<compile_context>
chip_gen: v7x
topology: tpu7x:2x2x1
jax: 0.10.0
libtpu: 0.0.40
codegen_flags: <defaults>
</compile_context>

<pallas_src>
import functools
import math

import jax
import jax.numpy as jnp
from jax import lax
from jax.experimental import pallas as pl
from jax.experimental.pallas import tpu as pltpu

# ----------------------- configuration (mirrors Diffusion.__init__ / DiffNet) ------------------
INPUT_DIM = 32            # input_dim  (upstream conditioning feature dim)
OUTPUT_DIM = 16           # output_dim (mel bins)
RESAMPLE_RATIO = 2        # integer nearest-neighbor upsampling ratio
RESIDUAL_CHANNELS = 128   # denoiser_residual_channels (DiffSinger default 256); 128 = lane-aligned
RESIDUAL_LAYERS = 4       # DiffSinger default 20; kept small for the demo
DILATION_CYCLE = 2
NUM_TIMESTEPS = 100
DILATIONS = tuple(2 ** (i % DILATION_CYCLE) for i in range(RESIDUAL_LAYERS))
OUT_PAD = 128             # lane-padded eps width (>= OUTPUT_DIM) so the last matmul is 128-wide
T_TILE = 256              # time tile: fills v6e/v7x MXU M dim (use 128 on v5e)

assert RESIDUAL_LAYERS % DILATION_CYCLE == 0, "layer loop assumes full dilation cycles"


def _round_up(x, m):
    return ((x + m - 1) // m) * m


# halo = receptive field of the full residual stack, rounded to a sublane multiple
HALO = _round_up(sum(DILATIONS), 8)

# linear beta schedule (DiffSinger-style)
_BETAS = jnp.linspace(1e-4, 0.06, NUM_TIMESTEPS, dtype=jnp.float32)
_ALPHAS_CUMPROD = jnp.cumprod(1.0 - _BETAS)
SQRT_AC = jnp.sqrt(_ALPHAS_CUMPROD)
SQRT_OMAC = jnp.sqrt(1.0 - _ALPHAS_CUMPROD)


# ----------------------------------------- Pallas kernel ---------------------------------------
def diffnet_kernel(coef_ref,                                   # SMEM (B, 2) f32
                   tgt_ref, noise_ref, cond_ref, dstep_ref,    # per-(batch, tile) VMEM blocks
                   w_in_ref, b_in_ref,
                   wdil_ref, bdil_ref, wc_ref, bc_ref,
                   wo_ref, bo_ref, ws_ref, bs_ref, wout_ref, bout_ref,
                   eps_ref,
                   *, t_total, t_tile, halo, dil_pattern, transpose_out):
    """One (batch, time-tile): q_sample + full DiffNet denoiser on a haloed window."""
    f32, bf16 = jnp.float32, jnp.bfloat16
    C = w_in_ref.shape[1]          # residual channels (128)
    L = wdil_ref.shape[0]          # residual layers
    W = tgt_ref.shape[2]           # window rows = t_tile + 2*halo

    b = pl.program_id(0)
    ti = pl.program_id(1)
    c0 = coef_ref[b, 0]            # sqrt(alpha_cumprod[t])       (SMEM scalar)
    c1 = coef_ref[b, 1]            # sqrt(1 - alpha_cumprod[t])   (SMEM scalar)

    # q_sample on the whole window (halo rows feed central rows through later layers)
    x_noisy = c0 * tgt_ref[0, 0] + c1 * noise_ref[0, 0]           # (W, M) f32

    # input_projection (1x1 conv == matmul) + ReLU
    x = jnp.dot(x_noisy.astype(bf16), w_in_ref[...],
                preferred_element_type=f32) + b_in_ref[...]
    x = jnp.maximum(x, 0.0)                                       # (W, C) f32

    cond_b16 = cond_ref[0, 0].astype(bf16)                        # (W, E)

    # global time index of every window row -> exact zero-padding at the TRUE sequence edges,
    # independent of the tile boundaries / padding garbage.
    row = lax.broadcasted_iota(jnp.int32, (W, 1), 0)              # hoisted (JAX won't CSE it)
    grow = row + (ti * t_tile - halo)

    inv_sqrt2 = 1.0 / math.sqrt(2.0)
    cycle = len(dil_pattern)

    def cycle_body(c, carry):
        x, skip = carry
        for j, d in enumerate(dil_pattern):        # static unroll over one dilation cycle
            l = c * cycle + j                      # dynamic leading-axis index into stacked weights
            y = x + dstep_ref[0, l]                # diffusion-step projection, (1, C) hoisted to glue

            # dilated conv (kernel=3, dilation=d, zero padding) via sublane roll + global masks:
            #   y_prev[t] = y[t-d] (0 if global t<d),  y_next[t] = y[t+d] (0 if global t>=T-d)
            y_prev = jnp.where(grow >= d, pltpu.roll(y, shift=d, axis=0), 0.0)
            y_next = jnp.where(grow < t_total - d, pltpu.roll(y, shift=W - d, axis=0), 0.0)
            y_cat = jnp.concatenate([y_prev, y, y_next], axis=-1).astype(bf16)   # (W, 3C)

            # conditioner projection computed per layer (no (T, L*2C) intermediate)
            cond_l = jnp.dot(cond_b16, wc_ref[l], preferred_element_type=f32) + bc_ref[l]
            # fused 3-tap dilated conv + conditioner add
            z = (jnp.dot(y_cat, wdil_ref[l], preferred_element_type=f32)
                 + bdil_ref[l] + cond_l)                          # (W, 2C)
            z = jax.nn.sigmoid(z[:, :C]) * jnp.tanh(z[:, C:])     # gate / filter (lane-aligned)

            out = jnp.dot(z.astype(bf16), wo_ref[l],
                          preferred_element_type=f32) + bo_ref[l]  # (W, 2C) residual / skip
            x = (x + out[:, :C]) * inv_sqrt2
            skip = skip + out[:, C:]
        return x, skip

    _, skip = lax.fori_loop(0, L // cycle, cycle_body, (x, jnp.zeros((W, C), f32)))

    # only the central t_tile rows are valid -> drop the halo before the 1x1 heads
    skip_c = skip[halo:halo + t_tile]                             # (t_tile, C), aligned slice
    h = jnp.dot(skip_c.astype(bf16), ws_ref[...],
                preferred_element_type=f32) + bs_ref[...]         # skip_projection (1/sqrt(L) folded)
    h = jnp.maximum(h, 0.0)
    eps = jnp.dot(h.astype(bf16), wout_ref[...],
                  preferred_element_type=f32) + bout_ref[...]     # (t_tile, OUT_PAD)

    if transpose_out:
        eps_ref[0] = jnp.transpose(eps)                           # (OUT_PAD, t_tile), lane-dense T
    else:
        eps_ref[0] = eps                                          # (t_tile, OUT_PAD)


def diffnet_pallas(coef, tgt, noise, cond, dstep, kparams):
    """coef:(B,2) f32, tgt/noise:(B,T,M) f32, cond:(B,T,E) f32, dstep:(B,L,1,C) f32 -> (B,M,T)."""
    B, T, M = tgt.shape

    # --- time tiling: short T collapses to one 8-aligned tile, long T uses 256-row tiles ---
    t_tile = _round_up(T, 8) if T <= T_TILE else T_TILE
    t_pad = _round_up(T, t_tile)
    n_tiles = t_pad // t_tile
    W = t_tile + 2 * HALO
    transpose_out = (t_tile % 128 == 0)   # lane-dense channel-major output only when aligned

    def windows(a):
        # (B, T, F) -> zero-pad time to [-HALO, t_pad+HALO) -> overlapping (B, n_tiles, W, F)
        p = jnp.pad(a, ((0, 0), (HALO, t_pad - T + HALO), (0, 0)))
        idx = jnp.arange(n_tiles)[:, None] * t_tile + jnp.arange(W)[None, :]
        return p[:, idx, :]

    tgt_w, noise_w, cond_w = windows(tgt), windows(noise), windows(cond)

    weights = (kparams["w_in"], kparams["b_in"], kparams["wdil"], kparams["bdil"],
               kparams["wc"], kparams["bc"], kparams["wo"], kparams["bo"],
               kparams["ws"], kparams["bs"], kparams["wout"], kparams["bout"])
    ins = (coef, tgt_w, noise_w, cond_w, dstep) + weights

    kernel = functools.partial(
        diffnet_kernel, t_total=T, t_tile=t_tile, halo=HALO,
        dil_pattern=tuple(2 ** i for i in range(DILATION_CYCLE)),
        transpose_out=transpose_out)

    def tile_spec(a):   # (B, n_tiles, W, F) -> one (1,1,W,F) window per (b, tile)
        return pl.BlockSpec((1, 1) + a.shape[2:], lambda b, i: (b, i, 0, 0))

    dstep_spec = pl.BlockSpec((1,) + dstep.shape[1:], lambda b, i: (b, 0, 0, 0))

    if transpose_out:
        out_shape = jax.ShapeDtypeStruct((B, OUT_PAD, t_pad), jnp.float32)
        out_spec = pl.BlockSpec((1, OUT_PAD, t_tile), lambda b, i: (b, 0, i))
    else:
        out_shape = jax.ShapeDtypeStruct((B, t_pad, OUT_PAD), jnp.float32)
        out_spec = pl.BlockSpec((1, t_tile, OUT_PAD), lambda b, i: (b, i, 0))

    def build(single_buffer_weights):
        def weight_spec(a):
            nd = a.ndim
            idx = lambda b, i, _nd=nd: (0,) * _nd
            if single_buffer_weights:
                # grid-invariant weights: one resident VMEM buffer, no double-buffering
                return pl.BlockSpec(a.shape, idx, pipeline_mode=pl.Buffered(1))
            return pl.BlockSpec(a.shape, idx)

        in_specs = ([pl.BlockSpec(memory_space=pltpu.MemorySpace.SMEM)]   # coef -> SMEM scalars
                    + [tile_spec(a) for a in (tgt_w, noise_w, cond_w)]
                    + [dstep_spec]
                    + [weight_spec(a) for a in weights])

        return pl.pallas_call(
            kernel,
            out_shape=out_shape,
            grid_spec=pltpu.PrefetchScalarGridSpec(
                num_scalar_prefetch=0,
                grid=(B, n_tiles),
                in_specs=in_specs,
                out_specs=out_spec),
            compiler_params=pltpu.CompilerParams(
                dimension_semantics=("parallel", "parallel"),  # B x tiles shards v7x megacore
                vmem_limit_bytes=48 * 1024 * 1024,             # fits v7x's 64 MiB; raise on v5e if helpful
            ))

    try:
        eps_pad = build(True)(*ins)
    except Exception:
        # pipeline_mode=pl.Buffered(1) not supported by this jax build -> default double-buffering
        eps_pad = build(False)(*ins)

    if transpose_out:
        return eps_pad[:, :M, :T]                               # already (B, M, T); slice only
    return jnp.transpose(eps_pad[:, :T, :M], (0, 2, 1))        # small-T path


# ----------------------------------------- JAX glue --------------------------------------------
def sinusoidal_pos_emb(t, dim):
    half = dim // 2
    scale = math.log(10000.0) / (half - 1)
    freqs = jnp.exp(jnp.arange(half, dtype=jnp.float32) * -scale)
    emb = t.astype(jnp.float32)[:, None] * freqs[None, :]
    return jnp.concatenate([jnp.sin(emb), jnp.cos(emb)], axis=-1)


def mish(x):
    return x * jnp.tanh(jax.nn.softplus(x))


def prepare_kernel_params(params):
    """Reshape / fold / cast weights into the kernel layout (bf16 matmul operands, f32 biases)."""
    C, L, M = RESIDUAL_CHANNELS, RESIDUAL_LAYERS, OUTPUT_DIM
    bf16 = jnp.bfloat16
    # NOTE: a real torch Conv1d checkpoint stores the dilated-conv weight as (2C, C, 3); it must
    # be permuted to tap-major (3, C, 2C) with tap order [t-d, t, t+d] before this reshape.
    wdil_cat = params["wdil"].reshape(L, 3 * C, 2 * C).astype(bf16)
    # pad output projection to 128 lanes so the last matmul / store are lane-dense
    wout_pad = jnp.zeros((C, OUT_PAD), jnp.float32).at[:, :M].set(params["wout"]).astype(bf16)
    bout_pad = jnp.zeros((1, OUT_PAD), jnp.float32).at[0, :M].set(params["bout"])
    return {
        "w_in": params["w_in"].astype(bf16), "b_in": params["b_in"][None, :],
        "wdil": wdil_cat,                    "bdil": params["bdil"][:, None, :],
        "wc": params["wc"].astype(bf16),     "bc": params["bc"][:, None, :],
        "wo": params["wo"].astype(bf16),     "bo": params["bo"][:, None, :],
        # fold the 1/sqrt(L) skip-sum normalization into the skip_projection weight (free)
        "ws": (params["ws"] / math.sqrt(float(L))).astype(bf16),
        "bs": params["bs"][None, :],
        "wout": wout_pad,                    "bout": bout_pad,
    }


def init_params(key):
    E, M, C, L = INPUT_DIM, OUTPUT_DIM, RESIDUAL_CHANNELS, RESIDUAL_LAYERS
    ks = jax.random.split(key, 18)

    def w(k, shape, scale=0.1):
        return scale * jax.random.normal(k, shape, jnp.float32)

    return {
        "w_in": w(ks[0], (M, C)),            "b_in": w(ks[1], (C,), 0.01),
        "wd":   w(ks[2], (L, C, C)),         "bd":   w(ks[3], (L, C), 0.01),
        "wc":   w(ks[4], (L, E, 2 * C)),     "bc":   w(ks[5], (L, 2 * C), 0.01),
        "wdil": w(ks[6], (L, 3, C, 2 * C)),  "bdil": w(ks[7], (L, 2 * C), 0.01),
        "wo":   w(ks[8], (L, C, 2 * C)),     "bo":   w(ks[9], (L, 2 * C), 0.01),
        "ws":   w(ks[10], (C, C)),           "bs":   w(ks[11], (C,), 0.01),
        "wout": w(ks[12], (C, M)),           "bout": w(ks[13], (M,), 0.01),
        # diffusion-step MLP (Linear -> Mish -> Linear); tiny, kept in glue
        "mlp_w1": w(ks[14], (C, 4 * C)),     "mlp_b1": w(ks[15], (4 * C,), 0.01),
        "mlp_w2": w(ks[16], (4 * C, C)),     "mlp_b2": w(ks[17], (C,), 0.01),
    }


def diffusion_forward(params, stats, x, lengths, targets=None, spk_embs=None, rng=None):
    """Mirrors Diffusion.forward (training path: targets is not None)."""
    B, Lin, _ = x.shape
    C, L = RESIDUAL_CHANNELS, RESIDUAL_LAYERS

    # x.permute(0,2,1) -> F.interpolate(scale_factor, mode='nearest') -> permute back
    Lout = int(math.floor(Lin * RESAMPLE_RATIO))
    src = jnp.floor(jnp.arange(Lout) / RESAMPLE_RATIO).astype(jnp.int32)
    x = x[:, src, :]
    lengths = lengths * RESAMPLE_RATIO

    if targets is None:
        # TODO(synk): inference-time reverse diffusion sampling (p_sample over all timesteps)
        # is not implemented; only the training path is translated.
        raise NotImplementedError("inference path not implemented")

    tgt = (targets - stats["mean"]) / stats["scale"]
    T = min(x.shape[1], tgt.shape[1])
    x = x[:, :T]
    tgt = tgt[:, :T]

    # GaussianDiffusion training step: sample t, noise; q_sample + denoise inside the kernel.
    k_t, k_n = jax.random.split(rng)
    t = jax.random.randint(k_t, (B,), 0, NUM_TIMESTEPS)
    noise = jax.random.normal(k_n, tgt.shape, dtype=jnp.float32)
    coef = jnp.stack([SQRT_AC[t], SQRT_OMAC[t]], axis=-1)                    # (B, 2) -> SMEM

    # diffusion-step embedding (sinusoidal + MLP) and per-layer step projections, hoisted to XLA
    demb = sinusoidal_pos_emb(t, C)
    demb = mish(demb @ params["mlp_w1"] + params["mlp_b1"]) @ params["mlp_w2"] + params["mlp_b2"]
    dstep = jnp.einsum("bc,lcd->bld", demb, params["wd"]) + params["bd"][None]   # (B, L, C)
    dstep = dstep[:, :, None, :]                                                 # (B, L, 1, C)

    kparams = prepare_kernel_params(params)
    eps_pred = diffnet_pallas(coef, tgt, noise, x, dstep, kparams)           # (B, M, T)

    # match torch output layout (B, 1, M, T)
    # TODO(synk): for very short T, packing several batch rows into one tile (per-row c0/c1)
    # would fill the MXU better than one program per (batch, tile).
    noise_out = jnp.transpose(noise, (0, 2, 1))[:, None]
    eps_out = eps_pred[:, None]
    return noise_out, eps_out, lengths


# ----------------------------------------- demo ------------------------------------------------
if __name__ == "__main__":
    key = jax.random.PRNGKey(0)
    kp, kx, kt, kr = jax.random.split(key, 4)

    params = init_params(kp)
    stats = {
        "mean": 0.1 * jnp.arange(OUTPUT_DIM, dtype=jnp.float32),
        "scale": 1.0 + 0.05 * jnp.arange(OUTPUT_DIM, dtype=jnp.float32),
    }

    B, Lin = 2, 8
    x = jax.random.normal(kx, (B, Lin, INPUT_DIM), jnp.float32)              # (B, Lmax, input_dim)
    lengths = jnp.array([8, 6], dtype=jnp.int32)                             # (B,)
    targets = jax.random.normal(kt, (B, Lin * RESAMPLE_RATIO, OUTPUT_DIM), jnp.float32)

    noise, eps_pred, new_lengths = diffusion_forward(params, stats, x, lengths, targets, rng=kr)
    jax.block_until_ready((noise, eps_pred, new_lengths))

    assert noise.shape == (B, 1, OUTPUT_DIM, Lin * RESAMPLE_RATIO)
    assert eps_pred.shape == (B, 1, OUTPUT_DIM, Lin * RESAMPLE_RATIO)
    assert new_lengths.shape == (B,)
    assert bool(jnp.all(jnp.isfinite(eps_pred)))
    print("KERNEL_OK")
</pallas_src>

<mosaic_0001>
module attributes {stable_mosaic.version = 11 : i64} {
  func.func @diffnet_kernel(%arg0: i32, %arg1: i32, %arg2: memref<2x2xf32, #tpu.memory_space<smem>>, %arg3: memref<1x1x32x16xf32, #tpu.memory_space<vmem>>, %arg4: memref<1x1x32x16xf32, #tpu.memory_space<vmem>>, %arg5: memref<1x1x32x32xf32, #tpu.memory_space<vmem>>, %arg6: memref<1x4x1x128xf32, #tpu.memory_space<vmem>>, %arg7: memref<16x128xbf16, #tpu.memory_space<vmem>>, %arg8: memref<1x128xf32, #tpu.memory_space<vmem>>, %arg9: memref<4x384x256xbf16, #tpu.memory_space<vmem>>, %arg10: memref<4x1x256xf32, #tpu.memory_space<vmem>>, %arg11: memref<4x32x256xbf16, #tpu.memory_space<vmem>>, %arg12: memref<4x1x256xf32, #tpu.memory_space<vmem>>, %arg13: memref<4x128x256xbf16, #tpu.memory_space<vmem>>, %arg14: memref<4x1x256xf32, #tpu.memory_space<vmem>>, %arg15: memref<128x128xbf16, #tpu.memory_space<vmem>>, %arg16: memref<1x128xf32, #tpu.memory_space<vmem>>, %arg17: memref<128x128xbf16, #tpu.memory_space<vmem>>, %arg18: memref<1x128xf32, #tpu.memory_space<vmem>>, %arg19: memref<1x16x128xf32, #tpu.memory_space<vmem>>) attributes {dimension_semantics = [#tpu.dimension_semantics<parallel>, #tpu.dimension_semantics<parallel>], iteration_bounds = array<i64: 2, 1>, scalar_prefetch = 0 : i64, scratch_operands = 0 : i64, tpu.core_type = #tpu.core_type<tc>, window_params = [{transform_indices = @transform_0, window_bounds = array<i64: 2, 2>}, {transform_indices = @transform_1, window_bounds = array<i64: 1, 1, 32, 16>}, {transform_indices = @transform_2, window_bounds = array<i64: 1, 1, 32, 16>}, {transform_indices = @transform_3, window_bounds = array<i64: 1, 1, 32, 32>}, {transform_indices = @transform_4, window_bounds = array<i64: 1, 4, 1, 128>}, {pipeline_mode = #tpu.pipeline_mode<synchronous>, transform_indices = @transform_5, window_bounds = array<i64: 16, 128>}, {pipeline_mode = #tpu.pipeline_mode<synchronous>, transform_indices = @transform_6, window_bounds = array<i64: 1, 128>}, {pipeline_mode = #tpu.pipeline_mode<synchronous>, transform_indices = @transform_7, window_bounds = array<i64: 4, 384, 256>}, {pipeline_mode = #tpu.pipeline_mode<synchronous>, transform_indices = @transform_8, window_bounds = array<i64: 4, 1, 256>}, {pipeline_mode = #tpu.pipeline_mode<synchronous>, transform_indices = @transform_9, window_bounds = array<i64: 4, 32, 256>}, {pipeline_mode = #tpu.pipeline_mode<synchronous>, transform_indices = @transform_10, window_bounds = array<i64: 4, 1, 256>}, {pipeline_mode = #tpu.pipeline_mode<synchronous>, transform_indices = @transform_11, window_bounds = array<i64: 4, 128, 256>}, {pipeline_mode = #tpu.pipeline_mode<synchronous>, transform_indices = @transform_12, window_bounds = array<i64: 4, 1, 256>}, {pipeline_mode = #tpu.pipeline_mode<synchronous>, transform_indices = @transform_13, window_bounds = array<i64: 128, 128>}, {pipeline_mode = #tpu.pipeline_mode<synchronous>, transform_indices = @transform_14, window_bounds = array<i64: 1, 128>}, {pipeline_mode = #tpu.pipeline_mode<synchronous>, transform_indices = @transform_15, window_bounds = array<i64: 128, 128>}, {pipeline_mode = #tpu.pipeline_mode<synchronous>, transform_indices = @transform_16, window_bounds = array<i64: 1, 128>}, {transform_indices = @transform_17, window_bounds = array<i64: 1, 16, 128>}]} {
    %0 = arith.index_cast %arg0 : i32 to index
    %c0 = arith.constant 0 : index
    %1 = memref.load %arg2[%0, %c0] : memref<2x2xf32, #tpu.memory_space<smem>>
    %2 = arith.index_cast %arg0 : i32 to index
    %c1 = arith.constant 1 : index
    %3 = memref.load %arg2[%2, %c1] : memref<2x2xf32, #tpu.memory_space<smem>>
    %c0_0 = arith.constant 0 : index
    %c0_1 = arith.constant 0 : index
    %c0_2 = arith.constant 0 : index
    %c0_3 = arith.constant 0 : index
    %4 = vector.load %arg3[%c0_0, %c0_1, %c0_2, %c0_3] : memref<1x1x32x16xf32, #tpu.memory_space<vmem>>, vector<1x1x32x16xf32>
    %5 = vector.shape_cast %4 : vector<1x1x32x16xf32> to vector<32x16xf32>
    %6 = vector.broadcast %1 : f32 to vector<32x16xf32>
    %7 = arith.mulf %6, %5 : vector<32x16xf32>
    %c0_4 = arith.constant 0 : index
    %c0_5 = arith.constant 0 : index
    %c0_6 = arith.constant 0 : index
    %c0_7 = arith.constant 0 : index
    %8 = vector.load %arg4[%c0_4, %c0_5, %c0_6, %c0_7] : memref<1x1x32x16xf32, #tpu.memory_space<vmem>>, vector<1x1x32x16xf32>
    %9 = vector.shape_cast %8 : vector<1x1x32x16xf32> to vector<32x16xf32>
    %10 = vector.broadcast %3 : f32 to vector<32x16xf32>
    %11 = arith.mulf %10, %9 : vector<32x16xf32>
    %12 = arith.addf %7, %11 : vector<32x16xf32>
    %13 = arith.truncf %12 : vector<32x16xf32> to vector<32x16xbf16>
    %c0_8 = arith.constant 0 : index
    %c0_9 = arith.constant 0 : index
    %14 = vector.load %arg7[%c0_8, %c0_9] : memref<16x128xbf16, #tpu.memory_space<vmem>>, vector<16x128xbf16>
    %cst = arith.constant dense<0.000000e+00> : vector<32x128xf32>
    %15 = tpu.matmul %13, %14, %cst {dimension_numbers = #tpu.dot_dimension_numbers<[1], [0], [0], [1], [0, 0, 1, 1], [], []>} : vector<32x16xbf16>, vector<16x128xbf16>, vector<32x128xf32> -> vector<32x128xf32>
    %c0_10 = arith.constant 0 : index
    %c0_11 = arith.constant 0 : index
    %16 = vector.load %arg8[%c0_10, %c0_11] : memref<1x128xf32, #tpu.memory_space<vmem>>, vector<1x128xf32>
    %17 = vector.broadcast %16 : vector<1x128xf32> to vector<32x128xf32>
    %18 = arith.addf %15, %17 : vector<32x128xf32>
    %cst_12 = arith.constant 0.000000e+00 : f32
    %19 = vector.broadcast %cst_12 : f32 to vector<32x128xf32>
    %20 = arith.maximumf %18, %19 : vector<32x128xf32>
    %c0_13 = arith.constant 0 : index
    %c0_14 = arith.constant 0 : index
    %c0_15 = arith.constant 0 : index
    %c0_16 = arith.constant 0 : index
    %21 = vector.load %arg5[%c0_13, %c0_14, %c0_15, %c0_16] : memref<1x1x32x32xf32, #tpu.memory_space<vmem>>, vector<1x1x32x32xf32>
    %22 = vector.shape_cast %21 : vector<1x1x32x32xf32> to vector<32x32xf32>
    %23 = arith.truncf %22 : vector<32x32xf32> to vector<32x32xbf16>
    %24 = tpu.iota {dimensions = array<i32: 0>} : vector<32x1xi32>
    %c16_i32 = arith.constant 16 : i32
    %25 = arith.muli %arg1, %c16_i32 : i32
    %c8_i32 = arith.constant 8 : i32
    %26 = arith.subi %25, %c8_i32 : i32
    %27 = vector.broadcast %26 : i32 to vector<32x1xi32>
    %28 = arith.addi %24, %27 : vector<32x1xi32>
    %cst_17 = arith.constant 0.000000e+00 : f32
    %29 = vector.broadcast %cst_17 : f32 to vector<32x128xf32>
    %c0_i32 = arith.constant 0 : i32
    %c2_i32 = arith.constant 2 : i32
    %30 = arith.addi %c0_i32, %c2_i32 : i32
    %c1_i32 = arith.constant 1 : i32
    %31:2 = scf.for %arg20 = %c0_i32 to %30 step %c1_i32 iter_args(%arg21 = %20, %arg22 = %29) -> (vector<32x128xf32>, vector<32x128xf32>)  : i32 {
      %c2_i32_33 = arith.constant 2 : i32
      %50 = arith.muli %arg20, %c2_i32_33 : i32
      %c0_i32_34 = arith.constant 0 : i32
      %51 = arith.addi %50, %c0_i32_34 : i32
      %c0_35 = arith.constant 0 : index
      %52 = arith.index_cast %51 : i32 to index
      %c0_36 = arith.constant 0 : index
      %c0_37 = arith.constant 0 : index
      %53 = vector.load %arg6[%c0_35, %52, %c0_36, %c0_37] : memref<1x4x1x128xf32, #tpu.memory_space<vmem>>, vector<1x1x1x128xf32>
      %54 = vector.shape_cast %53 : vector<1x1x1x128xf32> to vector<1x128xf32>
      %55 = vector.broadcast %54 : vector<1x128xf32> to vector<32x128xf32>
      %56 = arith.addf %arg21, %55 : vector<32x128xf32>
      %c1_i32_38 = arith.constant 1 : i32
      %57 = vector.broadcast %c1_i32_38 : i32 to vector<32x1xi32>
      %58 = arith.cmpi sge, %28, %57 : vector<32x1xi32>
      %c1_i32_39 = arith.constant 1 : i32
      %59 = tpu.dynamic_rotate %56 by %c1_i32_39 dim 0 : vector<32x128xf32>, i32 -> vector<32x128xf32>
      %cst_40 = arith.constant 0.000000e+00 : f32
      %60 = vector.shape_cast %58 : vector<32x1xi1> to vector<32x1xi1>
      %61 = vector.broadcast %60 : vector<32x1xi1> to vector<32x128xi1>
      %62 = vector.broadcast %cst_40 : f32 to vector<32x128xf32>
      %63 = arith.select %61, %59, %62 : vector<32x128xi1>, vector<32x128xf32>
      %c15_i32 = arith.constant 15 : i32
      %64 = vector.broadcast %c15_i32 : i32 to vector<32x1xi32>
      %65 = arith.cmpi slt, %28, %64 : vector<32x1xi32>
      %c31_i32 = arith.constant 31 : i32
      %66 = tpu.dynamic_rotate %56 by %c31_i32 dim 0 : vector<32x128xf32>, i32 -> vector<32x128xf32>
      %cst_41 = arith.constant 0.000000e+00 : f32
      %67 = vector.shape_cast %65 : vector<32x1xi1> to vector<32x1xi1>
      %68 = vector.broadcast %67 : vector<32x1xi1> to vector<32x128xi1>
      %69 = vector.broadcast %cst_41 : f32 to vector<32x128xf32>
      %70 = arith.select %68, %66, %69 : vector<32x128xi1>, vector<32x128xf32>
      %71 = tpu.concatenate %63, %56, %70 in 1 : vector<32x128xf32>, vector<32x128xf32>, vector<32x128xf32> -> vector<32x384xf32>
      %72 = arith.truncf %71 : vector<32x384xf32> to vector<32x384xbf16>
      %73 = arith.index_cast %51 : i32 to index
      %c0_42 = arith.constant 0 : index
      %c0_43 = arith.constant 0 : index
      %74 = vector.load %arg11[%73, %c0_42, %c0_43] : memref<4x32x256xbf16, #tpu.memory_space<vmem>>, vector<1x32x256xbf16>
      %75 = vector.shape_cast %74 : vector<1x32x256xbf16> to vector<32x256xbf16>
      %cst_44 = arith.constant dense<0.000000e+00> : vector<32x256xf32>
      %76 = tpu.matmul %23, %75, %cst_44 {dimension_numbers = #tpu.dot_dimension_numbers<[1], [0], [0], [1], [0, 0, 1, 1], [], []>} : vector<32x32xbf16>, vector<32x256xbf16>, vector<32x256xf32> -> vector<32x256xf32>
      %77 = arith.index_cast %51 : i32 to index
      %c0_45 = arith.constant 0 : index
      %c0_46 = arith.constant 0 : index
      %78 = vector.load %arg12[%77, %c0_45, %c0_46] : memref<4x1x256xf32, #tpu.memory_space<vmem>>, vector<1x1x256xf32>
      %79 = vector.shape_cast %78 : vector<1x1x256xf32> to vector<1x256xf32>
      %80 = vector.broadcast %79 : vector<1x256xf32> to vector<32x256xf32>
      %81 = arith.addf %76, %80 : vector<32x256xf32>
      %82 = arith.index_cast %51 : i32 to index
      %c0_47 = arith.constant 0 : index
      %c0_48 = arith.constant 0 : index
      %83 = vector.load %arg9[%82, %c0_47, %c0_48] : memref<4x384x256xbf16, #tpu.memory_space<vmem>>, vector<1x384x256xbf16>
      %84 = vector.shape_cast %83 : vector<1x384x256xbf16> to vector<384x256xbf16>
      %cst_49 = arith.constant dense<0.000000e+00> : vector<32x256xf32>
      %85 = tpu.matmul %72, %84, %cst_49 {dimension_numbers = #tpu.dot_dimension_numbers<[1], [0], [0], [1], [0, 0, 1, 1], [], []>} : vector<32x384xbf16>, vector<384x256xbf16>, vector<32x256xf32> -> vector<32x256xf32>
      %86 = arith.index_cast %51 : i32 to index
      %c0_50 = arith.constant 0 : index
      %c0_51 = arith.constant 0 : index
      %87 = vector.load %arg10[%86, %c0_50, %c0_51] : memref<4x1x256xf32, #tpu.memory_space<vmem>>, vector<1x1x256xf32>
      %88 = vector.shape_cast %87 : vector<1x1x256xf32> to vector<1x256xf32>
      %89 = vector.broadcast %88 : vector<1x256xf32> to vector<32x256xf32>
      %90 = arith.addf %85, %89 : vector<32x256xf32>
      %91 = arith.addf %90, %81 : vector<32x256xf32>
      %92 = vector.extract_strided_slice %91 {offsets = [0, 0], sizes = [32, 128], strides = [1, 1]} : vector<32x256xf32> to vector<32x128xf32>
      %93 = arith.negf %92 : vector<32x128xf32>
      %94 = math.exp %93 : vector<32x128xf32>
      %cst_52 = arith.constant 1.000000e+00 : f32
      %95 = vector.broadcast %cst_52 : f32 to vector<32x128xf32>
      %96 = arith.addf %95, %94 : vector<32x128xf32>
      %97 = arith.divf %95, %96 : vector<32x128xf32>
      %98 = vector.extract_strided_slice %91 {offsets = [0, 128], sizes = [32, 128], strides = [1, 1]} : vector<32x256xf32> to vector<32x128xf32>
      %99 = math.tanh %98 : vector<32x128xf32>
      %100 = arith.mulf %97, %99 : vector<32x128xf32>
      %101 = arith.truncf %100 : vector<32x128xf32> to vector<32x128xbf16>
      %102 = arith.index_cast %51 : i32 to index
      %c0_53 = arith.constant 0 : index
      %c0_54 = arith.constant 0 : index
      %103 = vector.load %arg13[%102, %c0_53, %c0_54] : memref<4x128x256xbf16, #tpu.memory_space<vmem>>, vector<1x128x256xbf16>
      %104 = vector.shape_cast %103 : vector<1x128x256xbf16> to vector<128x256xbf16>
      %cst_55 = arith.constant dense<0.000000e+00> : vector<32x256xf32>
      %105 = tpu.matmul %101, %104, %cst_55 {dimension_numbers = #tpu.dot_dimension_numbers<[1], [0], [0], [1], [0, 0, 1, 1], [], []>} : vector<32x128xbf16>, vector<128x256xbf16>, vector<32x256xf32> -> vector<32x256xf32>
      %106 = arith.index_cast %51 : i32 to index
      %c0_56 = arith.constant 0 : index
      %c0_57 = arith.constant 0 : index
      %107 = vector.load %arg14[%106, %c0_56, %c0_57] : memref<4x1x256xf32, #tpu.memory_space<vmem>>, vector<1x1x256xf32>
      %108 = vector.shape_cast %107 : vector<1x1x256xf32> to vector<1x256xf32>
      %109 = vector.broadcast %108 : vector<1x256xf32> to vector<32x256xf32>
      %110 = arith.addf %105, %109 : vector<32x256xf32>
      %111 = vector.extract_strided_slice %110 {offsets = [0, 0], sizes = [32, 128], strides = [1, 1]} : vector<32x256xf32> to vector<32x128xf32>
      %112 = arith.addf %arg21, %111 : vector<32x128xf32>
      %cst_58 = arith.constant 0.707106769 : f32
      %113 = vector.broadcast %cst_58 : f32 to vector<32x128xf32>
      %114 = arith.mulf %112, %113 : vector<32x128xf32>
      %115 = vector.extract_strided_slice %110 {offsets = [0, 128], sizes = [32, 128], strides = [1, 1]} : vector<32x256xf32> to vector<32x128xf32>
      %116 = arith.addf %arg22, %115 : vector<32x128xf32>
      %c2_i32_59 = arith.constant 2 : i32
      %117 = arith.muli %arg20, %c2_i32_59 : i32
      %c1_i32_60 = arith.constant 1 : i32
      %118 = arith.addi %117, %c1_i32_60 : i32
      %c0_61 = arith.constant 0 : index
      %119 = arith.index_cast %118 : i32 to index
      %c0_62 = arith.constant 0 : index
      %c0_63 = arith.constant 0 : index
      %120 = vector.load %arg6[%c0_61, %119, %c0_62, %c0_63] : memref<1x4x1x128xf32, #tpu.memory_space<vmem>>, vector<1x1x1x128xf32>
      %121 = vector.shape_cast %120 : vector<1x1x1x128xf32> to vector<1x128xf32>
      %122 = vector.broadcast %121 : vector<1x128xf32> to vector<32x128xf32>
      %123 = arith.addf %114, %122 : vector<32x128xf32>
      %c2_i32_64 = arith.constant 2 : i32
      %124 = vector.broadcast %c2_i32_64 : i32 to vector<32x1xi32>
      %125 = arith.cmpi sge, %28, %124 : vector<32x1xi32>
      %c2_i32_65 = arith.constant 2 : i32
      %126 = tpu.dynamic_rotate %123 by %c2_i32_65 dim 0 : vector<32x128xf32>, i32 -> vector<32x128xf32>
      %cst_66 = arith.constant 0.000000e+00 : f32
      %127 = vector.shape_cast %125 : vector<32x1xi1> to vector<32x1xi1>
      %128 = vector.broadcast %127 : vector<32x1xi1> to vector<32x128xi1>
      %129 = vector.broadcast %cst_66 : f32 to vector<32x128xf32>
      %130 = arith.select %128, %126, %129 : vector<32x128xi1>, vector<32x128xf32>
      %c14_i32 = arith.constant 14 : i32
      %131 = vector.broadcast %c14_i32 : i32 to vector<32x1xi32>
      %132 = arith.cmpi slt, %28, %131 : vector<32x1xi32>
      %c30_i32 = arith.constant 30 : i32
      %133 = tpu.dynamic_rotate %123 by %c30_i32 dim 0 : vector<32x128xf32>, i32 -> vector<32x128xf32>
      %cst_67 = arith.constant 0.000000e+00 : f32
      %134 = vector.shape_cast %132 : vector<32x1xi1> to vector<32x1xi1>
      %135 = vector.broadcast %134 : vector<32x1xi1> to vector<32x128xi1>
      %136 = vector.broadcast %cst_67 : f32 to vector<32x128xf32>
      %137 = arith.select %135, %133, %136 : vector<32x128xi1>, vector<32x128xf32>
      %138 = tpu.concatenate %130, %123, %137 in 1 : vector<32x128xf32>, vector<32x128xf32>, vector<32x128xf32> -> vector<32x384xf32>
      %139 = arith.truncf %138 : vector<32x384xf32> to vector<32x384xbf16>
      %140 = arith.index_cast %118 : i32 to index
      %c0_68 = arith.constant 0 : index
      %c0_69 = arith.constant 0 : index
      %141 = vector.load %arg11[%140, %c0_68, %c0_69] : memref<4x32x256xbf16, #tpu.memory_space<vmem>>, vector<1x32x256xbf16>
      %142 = vector.shape_cast %141 : vector<1x32x256xbf16> to vector<32x256xbf16>
      %cst_70 = arith.constant dense<0.000000e+00> : vector<32x256xf32>
      %143 = tpu.matmul %23, %142, %cst_70 {dimension_numbers = #tpu.dot_dimension_numbers<[1], [0], [0], [1], [0, 0, 1, 1], [], []>} : vector<32x32xbf16>, vector<32x256xbf16>, vector<32x256xf32> -> vector<32x256xf32>
      %144 = arith.index_cast %118 : i32 to index
      %c0_71 = arith.constant 0 : index
      %c0_72 = arith.constant 0 : index
      %145 = vector.load %arg12[%144, %c0_71, %c0_72] : memref<4x1x256xf32, #tpu.memory_space<vmem>>, vector<1x1x256xf32>
      %146 = vector.shape_cast %145 : vector<1x1x256xf32> to vector<1x256xf32>
      %147 = vector.broadcast %146 : vector<1x256xf32> to vector<32x256xf32>
      %148 = arith.addf %143, %147 : vector<32x256xf32>
      %149 = arith.index_cast %118 : i32 to index
      %c0_73 = arith.constant 0 : index
      %c0_74 = arith.constant 0 : index
      %150 = vector.load %arg9[%149, %c0_73, %c0_74] : memref<4x384x256xbf16, #tpu.memory_space<vmem>>, vector<1x384x256xbf16>
      %151 = vector.shape_cast %150 : vector<1x384x256xbf16> to vector<384x256xbf16>
      %cst_75 = arith.constant dense<0.000000e+00> : vector<32x256xf32>
      %152 = tpu.matmul %139, %151, %cst_75 {dimension_numbers = #tpu.dot_dimension_numbers<[1], [0], [0], [1], [0, 0, 1, 1], [], []>} : vector<32x384xbf16>, vector<384x256xbf16>, vector<32x256xf32> -> vector<32x256xf32>
      %153 = arith.index_cast %118 : i32 to index
      %c0_76 = arith.constant 0 : index
      %c0_77 = arith.constant 0 : index
      %154 = vector.load %arg10[%153, %c0_76, %c0_77] : memref<4x1x256xf32, #tpu.memory_space<vmem>>, vector<1x1x256xf32>
      %155 = vector.shape_cast %154 : vector<1x1x256xf32> to vector<1x256xf32>
      %156 = vector.broadcast %155 : vector<1x256xf32> to vector<32x256xf32>
      %157 = arith.addf %152, %156 : vector<32x256xf32>
      %158 = arith.addf %157, %148 : vector<32x256xf32>
      %159 = vector.extract_strided_slice %158 {offsets = [0, 0], sizes = [32, 128], strides = [1, 1]} : vector<32x256xf32> to vector<32x128xf32>
      %160 = arith.negf %159 : vector<32x128xf32>
      %161 = math.exp %160 : vector<32x128xf32>
      %cst_78 = arith.constant 1.000000e+00 : f32
      %162 = vector.broadcast %cst_78 : f32 to vector<32x128xf32>
      %163 = arith.addf %162, %161 : vector<32x128xf32>
      %164 = arith.divf %162, %163 : vector<32x128xf32>
      %165 = vector.extract_strided_slice %158 {offsets = [0, 128], sizes = [32, 128], strides = [1, 1]} : vector<32x256xf32> to vector<32x128xf32>
      %166 = math.tanh %165 : vector<32x128xf32>
      %167 = arith.mulf %164, %166 : vector<32x128xf32>
      %168 = arith.truncf %167 : vector<32x128xf32> to vector<32x128xbf16>
      %169 = arith.index_cast %118 : i32 to index
      %c0_79 = arith.constant 0 : index
      %c0_80 = arith.constant 0 : index
      %170 = vector.load %arg13[%169, %c0_79, %c0_80] : memref<4x128x256xbf16, #tpu.memory_space<vmem>>, vector<1x128x256xbf16>
      %171 = vector.shape_cast %170 : vector<1x128x256xbf16> to vector<128x256xbf16>
      %cst_81 = arith.constant dense<0.000000e+00> : vector<32x256xf32>
      %172 = tpu.matmul %168, %171, %cst_81 {dimension_numbers = #tpu.dot_dimension_numbers<[1], [0], [0], [1], [0, 0, 1, 1], [], []>} : vector<32x128xbf16>, vector<128x256xbf16>, vector<32x256xf32> -> vector<32x256xf32>
      %173 = arith.index_cast %118 : i32 to index
      %c0_82 = arith.constant 0 : index
      %c0_83 = arith.constant 0 : index
      %174 = vector.load %arg14[%173, %c0_82, %c0_83] : memref<4x1x256xf32, #tpu.memory_space<vmem>>, vector<1x1x256xf32>
      %175 = vector.shape_cast %174 : vector<1x1x256xf32> to vector<1x256xf32>
      %176 = vector.broadcast %175 : vector<1x256xf32> to vector<32x256xf32>
      %177 = arith.addf %172, %176 : vector<32x256xf32>
      %178 = vector.extract_strided_slice %177 {offsets = [0, 0], sizes = [32, 128], strides = [1, 1]} : vector<32x256xf32> to vector<32x128xf32>
      %179 = arith.addf %114, %178 : vector<32x128xf32>
      %cst_84 = arith.constant 0.707106769 : f32
      %180 = vector.broadcast %cst_84 : f32 to vector<32x128xf32>
      %181 = arith.mulf %179, %180 : vector<32x128xf32>
      %182 = vector.extract_strided_slice %177 {offsets = [0, 128], sizes = [32, 128], strides = [1, 1]} : vector<32x256xf32> to vector<32x128xf32>
      %183 = arith.addf %116, %182 : vector<32x128xf32>
      scf.yield %181, %183 : vector<32x128xf32>, vector<32x128xf32>
    }
    %c2_i32_18 = arith.constant 2 : i32
    %32 = vector.extract_strided_slice %31#1 {offsets = [8, 0], sizes = [16, 128], strides = [1, 1]} : vector<32x128xf32> to vector<16x128xf32>
    %33 = arith.truncf %32 : vector<16x128xf32> to vector<16x128xbf16>
    %c0_19 = arith.constant 0 : index
    %c0_20 = arith.constant 0 : index
    %34 = vector.load %arg15[%c0_19, %c0_20] : memref<128x128xbf16, #tpu.memory_space<vmem>>, vector<128x128xbf16>
    %cst_21 = arith.constant dense<0.000000e+00> : vector<16x128xf32>
    %35 = tpu.matmul %33, %34, %cst_21 {dimension_numbers = #tpu.dot_dimension_numbers<[1], [0], [0], [1], [0, 0, 1, 1], [], []>} : vector<16x128xbf16>, vector<128x128xbf16>, vector<16x128xf32> -> vector<16x128xf32>
    %c0_22 = arith.constant 0 : index
    %c0_23 = arith.constant 0 : index
    %36 = vector.load %arg16[%c0_22, %c0_23] : memref<1x128xf32, #tpu.memory_space<vmem>>, vector<1x128xf32>
    %37 = vector.broadcast %36 : vector<1x128xf32> to vector<16x128xf32>
    %38 = arith.addf %35, %37 : vector<16x128xf32>
    %cst_24 = arith.constant 0.000000e+00 : f32
    %39 = vector.broadcast %cst_24 : f32 to vector<16x128xf32>
    %40 = arith.maximumf %38, %39 : vector<16x128xf32>
    %41 = arith.truncf %40 : vector<16x128xf32> to vector<16x128xbf16>
    %c0_25 = arith.constant 0 : index
    %c0_26 = arith.constant 0 : index
    %42 = vector.load %arg17[%c0_25, %c0_26] : memref<128x128xbf16, #tpu.memory_space<vmem>>, vector<128x128xbf16>
    %cst_27 = arith.constant dense<0.000000e+00> : vector<16x128xf32>
    %43 = tpu.matmul %41, %42, %cst_27 {dimension_numbers = #tpu.dot_dimension_numbers<[1], [0], [0], [1], [0, 0, 1, 1], [], []>} : vector<16x128xbf16>, vector<128x128xbf16>, vector<16x128xf32> -> vector<16x128xf32>
    %c0_28 = arith.constant 0 : index
    %c0_29 = arith.constant 0 : index
    %44 = vector.load %arg18[%c0_28, %c0_29] : memref<1x128xf32, #tpu.memory_space<vmem>>, vector<1x128xf32>
    %45 = vector.broadcast %44 : vector<1x128xf32> to vector<16x128xf32>
    %46 = arith.addf %43, %45 : vector<16x128xf32>
    %c0_30 = arith.constant 0 : index
    %c0_31 = arith.constant 0 : index
    %c0_32 = arith.constant 0 : index
    %47 = vector.load %arg19[%c0_30, %c0_31, %c0_32] : memref<1x16x128xf32, #tpu.memory_space<vmem>>, vector<1x16x128xf32>
    %48 = vector.shape_cast %47 : vector<1x16x128xf32> to vector<16x128xf32>
    %49 = vector.shape_cast %46 : vector<16x128xf32> to vector<1x16x128xf32>
    tpu.vector_store %arg19[%c0_30, %c0_31, %c0_32], %49 {strides = array<i32>} : memref<1x16x128xf32, #tpu.memory_space<vmem>>, vector<1x16x128xf32>,
    return
  }
  func.func @transform_0(%arg0: i32, %arg1: i32) -> (i32, i32) {
    %c0_i32 = arith.constant 0 : i32
    %c0_i32_0 = arith.constant 0 : i32
    %c0_i32_1 = arith.constant 0 : i32
    return %c0_i32, %c0_i32_0 : i32, i32
  }
  func.func @transform_1(%arg0: i32, %arg1: i32) -> (i32, i32, i32, i32) {
    %c0_i32 = arith.constant 0 : i32
    %c0_i32_0 = arith.constant 0 : i32
    %c0_i32_1 = arith.constant 0 : i32
    return %arg0, %arg1, %c0_i32, %c0_i32_0 : i32, i32, i32, i32
  }
  func.func @transform_2(%arg0: i32, %arg1: i32) -> (i32, i32, i32, i32) {
    %c0_i32 = arith.constant 0 : i32
    %c0_i32_0 = arith.constant 0 : i32
    %c0_i32_1 = arith.constant 0 : i32
    return %arg0, %arg1, %c0_i32, %c0_i32_0 : i32, i32, i32, i32
  }
  func.func @transform_3(%arg0: i32, %arg1: i32) -> (i32, i32, i32, i32) {
    %c0_i32 = arith.constant 0 : i32
    %c0_i32_0 = arith.constant 0 : i32
    %c0_i32_1 = arith.constant 0 : i32
    return %arg0, %arg1, %c0_i32, %c0_i32_0 : i32, i32, i32, i32
  }
  func.func @transform_4(%arg0: i32, %arg1: i32) -> (i32, i32, i32, i32) {
    %c0_i32 = arith.constant 0 : i32
    %c0_i32_0 = arith.constant 0 : i32
    %c0_i32_1 = arith.constant 0 : i32
    %c0_i32_2 = arith.constant 0 : i32
    return %arg0, %c0_i32, %c0_i32_0, %c0_i32_1 : i32, i32, i32, i32
  }
  func.func @transform_5(%arg0: i32, %arg1: i32) -> (i32, i32) {
    %c0_i32 = arith.constant 0 : i32
    %c0_i32_0 = arith.constant 0 : i32
    %c0_i32_1 = arith.constant 0 : i32
    return %c0_i32, %c0_i32_0 : i32, i32
  }
  func.func @transform_6(%arg0: i32, %arg1: i32) -> (i32, i32) {
    %c0_i32 = arith.constant 0 : i32
    %c0_i32_0 = arith.constant 0 : i32
    %c0_i32_1 = arith.constant 0 : i32
    return %c0_i32, %c0_i32_0 : i32, i32
  }
  func.func @transform_7(%arg0: i32, %arg1: i32) -> (i32, i32, i32) {
    %c0_i32 = arith.constant 0 : i32
    %c0_i32_0 = arith.constant 0 : i32
    %c0_i32_1 = arith.constant 0 : i32
    %c0_i32_2 = arith.constant 0 : i32
    return %c0_i32, %c0_i32_0, %c0_i32_1 : i32, i32, i32
  }
  func.func @transform_8(%arg0: i32, %arg1: i32) -> (i32, i32, i32) {
    %c0_i32 = arith.constant 0 : i32
    %c0_i32_0 = arith.constant 0 : i32
    %c0_i32_1 = arith.constant 0 : i32
    %c0_i32_2 = arith.constant 0 : i32
    return %c0_i32, %c0_i32_0, %c0_i32_1 : i32, i32, i32
  }
  func.func @transform_9(%arg0: i32, %arg1: i32) -> (i32, i32, i32) {
    %c0_i32 = arith.constant 0 : i32
    %c0_i32_0 = arith.constant 0 : i32
    %c0_i32_1 = arith.constant 0 : i32
    %c0_i32_2 = arith.constant 0 : i32
    return %c0_i32, %c0_i32_0, %c0_i32_1 : i32, i32, i32
  }
  func.func @transform_10(%arg0: i32, %arg1: i32) -> (i32, i32, i32) {
    %c0_i32 = arith.constant 0 : i32
    %c0_i32_0 = arith.constant 0 : i32
    %c0_i32_1 = arith.constant 0 : i32
    %c0_i32_2 = arith.constant 0 : i32
    return %c0_i32, %c0_i32_0, %c0_i32_1 : i32, i32, i32
  }
  func.func @transform_11(%arg0: i32, %arg1: i32) -> (i32, i32, i32) {
    %c0_i32 = arith.constant 0 : i32
    %c0_i32_0 = arith.constant 0 : i32
    %c0_i32_1 = arith.constant 0 : i32
    %c0_i32_2 = arith.constant 0 : i32
    return %c0_i32, %c0_i32_0, %c0_i32_1 : i32, i32, i32
  }
  func.func @transform_12(%arg0: i32, %arg1: i32) -> (i32, i32, i32) {
    %c0_i32 = arith.constant 0 : i32
    %c0_i32_0 = arith.constant 0 : i32
    %c0_i32_1 = arith.constant 0 : i32
    %c0_i32_2 = arith.constant 0 : i32
    return %c0_i32, %c0_i32_0, %c0_i32_1 : i32, i32, i32
  }
  func.func @transform_13(%arg0: i32, %arg1: i32) -> (i32, i32) {
    %c0_i32 = arith.constant 0 : i32
    %c0_i32_0 = arith.constant 0 : i32
    %c0_i32_1 = arith.constant 0 : i32
    return %c0_i32, %c0_i32_0 : i32, i32
  }
  func.func @transform_14(%arg0: i32, %arg1: i32) -> (i32, i32) {
    %c0_i32 = arith.constant 0 : i32
    %c0_i32_0 = arith.constant 0 : i32
    %c0_i32_1 = arith.constant 0 : i32
    return %c0_i32, %c0_i32_0 : i32, i32
  }
  func.func @transform_15(%arg0: i32, %arg1: i32) -> (i32, i32) {
    %c0_i32 = arith.constant 0 : i32
    %c0_i32_0 = arith.constant 0 : i32
    %c0_i32_1 = arith.constant 0 : i32
    return %c0_i32, %c0_i32_0 : i32, i32
  }
  func.func @transform_16(%arg0: i32, %arg1: i32) -> (i32, i32) {
    %c0_i32 = arith.constant 0 : i32
    %c0_i32_0 = arith.constant 0 : i32
    %c0_i32_1 = arith.constant 0 : i32
    return %c0_i32, %c0_i32_0 : i32, i32
  }
  func.func @transform_17(%arg0: i32, %arg1: i32) -> (i32, i32, i32) {
    %c0_i32 = arith.constant 0 : i32
    %c0_i32_0 = arith.constant 0 : i32
    return %arg0, %arg1, %c0_i32 : i32, i32, i32
  }
}

module attributes {stable_mosaic.version = 11 : i64} {
  func.func @diffnet_kernel(%arg0: i32, %arg1: i32, %arg2: memref<2x2xf32, #tpu.memory_space<smem>>, %arg3: memref<1x1x32x16xf32, #tpu.memory_space<vmem>>, %arg4: memref<1x1x32x16xf32, #tpu.memory_space<vmem>>, %arg5: memref<1x1x32x32xf32, #tpu.memory_space<vmem>>, %arg6: memref<1x4x1x128xf32, #tpu.memory_space<vmem>>, %arg7: memref<16x128xbf16, #tpu.memory_space<vmem>>, %arg8: memref<1x128xf32, #tpu.memory_space<vmem>>, %arg9: memref<4x384x256xbf16, #tpu.memory_space<vmem>>, %arg10: memref<4x1x256xf32, #tpu.memory_space<vmem>>, %arg11: memref<4x32x256xbf16, #tpu.memory_space<vmem>>, %arg12: memref<4x1x256xf32, #tpu.memory_space<vmem>>, %arg13: memref<4x128x256xbf16, #tpu.memory_space<vmem>>, %arg14: memref<4x1x256xf32, #tpu.memory_space<vmem>>, %arg15: memref<128x128xbf16, #tpu.memory_space<vmem>>, %arg16: memref<1x128xf32, #tpu.memory_space<vmem>>, %arg17: memref<128x128xbf16, #tpu.memory_space<vmem>>, %arg18: memref<1x128xf32, #tpu.memory_space<vmem>>, %arg19: memref<1x16x128xf32, #tpu.memory_space<vmem>>) attributes {dimension_semantics = [#tpu.dimension_semantics<parallel>, #tpu.dimension_semantics<parallel>], iteration_bounds = array<i64: 2, 1>, scalar_prefetch = 0 : i64, scratch_operands = 0 : i64, tpu.core_type = #tpu.core_type<tc>, window_params = [{transform_indices = @transform_0, window_bounds = array<i64: 2, 2>}, {transform_indices = @transform_1, window_bounds = array<i64: 1, 1, 32, 16>}, {transform_indices = @transform_2, window_bounds = array<i64: 1, 1, 32, 16>}, {transform_indices = @transform_3, window_bounds = array<i64: 1, 1, 32, 32>}, {transform_indices = @transform_4, window_bounds = array<i64: 1, 4, 1, 128>}, {pipeline_mode = #tpu.pipeline_mode<synchronous>, transform_indices = @transform_5, window_bounds = array<i64: 16, 128>}, {pipeline_mode = #tpu.pipeline_mode<synchronous>, transform_indices = @transform_6, window_bounds = array<i64: 1, 128>}, {pipeline_mode = #tpu.pipeline_mode<synchronous>, transform_indices = @transform_7, window_bounds = array<i64: 4, 384, 256>}, {pipeline_mode = #tpu.pipeline_mode<synchronous>, transform_indices = @transform_8, window_bounds = array<i64: 4, 1, 256>}, {pipeline_mode = #tpu.pipeline_mode<synchronous>, transform_indices = @transform_9, window_bounds = array<i64: 4, 32, 256>}, {pipeline_mode = #tpu.pipeline_mode<synchronous>, transform_indices = @transform_10, window_bounds = array<i64: 4, 1, 256>}, {pipeline_mode = #tpu.pipeline_mode<synchronous>, transform_indices = @transform_11, window_bounds = array<i64: 4, 128, 256>}, {pipeline_mode = #tpu.pipeline_mode<synchronous>, transform_indices = @transform_12, window_bounds = array<i64: 4, 1, 256>}, {pipeline_mode = #tpu.pipeline_mode<synchronous>, transform_indices = @transform_13, window_bounds = array<i64: 128, 128>}, {pipeline_mode = #tpu.pipeline_mode<synchronous>, transform_indices = @transform_14, window_bounds = array<i64: 1, 128>}, {pipeline_mode = #tpu.pipeline_mode<synchronous>, transform_indices = @transform_15, window_bounds = array<i64: 128, 128>}, {pipeline_mode = #tpu.pipeline_mode<synchronous>, transform_indices = @transform_16, window_bounds = array<i64: 1, 128>}, {transform_indices = @transform_17, window_bounds = array<i64: 1, 16, 128>}]} {
    %0 = arith.index_cast %arg0 : i32 to index
    %c0 = arith.constant 0 : index
    %1 = memref.load %arg2[%0, %c0] : memref<2x2xf32, #tpu.memory_space<smem>>
    %2 = arith.index_cast %arg0 : i32 to index
    %c1 = arith.constant 1 : index
    %3 = memref.load %arg2[%2, %c1] : memref<2x2xf32, #tpu.memory_space<smem>>
    %c0_0 = arith.constant 0 : index
    %c0_1 = arith.constant 0 : index
    %c0_2 = arith.constant 0 : index
    %c0_3 = arith.constant 0 : index
    %4 = vector.load %arg3[%c0_0, %c0_1, %c0_2, %c0_3] : memref<1x1x32x16xf32, #tpu.memory_space<vmem>>, vector<1x1x32x16xf32>
    %5 = vector.shape_cast %4 : vector<1x1x32x16xf32> to vector<32x16xf32>
    %6 = vector.broadcast %1 : f32 to vector<32x16xf32>
    %7 = arith.mulf %6, %5 : vector<32x16xf32>
    %c0_4 = arith.constant 0 : index
    %c0_5 = arith.constant 0 : index
    %c0_6 = arith.constant 0 : index
    %c0_7 = arith.constant 0 : index
    %8 = vector.load %arg4[%c0_4, %c0_5, %c0_6, %c0_7] : memref<1x1x32x16xf32, #tpu.memory_space<vmem>>, vector<1x1x32x16xf32>
    %9 = vector.shape_cast %8 : vector<1x1x32x16xf32> to vector<32x16xf32>
    %10 = vector.broadcast %3 : f32 to vector<32x16xf32>
    %11 = arith.mulf %10, %9 : vector<32x16xf32>
    %12 = arith.addf %7, %11 : vector<32x16xf32>
    %13 = arith.truncf %12 : vector<32x16xf32> to vector<32x16xbf16>
    %c0_8 = arith.constant 0 : index
    %c0_9 = arith.constant 0 : index
    %14 = vector.load %arg7[%c0_8, %c0_9] : memref<16x128xbf16, #tpu.memory_space<vmem>>, vector<16x128xbf16>
    %cst = arith.constant dense<0.000000e+00> : vector<32x128xf32>
    %15 = tpu.matmul %13, %14, %cst {dimension_numbers = #tpu.dot_dimension_numbers<[1], [0], [0], [1], [0, 0, 1, 1], [], []>} : vector<32x16xbf16>, vector<16x128xbf16>, vector<32x128xf32> -> vector<32x128xf32>
    %c0_10 = arith.constant 0 : index
    %c0_11 = arith.constant 0 : index
    %16 = vector.load %arg8[%c0_10, %c0_11] : memref<1x128xf32, #tpu.memory_space<vmem>>, vector<1x128xf32>
    %17 = vector.broadcast %16 : vector<1x128xf32> to vector<32x128xf32>
    %18 = arith.addf %15, %17 : vector<32x128xf32>
    %cst_12 = arith.constant 0.000000e+00 : f32
    %19 = vector.broadcast %cst_12 : f32 to vector<32x128xf32>
    %20 = arith.maximumf %18, %19 : vector<32x128xf32>
    %c0_13 = arith.constant 0 : index
    %c0_14 = arith.constant 0 : index
    %c0_15 = arith.constant 0 : index
    %c0_16 = arith.constant 0 : index
    %21 = vector.load %arg5[%c0_13, %c0_14, %c0_15, %c0_16] : memref<1x1x32x32xf32, #tpu.memory_space<vmem>>, vector<1x1x32x32xf32>
    %22 = vector.shape_cast %21 : vector<1x1x32x32xf32> to vector<32x32xf32>
    %23 = arith.truncf %22 : vector<32x32xf32> to vector<32x32xbf16>
    %24 = tpu.iota {dimensions = array<i32: 0>} : vector<32x1xi32>
    %c16_i32 = arith.constant 16 : i32
    %25 = arith.muli %arg1, %c16_i32 : i32
    %c8_i32 = arith.constant 8 : i32
    %26 = arith.subi %25, %c8_i32 : i32
    %27 = vector.broadcast %26 : i32 to vector<32x1xi32>
    %28 = arith.addi %24, %27 : vector<32x1xi32>
    %cst_17 = arith.constant 0.000000e+00 : f32
    %29 = vector.broadcast %cst_17 : f32 to vector<32x128xf32>
    %c0_i32 = arith.constant 0 : i32
    %c2_i32 = arith.constant 2 : i32
    %30 = arith.addi %c0_i32, %c2_i32 : i32
    %c1_i32 = arith.constant 1 : i32
    %31:2 = scf.for %arg20 = %c0_i32 to %30 step %c1_i32 iter_args(%arg21 = %20, %arg22 = %29) -> (vector<32x128xf32>, vector<32x128xf32>)  : i32 {
      %c2_i32_33 = arith.constant 2 : i32
      %50 = arith.muli %arg20, %c2_i32_33 : i32
      %c0_i32_34 = arith.constant 0 : i32
      %51 = arith.addi %50, %c0_i32_34 : i32
      %c0_35 = arith.constant 0 : index
      %52 = arith.index_cast %51 : i32 to index
      %c0_36 = arith.constant 0 : index
      %c0_37 = arith.constant 0 : index
      %53 = vector.load %arg6[%c0_35, %52, %c0_36, %c0_37] : memref<1x4x1x128xf32, #tpu.memory_space<vmem>>, vector<1x1x1x128xf32>
      %54 = vector.shape_cast %53 : vector<1x1x1x128xf32> to vector<1x128xf32>
      %55 = vector.broadcast %54 : vector<1x128xf32> to vector<32x128xf32>
      %56 = arith.addf %arg21, %55 : vector<32x128xf32>
      %c1_i32_38 = arith.constant 1 : i32
      %57 = vector.broadcast %c1_i32_38 : i32 to vector<32x1xi32>
      %58 = arith.cmpi sge, %28, %57 : vector<32x1xi32>
      %c1_i32_39 = arith.constant 1 : i32
      %59 = tpu.dynamic_rotate %56 by %c1_i32_39 dim 0 : vector<32x128xf32>, i32 -> vector<32x128xf32>
      %cst_40 = arith.constant 0.000000e+00 : f32
      %60 = vector.shape_cast %58 : vector<32x1xi1> to vector<32x1xi1>
      %61 = vector.broadcast %60 : vector<32x1xi1> to vector<32x128xi1>
      %62 = vector.broadcast %cst_40 : f32 to vector<32x128xf32>
      %63 = arith.select %61, %59, %62 : vector<32x128xi1>, vector<32x128xf32>
      %c15_i32 = arith.constant 15 : i32
      %64 = vector.broadcast %c15_i32 : i32 to vector<32x1xi32>
      %65 = arith.cmpi slt, %28, %64 : vector<32x1xi32>
      %c31_i32 = arith.constant 31 : i32
      %66 = tpu.dynamic_rotate %56 by %c31_i32 dim 0 : vector<32x128xf32>, i32 -> vector<32x128xf32>
      %cst_41 = arith.constant 0.000000e+00 : f32
      %67 = vector.shape_cast %65 : vector<32x1xi1> to vector<32x1xi1>
      %68 = vector.broadcast %67 : vector<32x1xi1> to vector<32x128xi1>
      %69 = vector.broadcast %cst_41 : f32 to vector<32x128xf32>
      %70 = arith.select %68, %66, %69 : vector<32x128xi1>, vector<32x128xf32>
      %71 = tpu.concatenate %63, %56, %70 in 1 : vector<32x128xf32>, vector<32x128xf32>, vector<32x128xf32> -> vector<32x384xf32>
      %72 = arith.truncf %71 : vector<32x384xf32> to vector<32x384xbf16>
      %73 = arith.index_cast %51 : i32 to index
      %c0_42 = arith.constant 0 : index
      %c0_43 = arith.constant 0 : index
      %74 = vector.load %arg11[%73, %c0_42, %c0_43] : memref<4x32x256xbf16, #tpu.memory_space<vmem>>, vector<1x32x256xbf16>
      %75 = vector.shape_cast %74 : vector<1x32x256xbf16> to vector<32x256xbf16>
      %cst_44 = arith.constant dense<0.000000e+00> : vector<32x256xf32>
      %76 = tpu.matmul %23, %75, %cst_44 {dimension_numbers = #tpu.dot_dimension_numbers<[1], [0], [0], [1], [0, 0, 1, 1], [], []>} : vector<32x32xbf16>, vector<32x256xbf16>, vector<32x256xf32> -> vector<32x256xf32>
      %77 = arith.index_cast %51 : i32 to index
      %c0_45 = arith.constant 0 : index
      %c0_46 = arith.constant 0 : index
      %78 = vector.load %arg12[%77, %c0_45, %c0_46] : memref<4x1x256xf32, #tpu.memory_space<vmem>>, vector<1x1x256xf32>
      %79 = vector.shape_cast %78 : vector<1x1x256xf32> to vector<1x256xf32>
      %80 = vector.broadcast %79 : vector<1x256xf32> to vector<32x256xf32>
      %81 = arith.addf %76, %80 : vector<32x256xf32>
      %82 = arith.index_cast %51 : i32 to index
      %c0_47 = arith.constant 0 : index
      %c0_48 = arith.constant 0 : index
      %83 = vector.load %arg9[%82, %c0_47, %c0_48] : memref<4x384x256xbf16, #tpu.memory_space<vmem>>, vector<1x384x256xbf16>
      %84 = vector.shape_cast %83 : vector<1x384x256xbf16> to vector<384x256xbf16>
      %cst_49 = arith.constant dense<0.000000e+00> : vector<32x256xf32>
      %85 = tpu.matmul %72, %84, %cst_49 {dimension_numbers = #tpu.dot_dimension_numbers<[1], [0], [0], [1], [0, 0, 1, 1], [], []>} : vector<32x384xbf16>, vector<384x256xbf16>, vector<32x256xf32> -> vector<32x256xf32>
      %86 = arith.index_cast %51 : i32 to index
      %c0_50 = arith.constant 0 : index
      %c0_51 = arith.constant 0 : index
      %87 = vector.load %arg10[%86, %c0_50, %c0_51] : memref<4x1x256xf32, #tpu.memory_space<vmem>>, vector<1x1x256xf32>
      %88 = vector.shape_cast %87 : vector<1x1x256xf32> to vector<1x256xf32>
      %89 = vector.broadcast %88 : vector<1x256xf32> to vector<32x256xf32>
      %90 = arith.addf %85, %89 : vector<32x256xf32>
      %91 = arith.addf %90, %81 : vector<32x256xf32>
      %92 = vector.extract_strided_slice %91 {offsets = [0, 0], sizes = [32, 128], strides = [1, 1]} : vector<32x256xf32> to vector<32x128xf32>
      %93 = arith.negf %92 : vector<32x128xf32>
      %94 = math.exp %93 : vector<32x128xf32>
      %cst_52 = arith.constant 1.000000e+00 : f32
      %95 = vector.broadcast %cst_52 : f32 to vector<32x128xf32>
      %96 = arith.addf %95, %94 : vector<32x128xf32>
      %97 = arith.divf %95, %96 : vector<32x128xf32>
      %98 = vector.extract_strided_slice %91 {offsets = [0, 128], sizes = [32, 128], strides = [1, 1]} : vector<32x256xf32> to vector<32x128xf32>
      %99 = math.tanh %98 : vector<32x128xf32>
      %100 = arith.mulf %97, %99 : vector<32x128xf32>
      %101 = arith.truncf %100 : vector<32x128xf32> to vector<32x128xbf16>
      %102 = arith.index_cast %51 : i32 to index
      %c0_53 = arith.constant 0 : index
      %c0_54 = arith.constant 0 : index
      %103 = vector.load %arg13[%102, %c0_53, %c0_54] : memref<4x128x256xbf16, #tpu.memory_space<vmem>>, vector<1x128x256xbf16>
      %104 = vector.shape_cast %103 : vector<1x128x256xbf16> to vector<128x256xbf16>
      %cst_55 = arith.constant dense<0.000000e+00> : vector<32x256xf32>
      %105 = tpu.matmul %101, %104, %cst_55 {dimension_numbers = #tpu.dot_dimension_numbers<[1], [0], [0], [1], [0, 0, 1, 1], [], []>} : vector<32x128xbf16>, vector<128x256xbf16>, vector<32x256xf32> -> vector<32x256xf32>
      %106 = arith.index_cast %51 : i32 to index
      %c0_56 = arith.constant 0 : index
      %c0_57 = arith.constant 0 : index
      %107 = vector.load %arg14[%106, %c0_56, %c0_57] : memref<4x1x256xf32, #tpu.memory_space<vmem>>, vector<1x1x256xf32>
      %108 = vector.shape_cast %107 : vector<1x1x256xf32> to vector<1x256xf32>
      %109 = vector.broadcast %108 : vector<1x256xf32> to vector<32x256xf32>
      %110 = arith.addf %105, %109 : vector<32x256xf32>
      %111 = vector.extract_strided_slice %110 {offsets = [0, 0], sizes = [32, 128], strides = [1, 1]} : vector<32x256xf32> to vector<32x128xf32>
      %112 = arith.addf %arg21, %111 : vector<32x128xf32>
      %cst_58 = arith.constant 0.707106769 : f32
      %113 = vector.broadcast %cst_58 : f32 to vector<32x128xf32>
      %114 = arith.mulf %112, %113 : vector<32x128xf32>
      %115 = vector.extract_strided_slice %110 {offsets = [0, 128], sizes = [32, 128], strides = [1, 1]} : vector<32x256xf32> to vector<32x128xf32>
      %116 = arith.addf %arg22, %115 : vector<32x128xf32>
      %c2_i32_59 = arith.constant 2 : i32
      %117 = arith.muli %arg20, %c2_i32_59 : i32
      %c1_i32_60 = arith.constant 1 : i32
      %118 = arith.addi %117, %c1_i32_60 : i32
      %c0_61 = arith.constant 0 : index
      %119 = arith.index_cast %118 : i32 to index
      %c0_62 = arith.constant 0 : index
      %c0_63 = arith.constant 0 : index
      %120 = vector.load %arg6[%c0_61, %119, %c0_62, %c0_63] : memref<1x4x1x128xf32, #tpu.memory_space<vmem>>, vector<1x1x1x128xf32>
      %121 = vector.shape_cast %120 : vector<1x1x1x128xf32> to vector<1x128xf32>
      %122 = vector.broadcast %121 : vector<1x128xf32> to vector<32x128xf32>
      %123 = arith.addf %114, %122 : vector<32x128xf32>
      %c2_i32_64 = arith.constant 2 : i32
      %124 = vector.broadcast %c2_i32_64 : i32 to vector<32x1xi32>
      %125 = arith.cmpi sge, %28, %124 : vector<32x1xi32>
      %c2_i32_65 = arith.constant 2 : i32
      %126 = tpu.dynamic_rotate %123 by %c2_i32_65 dim 0 : vector<32x128xf32>, i32 -> vector<32x128xf32>
      %cst_66 = arith.constant 0.000000e+00 : f32
      %127 = vector.shape_cast %125 : vector<32x1xi1> to vector<32x1xi1>
      %128 = vector.broadcast %127 : vector<32x1xi1> to vector<32x128xi1>
      %129 = vector.broadcast %cst_66 : f32 to vector<32x128xf32>
      %130 = arith.select %128, %126, %129 : vector<32x128xi1>, vector<32x128xf32>
      %c14_i32 = arith.constant 14 : i32
      %131 = vector.broadcast %c14_i32 : i32 to vector<32x1xi32>
      %132 = arith.cmpi slt, %28, %131 : vector<32x1xi32>
      %c30_i32 = arith.constant 30 : i32
      %133 = tpu.dynamic_rotate %123 by %c30_i32 dim 0 : vector<32x128xf32>, i32 -> vector<32x128xf32>
      %cst_67 = arith.constant 0.000000e+00 : f32
      %134 = vector.shape_cast %132 : vector<32x1xi1> to vector<32x1xi1>
      %135 = vector.broadcast %134 : vector<32x1xi1> to vector<32x128xi1>
      %136 = vector.broadcast %cst_67 : f32 to vector<32x128xf32>
      %137 = arith.select %135, %133, %136 : vector<32x128xi1>, vector<32x128xf32>
      %138 = tpu.concatenate %130, %123, %137 in 1 : vector<32x128xf32>, vector<32x128xf32>, vector<32x128xf32> -> vector<32x384xf32>
      %139 = arith.truncf %138 : vector<32x384xf32> to vector<32x384xbf16>
      %140 = arith.index_cast %118 : i32 to index
      %c0_68 = arith.constant 0 : index
      %c0_69 = arith.constant 0 : index
      %141 = vector.load %arg11[%140, %c0_68, %c0_69] : memref<4x32x256xbf16, #tpu.memory_space<vmem>>, vector<1x32x256xbf16>
      %142 = vector.shape_cast %141 : vector<1x32x256xbf16> to vector<32x256xbf16>
      %cst_70 = arith.constant dense<0.000000e+00> : vector<32x256xf32>
      %143 = tpu.matmul %23, %142, %cst_70 {dimension_numbers = #tpu.dot_dimension_numbers<[1], [0], [0], [1], [0, 0, 1, 1], [], []>} : vector<32x32xbf16>, vector<32x256xbf16>, vector<32x256xf32> -> vector<32x256xf32>
      %144 = arith.index_cast %118 : i32 to index
      %c0_71 = arith.constant 0 : index
      %c0_72 = arith.constant 0 : index
      %145 = vector.load %arg12[%144, %c0_71, %c0_72] : memref<4x1x256xf32, #tpu.memory_space<vmem>>, vector<1x1x256xf32>
      %146 = vector.shape_cast %145 : vector<1x1x256xf32> to vector<1x256xf32>
      %147 = vector.broadcast %146 : vector<1x256xf32> to vector<32x256xf32>
      %148 = arith.addf %143, %147 : vector<32x256xf32>
      %149 = arith.index_cast %118 : i32 to index
      %c0_73 = arith.constant 0 : index
      %c0_74 = arith.constant 0 : index
      %150 = vector.load %arg9[%149, %c0_73, %c0_74] : memref<4x384x256xbf16, #tpu.memory_space<vmem>>, vector<1x384x256xbf16>
      %151 = vector.shape_cast %150 : vector<1x384x256xbf16> to vector<384x256xbf16>
      %cst_75 = arith.constant dense<0.000000e+00> : vector<32x256xf32>
      %152 = tpu.matmul %139, %151, %cst_75 {dimension_numbers = #tpu.dot_dimension_numbers<[1], [0], [0], [1], [0, 0, 1, 1], [], []>} : vector<32x384xbf16>, vector<384x256xbf16>, vector<32x256xf32> -> vector<32x256xf32>
      %153 = arith.index_cast %118 : i32 to index
      %c0_76 = arith.constant 0 : index
      %c0_77 = arith.constant 0 : index
      %154 = vector.load %arg10[%153, %c0_76, %c0_77] : memref<4x1x256xf32, #tpu.memory_space<vmem>>, vector<1x1x256xf32>
      %155 = vector.shape_cast %154 : vector<1x1x256xf32> to vector<1x256xf32>
      %156 = vector.broadcast %155 : vector<1x256xf32> to vector<32x256xf32>
      %157 = arith.addf %152, %156 : vector<32x256xf32>
      %158 = arith.addf %157, %148 : vector<32x256xf32>
      %159 = vector.extract_strided_slice %158 {offsets = [0, 0], sizes = [32, 128], strides = [1, 1]} : vector<32x256xf32> to vector<32x128xf32>
      %160 = arith.negf %159 : vector<32x128xf32>
      %161 = math.exp %160 : vector<32x128xf32>
      %cst_78 = arith.constant 1.000000e+00 : f32
      %162 = vector.broadcast %cst_78 : f32 to vector<32x128xf32>
      %163 = arith.addf %162, %161 : vector<32x128xf32>
      %164 = arith.divf %162, %163 : vector<32x128xf32>
      %165 = vector.extract_strided_slice %158 {offsets = [0, 128], sizes = [32, 128], strides = [1, 1]} : vector<32x256xf32> to vector<32x128xf32>
      %166 = math.tanh %165 : vector<32x128xf32>
      %167 = arith.mulf %164, %166 : vector<32x128xf32>
      %168 = arith.truncf %167 : vector<32x128xf32> to vector<32x128xbf16>
      %169 = arith.index_cast %118 : i32 to index
      %c0_79 = arith.constant 0 : index
      %c0_80 = arith.constant 0 : index
      %170 = vector.load %arg13[%169, %c0_79, %c0_80] : memref<4x128x256xbf16, #tpu.memory_space<vmem>>, vector<1x128x256xbf16>
      %171 = vector.shape_cast %170 : vector<1x128x256xbf16> to vector<128x256xbf16>
      %cst_81 = arith.constant dense<0.000000e+00> : vector<32x256xf32>
      %172 = tpu.matmul %168, %171, %cst_81 {dimension_numbers = #tpu.dot_dimension_numbers<[1], [0], [0], [1], [0, 0, 1, 1], [], []>} : vector<32x128xbf16>, vector<128x256xbf16>, vector<32x256xf32> -> vector<32x256xf32>
      %173 = arith.index_cast %118 : i32 to index
      %c0_82 = arith.constant 0 : index
      %c0_83 = arith.constant 0 : index
      %174 = vector.load %arg14[%173, %c0_82, %c0_83] : memref<4x1x256xf32, #tpu.memory_space<vmem>>, vector<1x1x256xf32>
      %175 = vector.shape_cast %174 : vector<1x1x256xf32> to vector<1x256xf32>
      %176 = vector.broadcast %175 : vector<1x256xf32> to vector<32x256xf32>
      %177 = arith.addf %172, %176 : vector<32x256xf32>
      %178 = vector.extract_strided_slice %177 {offsets = [0, 0], sizes = [32, 128], strides = [1, 1]} : vector<32x256xf32> to vector<32x128xf32>
      %179 = arith.addf %114, %178 : vector<32x128xf32>
      %cst_84 = arith.constant 0.707106769 : f32
      %180 = vector.broadcast %cst_84 : f32 to vector<32x128xf32>
      %181 = arith.mulf %179, %180 : vector<32x128xf32>
      %182 = vector.extract_strided_slice %177 {offsets = [0, 128], sizes = [32, 128], strides = [1, 1]} : vector<32x256xf32> to vector<32x128xf32>
      %183 = arith.addf %116, %182 : vector<32x128xf32>
      scf.yield %181, %183 : vector<32x128xf32>, vector<32x128xf32>
    }
    %c2_i32_18 = arith.constant 2 : i32
    %32 = vector.extract_strided_slice %31#1 {offsets = [8, 0], sizes = [16, 128], strides = [1, 1]} : vector<32x128xf32> to vector<16x128xf32>
    %33 = arith.truncf %32 : vector<16x128xf32> to vector<16x128xbf16>
    %c0_19 = arith.constant 0 : index
    %c0_20 = arith.constant 0 : index
    %34 = vector.load %arg15[%c0_19, %c0_20] : memref<128x128xbf16, #tpu.memory_space<vmem>>, vector<128x128xbf16>
    %cst_21 = arith.constant dense<0.000000e+00> : vector<16x128xf32>
    %35 = tpu.matmul %33, %34, %cst_21 {dimension_numbers = #tpu.dot_dimension_numbers<[1], [0], [0], [1], [0, 0, 1, 1], [], []>} : vector<16x128xbf16>, vector<128x128xbf16>, vector<16x128xf32> -> vector<16x128xf32>
    %c0_22 = arith.constant 0 : index
    %c0_23 = arith.constant 0 : index
    %36 = vector.load %arg16[%c0_22, %c0_23] : memref<1x128xf32, #tpu.memory_space<vmem>>, vector<1x128xf32>
    %37 = vector.broadcast %36 : vector<1x128xf32> to vector<16x128xf32>
    %38 = arith.addf %35, %37 : vector<16x128xf32>
    %cst_24 = arith.constant 0.000000e+00 : f32
    %39 = vector.broadcast %cst_24 : f32 to vector<16x128xf32>
    %40 = arith.maximumf %38, %39 : vector<16x128xf32>
    %41 = arith.truncf %40 : vector<16x128xf32> to vector<16x128xbf16>
    %c0_25 = arith.constant 0 : index
    %c0_26 = arith.constant 0 : index
    %42 = vector.load %arg17[%c0_25, %c0_26] : memref<128x128xbf16, #tpu.memory_space<vmem>>, vector<128x128xbf16>
    %cst_27 = arith.constant dense<0.000000e+00> : vector<16x128xf32>
    %43 = tpu.matmul %41, %42, %cst_27 {dimension_numbers = #tpu.dot_dimension_numbers<[1], [0], [0], [1], [0, 0, 1, 1], [], []>} : vector<16x128xbf16>, vector<128x128xbf16>, vector<16x128xf32> -> vector<16x128xf32>
    %c0_28 = arith.constant 0 : index
    %c0_29 = arith.constant 0 : index
    %44 = vector.load %arg18[%c0_28, %c0_29] : memref<1x128xf32, #tpu.memory_space<vmem>>, vector<1x128xf32>
    %45 = vector.broadcast %44 : vector<1x128xf32> to vector<16x128xf32>
    %46 = arith.addf %43, %45 : vector<16x128xf32>
    %c0_30 = arith.constant 0 : index
    %c0_31 = arith.constant 0 : index
    %c0_32 = arith.constant 0 : index
    %47 = vector.load %arg19[%c0_30, %c0_31, %c0_32] : memref<1x16x128xf32, #tpu.memory_space<vmem>>, vector<1x16x128xf32>
    %48 = vector.shape_cast %47 : vector<1x16x128xf32> to vector<16x128xf32>
    %49 = vector.shape_cast %46 : vector<16x128xf32> to vector<1x16x128xf32>
    tpu.vector_store %arg19[%c0_30, %c0_31, %c0_32], %49 {strides = array<i32>} : memref<1x16x128xf32, #tpu.memory_space<vmem>>, vector<1x16x128xf32>,
    return
  }
  func.func @transform_0(%arg0: i32, %arg1: i32) -> (i32, i32) {
    %c0_i32 = arith.constant 0 : i32
    %c0_i32_0 = arith.constant 0 : i32
    %c0_i32_1 = arith.constant 0 : i32
    return %c0_i32, %c0_i32_0 : i32, i32
  }
  func.func @transform_1(%arg0: i32, %arg1: i32) -> (i32, i32, i32, i32) {
    %c0_i32 = arith.constant 0 : i32
    %c0_i32_0 = arith.constant 0 : i32
    %c0_i32_1 = arith.constant 0 : i32
    return %arg0, %arg1, %c0_i32, %c0_i32_0 : i32, i32, i32, i32
  }
  func.func @transform_2(%arg0: i32, %arg1: i32) -> (i32, i32, i32, i32) {
    %c0_i32 = arith.constant 0 : i32
    %c0_i32_0 = arith.constant 0 : i32
    %c0_i32_1 = arith.constant 0 : i32
    return %arg0, %arg1, %c0_i32, %c0_i32_0 : i32, i32, i32, i32
  }
  func.func @transform_3(%arg0: i32, %arg1: i32) -> (i32, i32, i32, i32) {
    %c0_i32 = arith.constant 0 : i32
    %c0_i32_0 = arith.constant 0 : i32
    %c0_i32_1 = arith.constant 0 : i32
    return %arg0, %arg1, %c0_i32, %c0_i32_0 : i32, i32, i32, i32
  }
  func.func @transform_4(%arg0: i32, %arg1: i32) -> (i32, i32, i32, i32) {
    %c0_i32 = arith.constant 0 : i32
    %c0_i32_0 = arith.constant 0 : i32
    %c0_i32_1 = arith.constant 0 : i32
    %c0_i32_2 = arith.constant 0 : i32
    return %arg0, %c0_i32, %c0_i32_0, %c0_i32_1 : i32, i32, i32, i32
  }
  func.func @transform_5(%arg0: i32, %arg1: i32) -> (i32, i32) {
    %c0_i32 = arith.constant 0 : i32
    %c0_i32_0 = arith.constant 0 : i32
    %c0_i32_1 = arith.constant 0 : i32
    return %c0_i32, %c0_i32_0 : i32, i32
  }
  func.func @transform_6(%arg0: i32, %arg1: i32) -> (i32, i32) {
    %c0_i32 = arith.constant 0 : i32
    %c0_i32_0 = arith.constant 0 : i32
    %c0_i32_1 = arith.constant 0 : i32
    return %c0_i32, %c0_i32_0 : i32, i32
  }
  func.func @transform_7(%arg0: i32, %arg1: i32) -> (i32, i32, i32) {
    %c0_i32 = arith.constant 0 : i32
    %c0_i32_0 = arith.constant 0 : i32
    %c0_i32_1 = arith.constant 0 : i32
    %c0_i32_2 = arith.constant 0 : i32
    return %c0_i32, %c0_i32_0, %c0_i32_1 : i32, i32, i32
  }
  func.func @transform_8(%arg0: i32, %arg1: i32) -> (i32, i32, i32) {
    %c0_i32 = arith.constant 0 : i32
    %c0_i32_0 = arith.constant 0 : i32
    %c0_i32_1 = arith.constant 0 : i32
    %c0_i32_2 = arith.constant 0 : i32
    return %c0_i32, %c0_i32_0, %c0_i32_1 : i32, i32, i32
  }
  func.func @transform_9(%arg0: i32, %arg1: i32) -> (i32, i32, i32) {
    %c0_i32 = arith.constant 0 : i32
    %c0_i32_0 = arith.constant 0 : i32
    %c0_i32_1 = arith.constant 0 : i32
    %c0_i32_2 = arith.constant 0 : i32
    return %c0_i32, %c0_i32_0, %c0_i32_1 : i32, i32, i32
  }
  func.func @transform_10(%arg0: i32, %arg1: i32) -> (i32, i32, i32) {
    %c0_i32 = arith.constant 0 : i32
    %c0_i32_0 = arith.constant 0 : i32
    %c0_i32_1 = arith.constant 0 : i32
    %c0_i32_2 = arith.constant 0 : i32
    return %c0_i32, %c0_i32_0, %c0_i32_1 : i32, i32, i32
  }
  func.func @transform_11(%arg0: i32, %arg1: i32) -> (i32, i32, i32) {
    %c0_i32 = arith.constant 0 : i32
    %c0_i32_0 = arith.constant 0 : i32
    %c0_i32_1 = arith.constant 0 : i32
    %c0_i32_2 = arith.constant 0 : i32
    return %c0_i32, %c0_i32_0, %c0_i32_1 : i32, i32, i32
  }
  func.func @transform_12(%arg0: i32, %arg1: i32) -> (i32, i32, i32) {
    %c0_i32 = arith.constant 0 : i32
    %c0_i32_0 = arith.constant 0 : i32
    %c0_i32_1 = arith.constant 0 : i32
    %c0_i32_2 = arith.constant 0 : i32
    return %c0_i32, %c0_i32_0, %c0_i32_1 : i32, i32, i32
  }
  func.func @transform_13(%arg0: i32, %arg1: i32) -> (i32, i32) {
    %c0_i32 = arith.constant 0 : i32
    %c0_i32_0 = arith.constant 0 : i32
    %c0_i32_1 = arith.constant 0 : i32
    return %c0_i32, %c0_i32_0 : i32, i32
  }
  func.func @transform_14(%arg0: i32, %arg1: i32) -> (i32, i32) {
    %c0_i32 = arith.constant 0 : i32
    %c0_i32_0 = arith.constant 0 : i32
    %c0_i32_1 = arith.constant 0 : i32
    return %c0_i32, %c0_i32_0 : i32, i32
  }
  func.func @transform_15(%arg0: i32, %arg1: i32) -> (i32, i32) {
    %c0_i32 = arith.constant 0 : i32
    %c0_i32_0 = arith.constant 0 : i32
    %c0_i32_1 = arith.constant 0 : i32
    return %c0_i32, %c0_i32_0 : i32, i32
  }
  func.func @transform_16(%arg0: i32, %arg1: i32) -> (i32, i32) {
    %c0_i32 = arith.constant 0 : i32
    %c0_i32_0 = arith.constant 0 : i32
    %c0_i32_1 = arith.constant 0 : i32
    return %c0_i32, %c0_i32_0 : i32, i32
  }
  func.func @transform_17(%arg0: i32, %arg1: i32) -> (i32, i32, i32) {
    %c0_i32 = arith.constant 0 : i32
    %c0_i32_0 = arith.constant 0 : i32
    return %arg0, %arg1, %c0_i32 : i32, i32, i32
  }
}

</mosaic_0001>

<bundles_post_ra>
// kernel: tpu_custom_call.1
= control target key start
LH: loop header
LB: loop body
LE: loop exit
PB: predicated region body
PF: predicated region fallthrough
CT: control target
= control target key end

     0   :  { %s4909_s0 = inlined_call_operand.hbm [shape: f32[2,2], index: 0, kind: input, shape index: {}]   ;;  %s4910_s1 = inlined_call_operand.vmem [shape: f32[2,1,32,16], index: 1, kind: input, shape index: {}]   ;;  %s4911_s2 = inlined_call_operand.vmem [shape: f32[2,1,32,16], index: 2, kind: input, shape index: {}]   ;;  %s4912_s3 = inlined_call_operand.vmem [shape: f32[2,1,32,32], index: 3, kind: input, shape index: {}]   ;;  %s4913_s4 = inlined_call_operand.vmem [shape: f32[2,4,1,128], index: 4, kind: input, shape index: {}]   ;;  %s4914_s5 = inlined_call_operand.vmem [shape: bf16[16,128], index: 5, kind: input, shape index: {}]   ;;  %s4915_s6 = inlined_call_operand.vmem [shape: f32[1,128], index: 6, kind: input, shape index: {}]   ;;  %s4916_s7 = inlined_call_operand.hbm [shape: bf16[4,384,256], index: 7, kind: input, shape index: {}]   ;;  %s4917_s8 = inlined_call_operand.vmem [shape: f32[4,1,256], index: 8, kind: input, shape index: {}]   ;;  %s4918_s9 = inlined_call_operand.vmem [shape: bf16[4,32,256], index: 9, kind: input, shape index: {}]   ;;  %s4919_s10 = inlined_call_operand.vmem [shape: f32[4,1,256], index: 10, kind: input, shape index: {}]   ;;  %s4920_s11 = inlined_call_operand.hbm [shape: bf16[4,128,256], index: 11, kind: input, shape index: {}]   ;;  %s4921_s12 = inlined_call_operand.vmem [shape: f32[4,1,256], index: 12, kind: input, shape index: {}]   ;;  %s4922_s13 = inlined_call_operand.hbm [shape: bf16[128,128], index: 13, kind: input, shape index: {}]   ;;  %s4923_s14 = inlined_call_operand.vmem [shape: f32[1,128], index: 14, kind: input, shape index: {}]   ;;  %s4924_s15 = inlined_call_operand.hbm [shape: bf16[128,128], index: 15, kind: input, shape index: {}]   ;;  %s4925_s16 = inlined_call_operand.vmem [shape: f32[1,128], index: 16, kind: input, shape index: {}]   ;;  %s4926_s17 = inlined_call_operand.hbm [shape: f32[2,16,128], index: 17, kind: output, shape index: {}]  }
   0x1   :  { %4945 = sst [smem:[#allocation26_spill]] %s4909_s0 }
   0x2   :  { %4946 = sst [smem:[#allocation27_spill]] %s4910_s1 }
   0x3   :  { %4947 = sst [smem:[#allocation28_spill]] %s4914_s5 }
   0x4   :  { %4948 = sst [smem:[#allocation29_spill]] %s4916_s7 }
   0x5   :  { %4949 = sst [smem:[#allocation30_spill]] %s4917_s8 }
   0x6   :  { %4950 = sst [smem:[#allocation31_spill]] %s4920_s11 }
   0x7   :  { %4951 = sst [smem:[#allocation32_spill]] %s4921_s12 }
   0x8   :  { %4952 = sst [smem:[#allocation33_spill]] %s4923_s14 }
   0x9   :  { %4953 = sst [smem:[#allocation34_spill]] %s4925_s16 }
   0xa   :  { %4954 = sst [smem:[#allocation35_spill]] %s4926_s17 }
   0xb   :  { %22 = vsyncpa [#allocation5], 0 }
   0xc   :  { %23 = vsyncpa [#allocation3], 0 }
   0xd   :  { %24 = vsyncpa [#allocation8], 0 }
   0xe   :  { %25 = vsyncpa [#allocation11], 0 }
   0xf   :  { %26 = vsyncpa [#allocation4], 0 }
  0x10   :  { %28 = vsyncpa [#allocation4 + $0x1], 0  ;;  %s4236_s24 = smov 0   ;;  %s4238_s25 = smov 0  }
  0x11   :  { %s4240_s26 = smov 0   ;;  %s4242_s27 = smov 0  }
  0x12   :  { %s4244_s28 = smov 0   ;;  %s4246_s29 = smov 0  }
  0x13 LB: > { %4955 = sst [smem:[#allocation18_spill]] %s4079_s24  ;;  %s2958_s0 = sadd.s32 4294967295, %s4099_s29   ;;  %s4099_s29 = sphi %s4246_s29, %s34_s29   ;;  %s4095_s28 = sphi %s4244_s28, %s4997_s28   ;;  %s4091_s27 = sphi %s4242_s27, %s4996_s27   ;;  %s4087_s26 = sphi %s4240_s26, %s5000_s26   ;;  %s4083_s25 = sphi %s4238_s25, %s4999_s25   ;;  %s4079_s24 = sphi %s4236_s24, %s4998_s24  }
  0x14   : > { %4956 = sst [smem:[#allocation19_spill]] %s4087_s26  ;;  %s2959_s30 = sadd.s32 4294967294, %s4099_s29  }
  0x15   : > { %4957 = sst [smem:[#allocation20_spill]] %s4095_s28  ;;  %s46_s18 = sadd.s32 1, %s4095_s28 }
  0x16   : > { %4958 = sst [smem:[#allocation21_spill]] %s4099_s29  ;;  %s438_s19 = sadd.s32 1, %s4087_s26 }
  0x17   : > { %p48_p0 = scmp.ge.s32.totalorder %s46_s18, 2  ;;  %p448_p1 = scmp.ne.s32.totalorder %s4087_s26, %s4083_s25 }
  0x18   : > { %p449_p2 = scmp.eq.s32.totalorder %s2958_s0, 1  ;;  %p454_p3 = scmp.ne.s32.totalorder %s4083_s25, %s4079_s24 }
  0x19   : > { %s5002_s18 = smov (%p48_p0, %s46_s18), 0  ;;  %p455_p5 = scmp.eq.s32.totalorder %s2959_s30, 1 }
  0x1a   : > { %4959 = sst [smem:[#allocation22_spill]] %s5002_s18  ;;  %p4276_p4 = por %p449_p2, %p448_p1 }
  0x1b   : > { %s433_s20 = ssub.s32 %s4095_s28, %s5002_s18  ;;  %p2960_p6 = scmp.ge.s32.totalorder %s4099_s29, 1 }
  0x1c   : > { %s4960_s1 = scalar_select %p4276_p4, 1, 0 }
  0x1d   : > { %p436_p7 = scmp.eq.s32.totalorder %s433_s20, 0  ;;  %p4283_p8 = por %p455_p5, %p454_p3 }
  0x1e   : > { %4961 = sst [smem:[#allocation23_spill]] %s4960_s1  ;;  %p462_p9 = scmp.lt.s32.totalorder %s4099_s29, 3 }
  0x1f   : > { %s4962_s21 = scalar_select %p4283_p8, 1, 0 }
  0x20   : > { %s4289_s22 = scalar_select %p436_p7, %s4087_s26, %s438_s19  }
  0x21   : > { %4963 = sst [smem:[#allocation24_spill]] %s4962_s21  ;;  %p4291_p10 = pnand %p2960_p6, %p462_p9 }
  0x22   : > { %4964 = sst [smem:[#allocation25_spill]] %s4289_s22  ;;  %p4295_p11 = scmp.eq.s32.totalorder %s2958_s0, 0 }
  0x23   : > { %s4965_s23 = scalar_select %p4291_p10, 1, 0 }
  0x24   : > { %s4966_s24 = scalar_select %p4295_p11, 1, 0 }
  0x25   : > { %p3432_p12 = pneg %p4291_p10  ;;  %s4129_s30 = smov [#allocation7]  }
  0x26   : > { %s511_s20 = sshll.u32 %s4129_s30, 4  ;;  %s4968_s11 = sld [smem:[#allocation31_spill]]  ;;  %s512_s20 = int_to_ptr.vmem [resolvable:$true] %s511_s20 }
  0x27   : > { %p4303_p13 = pnand %p4295_p11, %p3432_p12 }
  0x29   : > { %p4315_p1 = pneg %p4303_p13 }
  0x2c   : > { %s3852_s22 = scalar_lea.hbm %s4968_s11, 8192 }
  0x2d   : > { %p3853_p0 = scmp.ne.s32.totalorder %s4968_s11, %s3852_s22  ;;  %p3859_p5 = scmp.lt.u32.totalorder %s3852_s22, %s4968_s11 }
  0x2f   : > { %p3855_p2 = pnand %p4315_p1, %p3853_p0 }
  0x31   : > { %p3856_p3 = pneg %p3855_p2 }
  0x33   : > { %p3861_p6 = pnand %p3859_p5, %p3856_p3 }
  0x35   : > { %3864 = shalt.err (!%p3861_p6)
}
  0x36   : > { %s3865_s28 = scalar_lea.vmem %s512_s20, 8192  ;;  %p3873_p8 = scmp.lt.s32.totalorder %s512_s20, %s512_s20 }
  0x37   : > { %p3866_p7 = scmp.ne.s32.totalorder %s512_s20, %s3865_s28  ;;  %p3874_p4 = scmp.lt.s32.totalorder %s3865_s28, %s3865_s28 }
  0x39   : > { %p3868_p9 = pnand %p3866_p7, %p4315_p1  ;;  %p3875_p11 = por %p3874_p4, %p3873_p8 }
  0x3b   : > { %p3869_p12 = pneg %p3868_p9 }
  0x3d   : > { %p3876_p10 = pnand %p3875_p11, %p3869_p12 }
  0x3f   : > { %3879 = shalt.err (!%p3876_p10)
}
  0x40   : > { %s4942_s26 = smov 128   ;;  %s4943_s19 = smov 8  }
  0x41   : > { %3441 = dma.hbm_to_vmem [thread:$0]  (!%p4303_p13), %s4968_s11, 8192, %s512_s20, [#allocation8], %s4942_s26, %s4942_s26, %s4943_s19  }
  0x42   : > { %s4970_s17 = sld [smem:[#allocation26_spill]] }
  0x48   : > { %s3880_s1 = scalar_lea.hbm %s4970_s17, 32 }
  0x49   : > { %p3881_p4 = scmp.ne.s32.totalorder %s4970_s17, %s3880_s1  ;;  %p3887_p11 = scmp.lt.u32.totalorder %s3880_s1, %s4970_s17 }
  0x4b   : > { %p3883_p8 = pnand %p3881_p4, %p4315_p1 }
  0x4d   : > { %p3884_p10 = pneg %p3883_p8 }
  0x4f   : > { %p3889_p0 = pnand %p3887_p11, %p3884_p10 }
  0x51   : > { %3892 = shalt.err (!%p3889_p0)
}
  0x52   : > { %s4132_s8 = smov [#allocation2]   ;;  %s4133_s22 = smov [#allocation6]  }
  0x53   : > { %3435 = dma.hbm_to_smem (!%p4303_p13), %s4970_s17, 32, %s4132_s8, [#allocation5]  }
  0x54   : > { %s489_s16 = sshll.u32 %s4133_s22, 4  ;;  %s4134_s0 = smov [#allocation9]   ;;  %s490_s16 = int_to_ptr.vmem [resolvable:$true] %s489_s16 }
  0x55   : > { %s527_s30 = sshll.u32 %s4134_s0, 4  ;;  %s4971_s7 = sld [smem:[#allocation29_spill]]  ;;  %s528_s30 = int_to_ptr.vmem [resolvable:$true] %s527_s30 }
  0x5b   : > { %s3893_s12 = scalar_lea.hbm %s4971_s7, 24576 }
  0x5c   : > { %p3894_p2 = scmp.ne.s32.totalorder %s4971_s7, %s3893_s12  ;;  %p3900_p6 = scmp.lt.u32.totalorder %s3893_s12, %s4971_s7 }
  0x5e   : > { %p3896_p3 = pnand %p3894_p2, %p4315_p1 }
  0x60   : > { %p3897_p5 = pneg %p3896_p3 }
  0x62   : > { %p3902_p7 = pnand %p3900_p6, %p3897_p5 }
  0x64   : > { %3905 = shalt.err (!%p3902_p7)
}
  0x65   : > { %s3906_s8 = scalar_lea.vmem %s490_s16, 24576  ;;  %p3914_p8 = scmp.lt.s32.totalorder %s490_s16, %s490_s16 }
  0x66   : > { %p3907_p9 = scmp.ne.s32.totalorder %s490_s16, %s3906_s8  ;;  %p3915_p10 = scmp.lt.s32.totalorder %s3906_s8, %s3906_s8 }
  0x68   : > { %p3909_p12 = pnand %p3907_p9, %p4315_p1  ;;  %p3916_p11 = por %p3915_p10, %p3914_p8 }
  0x6a   : > { %p3910_p4 = pneg %p3909_p12 }
  0x6c   : > { %p3917_p0 = pnand %p3916_p11, %p3910_p4 }
  0x6e   : > { %3920 = shalt.err (!%p3917_p0)
}
  0x6f   : > { %s4972_s26 = smov 8   ;;  %s4973_s29 = smov 128  }
  0x70   : > { %3438 = dma.hbm_to_vmem [thread:$0]  (!%p4303_p13), %s4971_s7, 24576, %s490_s16, [#allocation3], %s4973_s29, %s4973_s29, %s4972_s26  }
  0x71   : > { %s3921_s12 = scalar_lea.hbm %s4922_s13, 1024 }
  0x72   : > { %p3922_p2 = scmp.ne.s32.totalorder %s4922_s13, %s3921_s12  ;;  %p3928_p6 = scmp.lt.u32.totalorder %s3921_s12, %s4922_s13 }
  0x74   : > { %p3924_p3 = pnand %p3922_p2, %p4315_p1 }
  0x76   : > { %p3925_p5 = pneg %p3924_p3 }
  0x78   : > { %p3930_p7 = pnand %p3928_p6, %p3925_p5 }
  0x7a   : > { %3933 = shalt.err (!%p3930_p7)
}
  0x7b   : > { %s3934_s19 = scalar_lea.vmem %s528_s30, 1024  ;;  %p3942_p8 = scmp.lt.s32.totalorder %s528_s30, %s528_s30 }
  0x7c   : > { %p3935_p9 = scmp.ne.s32.totalorder %s528_s30, %s3934_s19  ;;  %p3943_p10 = scmp.lt.s32.totalorder %s3934_s19, %s3934_s19 }
  0x7e   : > { %p3937_p12 = pnand %p3935_p9, %p4315_p1  ;;  %p3944_p11 = por %p3943_p10, %p3942_p8 }
  0x80   : > { %p3938_p4 = pneg %p3937_p12 }
  0x82   : > { %p3945_p0 = pnand %p3944_p11, %p3938_p4 }
  0x84   : > { %3948 = shalt.err (!%p3945_p0)
}
  0x85   : > { %s4135_s16 = smov 64   ;;  %s4136_s26 = smov 4  }
  0x86   : > { %3444 = dma.hbm_to_vmem [thread:$0]  (!%p4303_p13), %s4922_s13, 1024, %s528_s30, [#allocation8], %s4135_s16, %s4135_s16, %s4136_s26  }
  0x87   : > { %s4137_s0 = smov [#allocation10]   ;;  %s3949_s1 = scalar_lea.hbm %s4924_s15, 1024 }
  0x88   : > { %s543_s28 = sshll.u32 %s4137_s0, 4  ;;  %p3950_p2 = scmp.ne.s32.totalorder %s4924_s15, %s3949_s1  ;;  %s544_s28 = int_to_ptr.vmem [resolvable:$true] %s543_s28 }
  0x89   : > { %p3956_p6 = scmp.lt.u32.totalorder %s3949_s1, %s4924_s15 }
  0x8a   : > { %p3952_p3 = pnand %p3950_p2, %p4315_p1 }
  0x8c   : > { %p3953_p5 = pneg %p3952_p3 }
  0x8e   : > { %p3958_p7 = pnand %p3956_p6, %p3953_p5 }
  0x90   : > { %3961 = shalt.err (!%p3958_p7)
}
  0x91   : > { %s3962_s30 = scalar_lea.vmem %s544_s28, 1024  ;;  %p3970_p8 = scmp.lt.s32.totalorder %s544_s28, %s544_s28 }
  0x92   : > { %p3963_p9 = scmp.ne.s32.totalorder %s544_s28, %s3962_s30  ;;  %p3971_p10 = scmp.lt.s32.totalorder %s3962_s30, %s3962_s30 }
  0x94   : > { %p3965_p12 = pnand %p3963_p9, %p4315_p1  ;;  %p3972_p11 = por %p3971_p10, %p3970_p8 }
  0x96   : > { %p3966_p4 = pneg %p3965_p12 }
  0x98   : > { %p3973_p0 = pnand %p3972_p11, %p3966_p4 }
  0x9a   : > { %3976 = shalt.err (!%p3973_p0)
}
  0x9b   : > { %3447 = dma.hbm_to_vmem [thread:$0]  (!%p4303_p13), %s4924_s15, 1024, %s544_s28, [#allocation11], %s4135_s16, %s4135_s16, %s4136_s26  }
  0x9c   : > { %p4974_p2 = scmp.ne.s32.totalorder %s4965_s23, 0 }
  0x9d   : > { %p4975_p3 = scmp.ne.s32.totalorder (!%p4974_p2), %s4966_s24, 0 }
  0x9e   : > { %605 = sbr.rel (%p4974_p2) target bundleno = 1977 (0x7b9), region = 88 }
  0xa5   : > { %4058 = dma.done.wait (%p4975_p3), [#allocation5], 32  }
  0xa6   : > { %4060 = vsyncadd (%p4975_p3), [#allocation5], 4294967264 }
  0xa7   : > { %4062 = dma.done.wait (%p4975_p3), [#allocation3], 24576  }
  0xa8   : > { %4064 = vsyncadd (%p4975_p3), [#allocation3], 4294942720 }
  0xa9   : > { %4066 = dma.done.wait (%p4975_p3), [#allocation8], 9216  }
  0xaa   : > { %4068 = vsyncadd (%p4975_p3), [#allocation8], 4294958080 }
  0xab   : > { %4070 = dma.done.wait (%p4975_p3), [#allocation11], 1024  }
  0xac   : > { %4072 = vsyncadd (%p4975_p3), [#allocation11], 4294966272 }
  0xad   : > { %627 = sfence }
  0xae   : > { %s4944_s7 = sand.u32 1, %s4083_s25   ;;  %s4976_s5 = sld [smem:[#allocation28_spill]]  ;;  %vm776_vm0 = vcmask 130048   ;;  %v842_v31 = vlaneseq  ;;  %v2982_v37 = vld [vmem:[%s4915_s6] ss:$0 sm:$0xff]  ;;  %v4468_v50 = vmov 0.0  }
  0xaf   : > { %s4431_s23 = sshll.u32 %s4944_s7, 4  ;;  %p700_p13 = scmp.lt.s32.totalorder %s4091_s27, 1  ;;  %v4470_v51 = vmov 0.0  }
  0xb0   : > { %s2981_s16 = sshll.u32 %s4091_s27, 7  ;;  %s4977_s20 = sld [smem:[#allocation27_spill]]  ;;  %v4454_v32 = vshrl.u32 %v842_v31, 7 }
  0xb1   : > { %s701_s24 = scalar_select %p700_p13, %s4091_s27, 1 }
  0xb2   : > { %s734_s26 = sld [smem:[#allocation2 + %s2981_s16]]  ;;  %s735_s0 = sadd.s32 1, %s2981_s16  ;;  %v844_v33 = vadd.s32 8, %v4454_v32  ;;  %v845_v34 = vadd.s32 16, %v4454_v32 }
  0xb3   : > { %s3264_s28 = sshll.u32 %s701_s24, 5  ;;  %s2980_s12 = sshll.u32 %s701_s24, 2 }
  0xb4   : > { %v3583_v0 = vld [vmem:[%s4976_s5] sm:$0xff]   ;;  %s726_s29 = scalar_lea.vmem %s4912_s3, %s3264_s28  ;;  %s4445_s21 = scalar_lea.vmem %s4913_s4, %s2980_s12  ;;  %v4458_v35 = vadd.s32 4294967288, %v844_v33  ;;  %v4460_v36 = vadd.s32 4294967288, %v845_v34 }
  0xb5   : > { %3300 = vmatprep.subr.bf16.mxu0 %v3583_v0  ;;  %s717_s11 = scalar_lea.vmem %s4911_s2, %s3264_s28  ;;  %s736_s16 = sld [smem:[#allocation2 + %s735_s0]]  ;;  %v836_v1 = vld [vmem:[%s726_s29] sm:$0xff]  ;;  %v837_v2 = vld [vmem:[%s726_s29 + $0x8] sm:$0xff]  ;;  %v838_v4 = vld [vmem:[%s726_s29 + $0x10] sm:$0xff] }
  0xb6   : > { %3301 = vmatpush3.bf16.msra.mxu0 %v3583_v0  ;;  %s708_s8 = scalar_lea.vmem %s4977_s20, %s3264_s28  ;;  %v839_v5 = vld [vmem:[%s726_s29 + $0x18] sm:$0xff]  ;;  %v4450_v6 = vpack.c.bf16 %v837_v2, %v836_v1  ;;  %v746_v12 = vld [vmem:[%s717_s11] sm:$0xff]  ;;  %v747_v13 = vld [vmem:[%s717_s11 + $0x8] sm:$0xff]  ;;  %s4466_s7 = scalar_lea.vmem [#allocation12], %s4431_s23 }
  0xb7   : > { %v737_v3 = vld [vmem:[%s708_s8] sm:$0xff]  ;;  %v738_v7 = vld [vmem:[%s708_s8 + $0x8] sm:$0xff]  ;;  %v4452_v9 = vpack.c.bf16 %v839_v5, %v838_v4  ;;  %v739_v10 = vld [vmem:[%s708_s8 + $0x10] sm:$0xff]  ;;  %s4480_s24 = smov 0  }
  0xb8   : > { %v741_v8 = vstv %s734_s26  ;;  %v740_v11 = vld [vmem:[%s708_s8 + $0x18] sm:$0xff]  ;;  %v748_v14 = vld [vmem:[%s717_s11 + $0x10] sm:$0xff] }
  0xb9   : > { %v749_v15 = vld [vmem:[%s717_s11 + $0x18] sm:$0xff]  ;;  %v742_v16 = vmul.f32 %v741_v8, %v737_v3  ;;  %v743_v17 = vmul.f32 %v741_v8, %v738_v7  ;;  %v744_v18 = vmul.f32 %v741_v8, %v739_v10  ;;  %v745_v19 = vmul.f32 %v741_v8, %v740_v11 }
  0xbb   : > { %v750_v20 = vstv %s736_s16 }
  0xbc   : > { %v751_v21 = vmul.f32 %v750_v20, %v746_v12  ;;  %v752_v22 = vmul.f32 %v750_v20, %v747_v13  ;;  %v753_v23 = vmul.f32 %v750_v20, %v748_v14  ;;  %v754_v24 = vmul.f32 %v750_v20, %v749_v15 }
  0xbe   : > { %v755_v25 = vadd.f32 %v751_v21, %v742_v16  ;;  %v756_v26 = vadd.f32 %v752_v22, %v743_v17  ;;  %v757_v27 = vadd.f32 %v753_v23, %v744_v18  ;;  %v758_v28 = vadd.f32 %v754_v24, %v745_v19 }
  0xc0   : > { %v759_v29 = vpack.c.bf16 %v756_v26, %v755_v25  ;;  %v760_v30 = vpack.c.bf16 %v758_v28, %v757_v27 }
  0xc2   : > { %3302 = vmatprep.mubr.msk.bf16.mxu0 %vm776_vm0, %v759_v29 }
  0xc3   : > { %3303 = vmatmul.mubr.msk.bf16.vlgmr.msra.gmra.mrb[0].mxu0 %vm776_vm0, %v760_v30 }
 0x196   : > { %v3304_v38 = vpop.f32.mrb[0].mxu0 }
 0x197   : > { %v826_v39 = vadd.f32 %v3304_v38, %v2982_v37  ;;  %v817_v40 = vpop.f32.mrb[1].mxu0 }
 0x198   : > { %v818_v41 = vadd.f32 %v2982_v37, %v817_v40  ;;  %v3305_v42 = vpop.f32.mrb[2].mxu0 }
 0x199   : > { %v834_v43 = vmax.f32 %v826_v39, 0.0   ;;  %v829_v44 = vadd.f32 %v3305_v42, %v2982_v37  ;;  %v820_v45 = vpop.f32.mrb[3].mxu0 }
 0x19a   : > { %v832_v46 = vmax.f32 %v818_v41, 0.0   ;;  %v821_v47 = vadd.f32 %v2982_v37, %v820_v45 }
 0x19b   : > { %v835_v48 = vmax.f32 %v829_v44, 0.0  }
 0x19c   : > { %v833_v49 = vmax.f32 %v821_v47, 0.0  }
 0x19d LB: >> { %v4138_v52 = vmov 0   ;;  %s3268_s23 = sshll.u32 %s4127_s24, 6  ;;  %s3270_s26 = smul.u32 768, %s4127_s24  ;;  %vm978_vm1 = vcmask 261120   ;;  %vm914_vm2 = vcmp.lt.s32.totalorder %v4454_v32, 7  ;;  %vm889_vm3 = vcmp.lt.s32.totalorder %v4454_v32, 1  ;;  %s4127_s24 = sphi %s4480_s24, %s859_s24   ;;  %v4123_v46 = vphi %v832_v46, %v4983_v46   ;;  %v4119_v49 = vphi %v833_v49, %v2452_v49   ;;  %v4115_v43 = vphi %v834_v43, %v2453_v43   ;;  %v4111_v48 = vphi %v835_v48, %v2454_v48   ;;  %v4107_v51 = vphi %v4470_v51, %v4982_v51   ;;  %v4103_v50 = vphi %v4468_v50, %v4981_v50  }
 0x19e   : >> { %1017 = vmatprep.mubr.bf16.mxu0 %v4138_v52  ;;  %1634 = vmatprep.mubr.bf16.mxu1 %v4138_v52  ;;  %s4510_s12 = scalar_lea.vmem %s4918_s9, %s3268_s23  ;;  %s2986_s1 = sshll.u32 %s4127_s24, 1  ;;  %vm882_vm4 = vcmp.ge.s32.totalorder %v4458_v35, 1  ;;  %vm4140_vm5 = vmmov 1   ;;  %vm908_vm7 = vcmp.lt.s32.totalorder %v4460_v36, 15  ;;  %vm1688_vm9 = vcmp.lt.s32.totalorder %v4454_v32, 2 }
 0x19f   : >> { %v3584_v53 = vld [vmem:[%s4510_s12 + $0x4] ss:$8 sps:$4 sm:$0xff]   ;;  %v3586_v54 = vld [vmem:[%s4510_s12] ss:$8 sps:$4 sm:$0xff]   ;;  %v3587_v55 = vld [vmem:[%s4510_s12 + $0x14] ss:$8 sps:$4 sm:$0xff]   ;;  %s4534_s20 = scalar_lea.vmem %s4445_s21, %s2986_s1 }
 0x1a0   : >> { %985 = vmatprep.subr.bf16.mxu0 %v3584_v53  ;;  %s4515_s14 = scalar_lea.vmem [#allocation6], %s3270_s26  ;;  %v3589_v56 = vld [vmem:[%s4510_s12 + $0x10] ss:$8 sps:$4 sm:$0xff]   ;;  %v2987_v4 = vld [vmem:[%s4534_s20] ss:$0 sm:$0xff]  ;;  %s3272_s8 = sshll.u32 %s4127_s24, 8  ;;  %vm3047_vm6 = vmpackc.low %vm882_vm4, %vm4140_vm5 }
 0x1a1   : >> { %986 = vmatpush1.bf16.msra.mxu0 %v3586_v54  ;;  %v3592_v57 = vld [vmem:[%s4515_s14 + $0x4] ss:$8 sps:$4 sm:$0xff]   ;;  %v3590_v58 = vld [vmem:[%s4515_s14] ss:$8 sps:$4 sm:$0xff]   ;;  %v3595_v59 = vld [vmem:[%s4515_s14 + $0x14] ss:$8 sps:$4 sm:$0xff]   ;;  %v877_v5 = vadd.f32 %v4123_v46, %v2987_v4  ;;  %v4541_v7 = vadd.f32 %v4119_v49, %v2987_v4  ;;  %v4544_v8 = vadd.f32 %v4115_v43, %v2987_v4  ;;  %v880_v45 = vadd.f32 %v4111_v48, %v2987_v4 }
 0x1a2   : >> { %987 = vmatprep.subr.bf16.mxu0 %v3587_v55  ;;  %v3593_v60 = vld [vmem:[%s4515_s14 + $0x10] ss:$8 sps:$4 sm:$0xff]   ;;  %v3598_v61 = vld [vmem:[%s4515_s14 + $0x24] ss:$8 sps:$4 sm:$0xff]   ;;  %v3596_v62 = vld [vmem:[%s4515_s14 + $0x20] ss:$8 sps:$4 sm:$0xff]  }
 0x1a3   : >> { %v3601_v63 = vld [vmem:[%s4515_s14 + $0x34] ss:$8 sps:$4 sm:$0xff]   ;;  %v3599_v0 = vld [vmem:[%s4515_s14 + $0x30] ss:$8 sps:$4 sm:$0xff]   ;;  %v3604_v1 = vld [vmem:[%s4515_s14 + $0x44] ss:$8 sps:$4 sm:$0xff]   ;;  %v932_v14 = vpack.c.bf16 %v4541_v7, %v877_v5 }
 0x1a4   : >> { %v3602_v2 = vld [vmem:[%s4515_s14 + $0x40] ss:$8 sps:$4 sm:$0xff]   ;;  %v3607_v3 = vld [vmem:[%s4515_s14 + $0x54] ss:$8 sps:$4 sm:$0xff]   ;;  %v3605_v10 = vld [vmem:[%s4515_s14 + $0x50] ss:$8 sps:$4 sm:$0xff]  }
 0x1a5   : >> { %988 = vmatpush1.bf16.msra.mxu0 %v3589_v56  ;;  %v910_v11 = vrot.slane %v877_v5, 1  ;;  %v911_v12 = vrot.slane %v4541_v7, 1  ;;  %v3610_v13 = vld [vmem:[%s4515_s14 + $0x64] ss:$8 sps:$4 sm:$0xff]   ;;  %v912_v15 = vrot.slane %v4544_v8, 1  ;;  %s4569_s19 = scalar_lea.vmem [#allocation7], %s3272_s8  ;;  %v935_v56 = vpack.c.bf16 %v880_v45, %v4544_v8  ;;  %vm3050_vm8 = vmpackc.low %vm4140_vm5, %vm908_vm7 }
 0x1a6   : >> { %1342 = vmatprep.subr.bf16.mxu0 %v3592_v57  ;;  %v3608_v18 = vld [vmem:[%s4515_s14 + $0x60] ss:$8 sps:$4 sm:$0xff]   ;;  %v3613_v20 = vld [vmem:[%s4515_s14 + $0x74] ss:$8 sps:$4 sm:$0xff]   ;;  %v3611_v21 = vld [vmem:[%s4515_s14 + $0x70] ss:$8 sps:$4 sm:$0xff]  }
 0x1a7   : >> { %v4554_v16 = vsel %vm914_vm2, %v910_v11, %v911_v12  ;;  %v4560_v17 = vsel %vm914_vm2, %v911_v12, %v912_v15  ;;  %v3616_v22 = vld [vmem:[%s4515_s14 + $0x84] ss:$8 sps:$4 sm:$0xff]   ;;  %v3614_v23 = vld [vmem:[%s4515_s14 + $0x80] ss:$8 sps:$4 sm:$0xff]   ;;  %v3619_v24 = vld [vmem:[%s4515_s14 + $0x94] ss:$8 sps:$4 sm:$0xff]  }
 0x1a8   : >> { %2995 = vmatmul.mubr.msk.bf16.vlgmr.msra.gmra.mrb[0].mxu0 %vm978_vm1, %v4450_v6  ;;  %v933_v19 = vpack.c.bf16 %v4560_v17, %v4554_v16  ;;  %v3617_v25 = vld [vmem:[%s4515_s14 + $0x90] ss:$8 sps:$4 sm:$0xff]   ;;  %v3622_v26 = vld [vmem:[%s4515_s14 + $0xa4] ss:$8 sps:$4 sm:$0xff]   ;;  %v3620_v27 = vld [vmem:[%s4515_s14 + $0xa0] ss:$8 sps:$4 sm:$0xff]  }
 0x1a9   : >> { %1343 = vmatpush1.bf16.msra.mxu0 %v3590_v58  ;;  %1027 = vmatprep.mubr.bf16.mxu0 %v4138_v52  ;;  %v3625_v28 = vld [vmem:[%s4515_s14 + $0xb4] ss:$8 sps:$4 sm:$0xff]   ;;  %v3623_v29 = vld [vmem:[%s4515_s14 + $0xb0] ss:$8 sps:$4 sm:$0xff]   ;;  %v3628_v30 = vld [vmem:[%s4515_s14 + $0xc4] ss:$8 sps:$4 sm:$0xff]  }
 0x1aa   : >> { %1344 = vmatprep.subr.bf16.mxu0 %v3595_v59  ;;  %v3626_v31 = vld [vmem:[%s4515_s14 + $0xc0] ss:$8 sps:$4 sm:$0xff]   ;;  %v3631_v33 = vld [vmem:[%s4515_s14 + $0xd4] ss:$8 sps:$4 sm:$0xff]   ;;  %v3629_v34 = vld [vmem:[%s4515_s14 + $0xd0] ss:$8 sps:$4 sm:$0xff]  }
 0x1ab   : >> { %v3634_v37 = vld [vmem:[%s4515_s14 + $0xe4] ss:$8 sps:$4 sm:$0xff]   ;;  %v3632_v38 = vld [vmem:[%s4515_s14 + $0xe0] ss:$8 sps:$4 sm:$0xff]   ;;  %v885_v39 = vrot.slane %v877_v5, 7  ;;  %v886_v40 = vrot.slane %v4541_v7, 7 }
 0x1ac   : >> { %v3637_v41 = vld [vmem:[%s4515_s14 + $0xf4] ss:$8 sps:$4 sm:$0xff]   ;;  %v3635_v42 = vld [vmem:[%s4515_s14 + $0xf0] ss:$8 sps:$4 sm:$0xff]   ;;  %v3640_v47 = vld [vmem:[%s4515_s14 + $0x104] ss:$8 sps:$4 sm:$0xff]  }
 0x1ad   : >> { %1345 = vmatpush1.bf16.msra.mxu0 %v3593_v60  ;;  %v892_v44 = vsel %vm889_vm3, %v885_v39, %v886_v40  ;;  %v4139_v53 = vmov 0.0   ;;  %v3638_v55 = vld [vmem:[%s4515_s14 + $0x100] ss:$8 sps:$4 sm:$0xff]   ;;  %v887_v57 = vrot.slane %v4544_v8, 7  ;;  %v888_v58 = vrot.slane %v880_v45, 7  ;;  %s4647_s30 = sshll.u32 %s4127_s24, 2 }
 0x1ae   : >> { %1346 = vmatprep.subr.bf16.mxu0 %v3598_v61  ;;  %v3048_v54 = vpack.c.bf16 %v892_v44, %v4139_v53  ;;  %v3643_v59 = vld [vmem:[%s4515_s14 + $0x114] ss:$8 sps:$4 sm:$0xff]   ;;  %v3641_v60 = vld [vmem:[%s4515_s14 + $0x110] ss:$8 sps:$4 sm:$0xff]   ;;  %v3652_v4 = vld [vmem:[%s4515_s14 + $0x144] ss:$8 sps:$4 sm:$0xff]   ;;  %s4653_s18 = scalar_lea.vmem %s4919_s10, %s4647_s30 }
 0x1af   : >> { %v890_v61 = vsel %vm889_vm3, %v887_v57, %v888_v58  ;;  %v3650_v5 = vld [vmem:[%s4515_s14 + $0x140] ss:$8 sps:$4 sm:$0xff]   ;;  %v3655_v7 = vld [vmem:[%s4515_s14 + $0x154] ss:$8 sps:$4 sm:$0xff]   ;;  %v3658_v11 = vld [vmem:[%s4515_s14 + $0x164] ss:$8 sps:$4 sm:$0xff]  }
 0x1b0   : >> { %2996 = vmatmul.mubr.msk.bf16.gmra.mrb[4].mxu0 %vm978_vm1, %v4452_v9  ;;  %v3656_v12 = vld [vmem:[%s4515_s14 + $0x160] ss:$8 sps:$4 sm:$0xff]   ;;  %v3662_v16 = vld [vmem:[%s4569_s19 + $0x4] ss:$8 sps:$4 sm:$0xff]   ;;  %v3665_v8 = vld [vmem:[%s4569_s19 + $0x14] ss:$8 sps:$4 sm:$0xff]  }
 0x1b1   : >> { %1347 = vmatpush1.bf16.msra.mxu0 %v3596_v62  ;;  %1374 = vmatprep.mubr.bf16.mxu0 %v932_v14  ;;  %v891_v62 = vsel %vm889_vm3, %v886_v40, %v887_v57  ;;  %v3659_v14 = vld [vmem:[%s4515_s14 + $0x170] ss:$8 sps:$4 sm:$0xff]   ;;  %v3664_v17 = vld [vmem:[%s4569_s19] ss:$8 sps:$4 sm:$0xff]   ;;  %s4978_s11 = sld [smem:[#allocation30_spill]]  ;;  %s4979_s28 = sld [smem:[#allocation32_spill]] }
 0x1b2   : >> { %1348 = vmatprep.subr.bf16.mxu0 %v3601_v63  ;;  %v3646_v63 = vld [vmem:[%s4515_s14 + $0x124] ss:$8 sps:$4 sm:$0xff]   ;;  %1602 = vmatprep.subr.bf16.mxu1 %v3662_v16  ;;  %vm1681_vm10 = vcmp.ge.s32.totalorder %v4458_v35, 2  ;;  %vm1713_vm12 = vcmp.lt.s32.totalorder %v4454_v32, 6  ;;  %vm1707_vm13 = vcmp.lt.s32.totalorder %v4460_v36, 14  ;;  %s859_s24 = sadd.s32 1, %s4127_s24  }
 0x1b3   : >> { %1603 = vmatpush1.bf16.msra.mxu1 %v3664_v17  ;;  %vm3194_vm11 = vmpackc.low %vm1681_vm10, %vm4140_vm5  ;;  %p856_p1 = scmp.ge.s32.totalorder %s859_s24, 2  }
 0x1b4   : >> { %1604 = vmatprep.subr.bf16.mxu1 %v3665_v8  ;;  %vm3197_vm14 = vmpackc.low %vm4140_vm5, %vm1707_vm13  ;;  %vm4142_vm15 = vmmov (%p856_p1), 0   ;;  %v3847_v35 = vld [vmem:[#allocation10 + $0x18] sm:$0xff] (%p856_p1)   ;;  %v3842_v36 = vld [vmem:[#allocation9 + $0x30] sm:$0xff] (%p856_p1)   ;;  %s4985_s8 = sld [smem:[#allocation34_spill]] (%p856_p1)  ;;  %s2705_s29 = sshll.u32 (%p856_p1), %s4466_s7, 4  ;;  %s4857_s29 = int_to_ptr.vmem [resolvable:$true] %s2705_s29 }
 0x1b5   : >> { %1349 = vmatpush1.bf16.msra.mxu0 %v3599_v0  ;;  %v934_v0 = vpack.c.bf16 %v890_v61, %v891_v62  ;;  %s4987_s16 = sld [smem:[#allocation35_spill]] (%p856_p1)  ;;  %s4143_s26 = smov (%p856_p1), [#allocation12]  }
 0x1b6   : >> { %1350 = vmatprep.subr.bf16.mxu0 %v3604_v1  ;;  %v3644_v1 = vld [vmem:[%s4515_s14 + $0x120] ss:$8 sps:$4 sm:$0xff]   ;;  %s3981_s0 = sshll.u32 (%p856_p1), %s4143_s26, 4  ;;  %s3982_s0 = int_to_ptr.vmem [resolvable:$false] %s3981_s0 }
 0x1b7   : >> { %s4659_s23 = scalar_lea.vmem %s4978_s11, %s4647_s30  ;;  %p3984_p12 = scmp.lt.s32.totalorder (%p856_p1), %s4857_s29, %s3982_s0 }
 0x1b8   : >> { %v1090_v39 = vld [vmem:[%s4659_s23] sm:$0x3] }
 0x1b9   : >> { %1351 = vmatpush1.bf16.msra.mxu0 %v3602_v2  ;;  %v3649_v2 = vld [vmem:[%s4515_s14 + $0x134] ss:$8 sps:$4 sm:$0xff]  }
 0x1ba   : >> { %1352 = vmatprep.subr.bf16.mxu0 %v3607_v3  ;;  %v3647_v3 = vld [vmem:[%s4515_s14 + $0x130] ss:$8 sps:$4 sm:$0xff]  }
 0x1bd   : >> { %1353 = vmatpush1.bf16.msra.mxu0 %v3605_v10  ;;  %v3653_v10 = vld [vmem:[%s4515_s14 + $0x150] ss:$8 sps:$4 sm:$0xff]  }
 0x1be   : >> { %1354 = vmatprep.subr.bf16.mxu0 %v3610_v13  ;;  %v3661_v13 = vld [vmem:[%s4515_s14 + $0x174] ss:$8 sps:$4 sm:$0xff]  }
 0x1c1   : >> { %1355 = vmatpush1.bf16.msra.mxu0 %v3608_v18  ;;  %v913_v18 = vrot.slane %v880_v45, 1 }
 0x1c2   : >> { %1356 = vmatprep.subr.bf16.mxu0 %v3613_v20 }
 0x1c3   : >> { %v915_v20 = vsel %vm914_vm2, %v912_v15, %v913_v18  ;;  %v3667_v15 = vld [vmem:[%s4569_s19 + $0x10] ss:$8 sps:$4 sm:$0xff]  }
 0x1c4   : >> { %1605 = vmatpush1.bf16.msra.mxu1 %v3667_v15 }
 0x1c5   : >> { %1357 = vmatpush1.bf16.msra.mxu0 %v3611_v21  ;;  %v3051_v21 = vpack.c.bf16 %v4139_v53, %v915_v20 }
 0x1c6   : >> { %1358 = vmatprep.subr.bf16.mxu0 %v3616_v22  ;;  %v3670_v22 = vld [vmem:[%s4569_s19 + $0x20] ss:$8 sps:$4 sm:$0xff]  }
 0x1c9   : >> { %1359 = vmatpush1.bf16.msra.mxu0 %v3614_v23  ;;  %v3671_v23 = vld [vmem:[%s4569_s19 + $0x34] ss:$8 sps:$4 sm:$0xff]  }
 0x1ca   : >> { %1360 = vmatprep.subr.bf16.mxu0 %v3619_v24  ;;  %v3673_v24 = vld [vmem:[%s4569_s19 + $0x30] ss:$8 sps:$4 sm:$0xff]  }
 0x1cd   : >> { %1361 = vmatpush1.bf16.msra.mxu0 %v3617_v25  ;;  %v3674_v25 = vld [vmem:[%s4569_s19 + $0x44] ss:$8 sps:$4 sm:$0xff]  }
 0x1ce   : >> { %1362 = vmatprep.subr.bf16.mxu0 %v3622_v26  ;;  %v3676_v26 = vld [vmem:[%s4569_s19 + $0x40] ss:$8 sps:$4 sm:$0xff]  }
 0x1d1   : >> { %1363 = vmatpush1.bf16.msra.mxu0 %v3620_v27  ;;  %v3677_v27 = vld [vmem:[%s4569_s19 + $0x54] ss:$8 sps:$4 sm:$0xff]  }
 0x1d2   : >> { %1364 = vmatprep.subr.bf16.mxu0 %v3625_v28  ;;  %v3679_v28 = vld [vmem:[%s4569_s19 + $0x50] ss:$8 sps:$4 sm:$0xff]  }
 0x1d5   : >> { %1365 = vmatpush1.bf16.msra.mxu0 %v3623_v29  ;;  %v3680_v29 = vld [vmem:[%s4569_s19 + $0x64] ss:$8 sps:$4 sm:$0xff]  }
 0x1d6   : >> { %1366 = vmatprep.subr.bf16.mxu0 %v3628_v30  ;;  %v3682_v30 = vld [vmem:[%s4569_s19 + $0x60] ss:$8 sps:$4 sm:$0xff]  }
 0x1d9   : >> { %1367 = vmatpush1.bf16.msra.mxu0 %v3626_v31  ;;  %v3683_v31 = vld [vmem:[%s4569_s19 + $0x74] ss:$8 sps:$4 sm:$0xff]  }
 0x1da   : >> { %1368 = vmatprep.subr.bf16.mxu0 %v3631_v33  ;;  %v3685_v33 = vld [vmem:[%s4569_s19 + $0x70] ss:$8 sps:$4 sm:$0xff]  }
 0x1dd   : >> { %1369 = vmatpush1.bf16.msra.mxu0 %v3629_v34  ;;  %v3688_v34 = vld [vmem:[%s4510_s12 + $0x24] ss:$8 sps:$4 sm:$0xff]  }
 0x1de   : >> { %1370 = vmatprep.subr.bf16.mxu0 %v3634_v37  ;;  %v4662_v37 = vsub.s32 0, %v4454_v32 }
 0x1e1   : >> { %1371 = vmatpush1.bf16.msra.mxu0 %v3632_v38  ;;  %v946_v38 = vld [vmem:[%s4653_s18] sm:$0x3] }
 0x1e2   : >> { %1372 = vmatprep.subr.bf16.mxu0 %v3637_v41  ;;  %v951_v40 = vrot.slane %v946_v38, %v4662_v37  ;;  %v1095_v41 = vrot.slane %v1090_v39, %v4662_v37 }
 0x1e5   : >> { %1373 = vmatpush1.bf16.msra.mxu0 %v3635_v42  ;;  %v3346_v42 = vadd.f32 %v1095_v41, %v951_v40 }
 0x1e6   : >> { %1395 = vmatprep.subr.bf16.mxu0 %v3640_v47  ;;  %v4669_v47 = vsub.s32 1, %v4454_v32  ;;  %v3841_v32 = vld [vmem:[#allocation9 + $0x28] sm:$0xff] (%p856_p1)  }
 0x1e8   : >> { %3049 = vmatmul.mubr.msk.bf16.vlgmr.msra.gmra.mrb[0].mxu0 %vm3047_vm6, %v3048_v54 }
 0x1e9   : >> { %1396 = vmatpush1.bf16.msra.mxu0 %v3638_v55  ;;  %1384 = vmatprep.mubr.bf16.mxu0 %v935_v56 }
 0x1ea   : >> { %1397 = vmatprep.subr.bf16.mxu0 %v3643_v59  ;;  %v955_v59 = vrot.slane %v946_v38, %v4669_v47 }
 0x1ed   : >> { %1398 = vmatpush1.bf16.msra.mxu0 %v3641_v60  ;;  %v1099_v60 = vrot.slane %v1090_v39, %v4669_v47  ;;  %v3694_v39 = vld [vmem:[%s4515_s14 + $0x184] ss:$8 sps:$4 sm:$0xff]  }
 0x1ee   : >> { %1399 = vmatprep.subr.bf16.mxu0 %v3646_v63 }
 0x1ef   : >> { %v3348_v63 = vadd.f32 %v1099_v60, %v955_v59  ;;  %v3706_v59 = vld [vmem:[%s4515_s14 + $0x1c4] ss:$8 sps:$4 sm:$0xff]   ;;  %v3704_v60 = vld [vmem:[%s4515_s14 + $0x1c0] ss:$8 sps:$4 sm:$0xff]  }
 0x1f0   : >> { %1385 = vmatmul.mubr.bf16.gmra.mrb[4].mxu0 %v934_v0 }
 0x1f1   : >> { %1400 = vmatpush1.bf16.msra.mxu0 %v3644_v1  ;;  %1427 = vmatprep.mubr.bf16.mxu0 %v4138_v52 }
 0x1f2   : >> { %1401 = vmatprep.subr.bf16.mxu0 %v3649_v2 }
 0x1f5   : >> { %1402 = vmatpush1.bf16.msra.mxu0 %v3647_v3 }
 0x1f6   : >> { %1403 = vmatprep.subr.bf16.mxu0 %v3652_v4 }
 0x1f9   : >> { %1404 = vmatpush1.bf16.msra.mxu0 %v3650_v5 }
 0x1fa   : >> { %1405 = vmatprep.subr.bf16.mxu0 %v3655_v7 }
 0x1fd   : >> { %1406 = vmatpush1.bf16.msra.mxu0 %v3653_v10 }
 0x1fe   : >> { %1407 = vmatprep.subr.bf16.mxu0 %v3658_v11 }
 0x201   : >> { %1408 = vmatpush1.bf16.msra.mxu0 %v3656_v12 }
 0x202   : >> { %1409 = vmatprep.subr.bf16.mxu0 %v3661_v13 }
 0x205   : >> { %1410 = vmatpush1.bf16.msra.mxu0 %v3659_v14 }
 0x208   : >> { %1428 = vmatmul.mubr.bf16.vlgmr.msra.gmra.mrb[0].mxu0 %v933_v19  ;;  %v3668_v19 = vld [vmem:[%s4569_s19 + $0x24] ss:$8 sps:$4 sm:$0xff]  }
 0x209   : >> { %1437 = vmatprep.mubr.bf16.mxu0 %v4138_v52  ;;  %1606 = vmatprep.subr.bf16.mxu1 %v3668_v19 }
 0x20a   : >> { %1607 = vmatpush1.bf16.msra.mxu1 %v3670_v22 }
 0x20b   : >> { %1608 = vmatprep.subr.bf16.mxu1 %v3671_v23 }
 0x20e   : >> { %1609 = vmatpush1.bf16.msra.mxu1 %v3673_v24 }
 0x20f   : >> { %1610 = vmatprep.subr.bf16.mxu1 %v3674_v25 }
 0x210   : >> { %3052 = vmatmul.mubr.msk.bf16.gmra.mrb[4].mxu0 %vm3050_vm8, %v3051_v21 }
 0x211   : >> { %2426 = vmatprep.mubr.bf16.mxu0 %v4138_v52 }
 0x212   : >> { %1611 = vmatpush1.bf16.msra.mxu1 %v3676_v26 }
 0x213   : >> { %1612 = vmatprep.subr.bf16.mxu1 %v3677_v27  ;;  %v3686_v27 = vld [vmem:[%s4510_s12 + $0x20] ss:$8 sps:$4 sm:$0xff]  }
 0x216   : >> { %1613 = vmatpush1.bf16.msra.mxu1 %v3679_v28 }
 0x217   : >> { %1614 = vmatprep.subr.bf16.mxu1 %v3680_v29  ;;  %v3691_v29 = vld [vmem:[%s4510_s12 + $0x34] ss:$8 sps:$4 sm:$0xff]  }
 0x21a   : >> { %1615 = vmatpush1.bf16.msra.mxu1 %v3682_v30 }
 0x21b   : >> { %1616 = vmatprep.subr.bf16.mxu1 %v3683_v31 }
 0x21e   : >> { %1617 = vmatpush1.bf16.msra.mxu1 %v3685_v33  ;;  %v3689_v33 = vld [vmem:[%s4510_s12 + $0x30] ss:$8 sps:$4 sm:$0xff]   ;;  %s4720_s12 = scalar_lea.vmem %s4979_s28, %s4647_s30  ;;  %s3278_s30 = sshll.u32 (%p856_p1), %s4091_s27, 8 }
 0x21f   : >> { %1777 = vmatprep.subr.bf16.mxu1 %v3688_v34  ;;  %s4855_s5 = scalar_lea.hbm (%p856_p1), %s4987_s16, %s3278_s30  ;;  %s4988_s27 = sand.u32 (%p856_p1), 1, %s4083_s25  }
 0x220   : > { %s4863_s11 = scalar_lea.sflag (%p856_p1), [#allocation4], %s4988_s27  ;;  %s3983_s28 = scalar_lea.vmem (%p856_p1), %s3982_s0, 512 }
 0x2db   : >> { %v1429_v44 = vpop.f32.mrb[0].mxu0 }
 0x2dc   : >> { %v3347_v45 = vadd.f32 %v3346_v42, %v1429_v44  ;;  %v1431_v54 = vpop.f32.mrb[1].mxu0  ;;  %v3692_v44 = vld [vmem:[%s4515_s14 + $0x180] ss:$8 sps:$4 sm:$0xff]  }
 0x2dd   : >> { %v1433_v55 = vpop.f32.mrb[2].mxu0  ;;  %v3349_v7 = vadd.f32 %v3348_v63, %v1431_v54  ;;  %v3695_v54 = vld [vmem:[%s4515_s14 + $0x190] ss:$8 sps:$4 sm:$0xff]  }
 0x2de   : >> { %v3053_v56 = vmul.f32 -1.442695, %v3347_v45  ;;  %v3351_v57 = vadd.f32 %v3346_v42, %v1433_v55  ;;  %v1435_v58 = vpop.f32.mrb[3].mxu0  ;;  %v3697_v45 = vld [vmem:[%s4515_s14 + $0x194] ss:$8 sps:$4 sm:$0xff]  }
 0x2df   : >> { %v3353_v12 = vadd.f32 %v3348_v63, %v1435_v58  ;;  %v3700_v55 = vld [vmem:[%s4515_s14 + $0x1a4] ss:$8 sps:$4 sm:$0xff]   ;;  %v3701_v58 = vld [vmem:[%s4515_s14 + $0x1b0] ss:$8 sps:$4 sm:$0xff]  }
 0x2e0   : >> { %3788 = vpow2.f32 %v3053_v56  ;;  %v3054_v61 = vmul.f32 -1.442695, %v3351_v57  ;;  %v3698_v56 = vld [vmem:[%s4515_s14 + $0x1a0] ss:$8 sps:$4 sm:$0xff]   ;;  %v3703_v57 = vld [vmem:[%s4515_s14 + $0x1b4] ss:$8 sps:$4 sm:$0xff]  }
 0x2e2   : >> { %3790 = vpow2.f32 %v3054_v61  ;;  %v3709_v61 = vld [vmem:[%s4515_s14 + $0x1d4] ss:$8 sps:$4 sm:$0xff]  }
 0x2e3   : >> { %v1439_v62 = vpop.f32.mrb[4].mxu0 }
 0x2e4   : >> { %v3355_v0 = vadd.f32 %v3346_v42, %v1439_v62  ;;  %v1441_v1 = vpop.f32.mrb[5].mxu0  ;;  %v3707_v62 = vld [vmem:[%s4515_s14 + $0x1d0] ss:$8 sps:$4 sm:$0xff]  }
 0x2e5   : >> { %v1443_v2 = vpop.f32.mrb[6].mxu0  ;;  %v3357_v20 = vadd.f32 %v3348_v63, %v1441_v1  ;;  %v3715_v1 = vld [vmem:[%s4515_s14 + $0x1f4] ss:$8 sps:$4 sm:$0xff]  }
 0x2e6   : >> { %v3055_v3 = vmul.f32 -1.442695, %v3355_v0  ;;  %v3359_v4 = vadd.f32 %v3346_v42, %v1443_v2  ;;  %v1445_v5 = vpop.f32.mrb[7].mxu0  ;;  %v3710_v0 = vld [vmem:[%s4515_s14 + $0x1e0] ss:$8 sps:$4 sm:$0xff]  }
 0x2e7   : >> { %v3361_v16 = vadd.f32 %v3348_v63, %v1445_v5  ;;  %v3712_v63 = vld [vmem:[%s4515_s14 + $0x1e4] ss:$8 sps:$4 sm:$0xff]   ;;  %v3713_v2 = vld [vmem:[%s4515_s14 + $0x1f0] ss:$8 sps:$4 sm:$0xff]   ;;  %v3721_v5 = vld [vmem:[%s4515_s14 + $0x214] ss:$8 sps:$4 sm:$0xff]  }
 0x2e8   : >> { %3792 = vpow2.f32 %v3055_v3  ;;  %v3056_v10 = vmul.f32 -1.442695, %v3359_v4  ;;  %v3718_v3 = vld [vmem:[%s4515_s14 + $0x204] ss:$8 sps:$4 sm:$0xff]   ;;  %v3716_v4 = vld [vmem:[%s4515_s14 + $0x200] ss:$8 sps:$4 sm:$0xff]  }
 0x2ea   : >> { %v3789_v11 = vpop.eup %3788  ;;  %3794 = vpow2.f32 %v3056_v10  ;;  %v3724_v10 = vld [vmem:[%s4515_s14 + $0x224] ss:$8 sps:$4 sm:$0xff]  }
 0x2eb   : >> { %v1468_v13 = vadd.f32 1.0, %v3789_v11  ;;  %3796 = vtanh.f32 %v3349_v7  ;;  %v3719_v7 = vld [vmem:[%s4515_s14 + $0x210] ss:$8 sps:$4 sm:$0xff]   ;;  %v3722_v11 = vld [vmem:[%s4515_s14 + $0x220] ss:$8 sps:$4 sm:$0xff]  }
 0x2ec   : >> { %v3791_v14 = vpop.eup %3790 }
 0x2ed   : >> { %3798 = vrcp.f32 %v1468_v13  ;;  %v1469_v18 = vadd.f32 1.0, %v3791_v14  ;;  %v3725_v13 = vld [vmem:[%s4515_s14 + $0x230] ss:$8 sps:$4 sm:$0xff]   ;;  %v3730_v14 = vld [vmem:[%s4515_s14 + $0x244] ss:$8 sps:$4 sm:$0xff]  }
 0x2ee   : >> { %3800 = vtanh.f32 %v3353_v12  ;;  %v3727_v12 = vld [vmem:[%s4515_s14 + $0x234] ss:$8 sps:$4 sm:$0xff]  }
 0x2ef   : >> { %3802 = vrcp.f32 %v1469_v18  ;;  %v3728_v18 = vld [vmem:[%s4515_s14 + $0x240] ss:$8 sps:$4 sm:$0xff]  }
 0x2f0   : >> { %3804 = vtanh.f32 %v3357_v20  ;;  %v3733_v20 = vld [vmem:[%s4515_s14 + $0x254] ss:$8 sps:$4 sm:$0xff]  }
 0x2f2   : >> { %v3793_v21 = vpop.eup %3792 }
 0x2f3   : >> { %v1470_v17 = vadd.f32 1.0, %v3793_v21  ;;  %v3731_v21 = vld [vmem:[%s4515_s14 + $0x250] ss:$8 sps:$4 sm:$0xff]  }
 0x2f4   : >> { %v3795_v8 = vpop.eup %3794 }
 0x2f5   : >> { %3806 = vrcp.f32 %v1470_v17  ;;  %v1471_v15 = vadd.f32 1.0, %v3795_v8  ;;  %v3797_v19 = vpop.eup %3796  ;;  %v3734_v17 = vld [vmem:[%s4515_s14 + $0x260] ss:$8 sps:$4 sm:$0xff]   ;;  %v3739_v8 = vld [vmem:[%s4515_s14 + $0x274] ss:$8 sps:$4 sm:$0xff]  }
 0x2f6   : >> { %3808 = vtanh.f32 %v3361_v16  ;;  %v3736_v16 = vld [vmem:[%s4515_s14 + $0x264] ss:$8 sps:$4 sm:$0xff]  }
 0x2f7   : >> { %v3799_v22 = vpop.eup %3798  ;;  %3810 = vrcp.f32 %v1471_v15  ;;  %v3737_v15 = vld [vmem:[%s4515_s14 + $0x270] ss:$8 sps:$4 sm:$0xff]  }
 0x2f8   : >> { %v3801_v23 = vpop.eup %3800  ;;  %v1484_v24 = vmul.f32 %v3799_v22, %v3797_v19  ;;  %v3742_v19 = vld [vmem:[%s4515_s14 + $0x284] ss:$8 sps:$4 sm:$0xff]   ;;  %v4723_v22 = vld [vmem:[%s4720_s12] sm:$0x3] }
 0x2f9   : >> { %v3803_v25 = vpop.eup %3802 }
 0x2fa   : >> { %v1485_v26 = vmul.f32 %v3803_v25, %v3801_v23  ;;  %v3805_v30 = vpop.eup %3804  ;;  %v1515_v23 = vrot.slane %v4723_v22, %v4662_v37 }
 0x2fc   : >> { %v1488_v28 = vpack.c.bf16 %v1485_v26, %v1484_v24 }
 0x2fe   : >> { %1635 = vmatmul.mubr.bf16.vlgmr.msra.gmra.mrb[0].mxu1 %v1488_v28 }
 0x2ff   : >> { %v3807_v31 = vpop.eup %3806  ;;  %1644 = vmatprep.mubr.bf16.mxu1 %v4138_v52  ;;  %1778 = vmatpush1.bf16.msra.mxu1 %v3686_v27 }
 0x300   : >> { %v3809_v34 = vpop.eup %3808  ;;  %v1486_v38 = vmul.f32 %v3807_v31, %v3805_v30  ;;  %1779 = vmatprep.subr.bf16.mxu1 %v3691_v29  ;;  %v3077_v31 = vld [vmem:[%s4534_s20 + $0x1] ss:$0 sm:$0xff] }
 0x301   : >> { %v3811_v40 = vpop.eup %3810 }
 0x302   : >> { %v1487_v41 = vmul.f32 %v3811_v40, %v3809_v34 }
 0x303   : >> { %1780 = vmatpush1.bf16.msra.mxu1 %v3689_v33 }
 0x304   : >> { %v1489_v42 = vpack.c.bf16 %v1487_v41, %v1486_v38  ;;  %2134 = vmatprep.subr.bf16.mxu1 %v3694_v39 }
 0x306   : >> { %1645 = vmatmul.mubr.bf16.gmra.mrb[4].mxu1 %v1489_v42 }
 0x307   : >> { %1809 = vmatprep.mubr.bf16.mxu1 %v4138_v52 }
 0x30e   : >> { %3091 = vmatmul.mubr.msk.bf16.vlgmr.msra.gmra.mrb[8].mxu1 %vm978_vm1, %v4450_v6  ;;  %v3840_v6 = vld [vmem:[#allocation9 + $0x20] sm:$0xff] (%p856_p1)  }
 0x30f   : >> { %2135 = vmatpush1.bf16.msra.mxu1 %v3692_v44  ;;  %1819 = vmatprep.mubr.bf16.mxu1 %v4138_v52 }
 0x310   : >> { %2136 = vmatprep.subr.bf16.mxu1 %v3697_v45 }
 0x313   : >> { %2137 = vmatpush1.bf16.msra.mxu1 %v3695_v54 }
 0x314   : >> { %2138 = vmatprep.subr.bf16.mxu1 %v3700_v55 }
 0x316   : >> { %3092 = vmatmul.mubr.msk.bf16.gmra.mrb[12].mxu1 %vm978_vm1, %v4452_v9  ;;  %v3846_v9 = vld [vmem:[#allocation10 + $0x10] sm:$0xff] (%p856_p1)  }
 0x317   : >> { %2139 = vmatpush1.bf16.msra.mxu1 %v3698_v56 }
 0x318   : >> { %2140 = vmatprep.subr.bf16.mxu1 %v3703_v57 }
 0x31b   : >> { %2141 = vmatpush1.bf16.msra.mxu1 %v3701_v58 }
 0x31c   : >> { %2142 = vmatprep.subr.bf16.mxu1 %v3706_v59 }
 0x31f   : >> { %2143 = vmatpush1.bf16.msra.mxu1 %v3704_v60 }
 0x320   : >> { %2144 = vmatprep.subr.bf16.mxu1 %v3709_v61  ;;  %v3740_v61 = vld [vmem:[%s4515_s14 + $0x280] ss:$8 sps:$4 sm:$0xff]  }
 0x323   : >> { %2145 = vmatpush1.bf16.msra.mxu1 %v3707_v62 }
 0x324   : >> { %2146 = vmatprep.subr.bf16.mxu1 %v3712_v63 }
 0x327   : >> { %2147 = vmatpush1.bf16.msra.mxu1 %v3710_v0 }
 0x328   : >> { %2148 = vmatprep.subr.bf16.mxu1 %v3715_v1 }
 0x32b   : >> { %2149 = vmatpush1.bf16.msra.mxu1 %v3713_v2  ;;  %v3743_v2 = vld [vmem:[%s4515_s14 + $0x290] ss:$8 sps:$4 sm:$0xff]  }
 0x32c   : >> { %2150 = vmatprep.subr.bf16.mxu1 %v3718_v3  ;;  %v3748_v3 = vld [vmem:[%s4515_s14 + $0x2a4] ss:$8 sps:$4 sm:$0xff]  }
 0x32f   : >> { %2151 = vmatpush1.bf16.msra.mxu1 %v3716_v4 }
 0x330   : >> { %2152 = vmatprep.subr.bf16.mxu1 %v3721_v5 }
 0x333   : >> { %2153 = vmatpush1.bf16.msra.mxu1 %v3719_v7  ;;  %v3746_v7 = vld [vmem:[%s4515_s14 + $0x2a0] ss:$8 sps:$4 sm:$0xff]  }
 0x334   : >> { %2154 = vmatprep.subr.bf16.mxu1 %v3724_v10 }
 0x337   : >> { %2155 = vmatpush1.bf16.msra.mxu1 %v3722_v11 }
 0x338   : >> { %2156 = vmatprep.subr.bf16.mxu1 %v3727_v12 }
 0x33b   : >> { %2157 = vmatpush1.bf16.msra.mxu1 %v3725_v13  ;;  %v3751_v13 = vld [vmem:[%s4515_s14 + $0x2b4] ss:$8 sps:$4 sm:$0xff]  }
 0x33c   : >> { %2158 = vmatprep.subr.bf16.mxu1 %v3730_v14  ;;  %v3749_v14 = vld [vmem:[%s4515_s14 + $0x2b0] ss:$8 sps:$4 sm:$0xff]  }
 0x33f   : >> { %2159 = vmatpush1.bf16.msra.mxu1 %v3728_v18  ;;  %v3754_v18 = vld [vmem:[%s4515_s14 + $0x2c4] ss:$8 sps:$4 sm:$0xff]  }
 0x340   : >> { %2160 = vmatprep.subr.bf16.mxu1 %v3733_v20  ;;  %v3752_v20 = vld [vmem:[%s4515_s14 + $0x2c0] ss:$8 sps:$4 sm:$0xff]  }
 0x343   : >> { %2161 = vmatpush1.bf16.msra.mxu1 %v3731_v21  ;;  %v3757_v21 = vld [vmem:[%s4515_s14 + $0x2d4] ss:$8 sps:$4 sm:$0xff]  }
 0x344   : >> { %2162 = vmatprep.subr.bf16.mxu1 %v3736_v16  ;;  %v3755_v16 = vld [vmem:[%s4515_s14 + $0x2d0] ss:$8 sps:$4 sm:$0xff]  }
 0x347   : >> { %2163 = vmatpush1.bf16.msra.mxu1 %v3734_v17  ;;  %v3760_v17 = vld [vmem:[%s4515_s14 + $0x2e4] ss:$8 sps:$4 sm:$0xff]  }
 0x348   : >> { %2164 = vmatprep.subr.bf16.mxu1 %v3739_v8  ;;  %v3758_v8 = vld [vmem:[%s4515_s14 + $0x2e0] ss:$8 sps:$4 sm:$0xff]  }
 0x34b   : >> { %2165 = vmatpush1.bf16.msra.mxu1 %v3737_v15  ;;  %v3763_v15 = vld [vmem:[%s4515_s14 + $0x2f4] ss:$8 sps:$4 sm:$0xff]  }
 0x34c   : >> { %2187 = vmatprep.subr.bf16.mxu1 %v3742_v19 }
 0x3d1   : >> { %v1636_v24 = vpop.f32.mrb[0].mxu1 }
 0x3d2   : >> { %v1637_v25 = vadd.f32 %v1636_v24, %v1515_v23  ;;  %v1638_v26 = vpop.f32.mrb[1].mxu1  ;;  %v3761_v24 = vld [vmem:[%s4515_s14 + $0x2f0] ss:$8 sps:$4 sm:$0xff]  }
 0x3d3   : >> { %v1640_v27 = vpop.f32.mrb[2].mxu1 }
 0x3d4   : >> { %v1655_v28 = vadd.f32 %v4123_v46, %v1637_v25  ;;  %v1641_v29 = vadd.f32 %v1640_v27, %v1515_v23  ;;  %v4728_v30 = vpop.f32.mrb[3].mxu1 }
 0x3d6   : >> { %v4731_v33 = vmul.f32 0.70710677, %v1655_v28  ;;  %v1656_v34 = vadd.f32 %v4119_v49, %v1641_v29 }
 0x3d8   : >> { %v4735_v38 = vadd.f32 %v3077_v31, %v4731_v33  ;;  %v4737_v39 = vmul.f32 0.70710677, %v1656_v34 }
 0x3d9   : >> { %v1646_v40 = vpop.f32.mrb[4].mxu1 }
 0x3da   : >> { %v4740_v41 = vadd.f32 %v3077_v31, %v4737_v39  ;;  %v1647_v42 = vadd.f32 %v1646_v40, %v1515_v23  ;;  %v4742_v46 = vpop.f32.mrb[5].mxu1  ;;  %v1684_v49 = vrot.slane %v4735_v38, 6  ;;  %v1709_v25 = vrot.slane %v4735_v38, 2  ;;  %v3764_v40 = vld [vmem:[%s4569_s19 + $0x80] ss:$8 sps:$4 sm:$0xff]  }
 0x3db   : >> { %v1650_v44 = vpop.f32.mrb[6].mxu1 }
 0x3dc   : >> { %v1685_v45 = vrot.slane %v4740_v41, 6  ;;  %v1657_v54 = vadd.f32 %v4115_v43, %v1647_v42  ;;  %v1651_v55 = vadd.f32 %v1650_v44, %v1515_v23  ;;  %v1652_v56 = vpop.f32.mrb[7].mxu1  ;;  %v1731_v57 = vpack.c.bf16 %v4740_v41, %v4735_v38  ;;  %v3745_v43 = vld [vmem:[%s4515_s14 + $0x294] ss:$8 sps:$4 sm:$0xff]   ;;  %v3766_v38 = vld [vmem:[%s4569_s19 + $0x84] ss:$8 sps:$4 sm:$0xff]  }
 0x3dd   : >> { %v1710_v23 = vrot.slane %v4740_v41, 2  ;;  %2394 = vmatprep.subr.bf16.mxu0 %v3766_v38  ;;  %v3769_v41 = vld [vmem:[%s4569_s19 + $0x94] ss:$8 sps:$4 sm:$0xff]   ;;  %v3767_v42 = vld [vmem:[%s4569_s19 + $0x90] ss:$8 sps:$4 sm:$0xff]   ;;  %s4984_s14 = sld [smem:[#allocation33_spill]] (%p856_p1) }
 0x3de   : >> { %v1691_v58 = vsel %vm1688_vm9, %v1684_v49, %v1685_v45  ;;  %v4753_v59 = vmul.f32 0.70710677, %v1657_v54  ;;  %v1658_v60 = vadd.f32 %v4111_v48, %v1651_v55  ;;  %2166 = vmatprep.mubr.bf16.mxu1 %v1731_v57  ;;  %2395 = vmatpush1.bf16.msra.mxu0 %v3764_v40  ;;  %v3772_v44 = vld [vmem:[%s4569_s19 + $0xa4] ss:$8 sps:$4 sm:$0xff]   ;;  %v3770_v49 = vld [vmem:[%s4569_s19 + $0xa0] ss:$8 sps:$4 sm:$0xff]  }
 0x3df   : >> { %v3195_v62 = vpack.c.bf16 %v1691_v58, %v4139_v53  ;;  %v1716_v27 = vsel %vm1713_vm12, %v1709_v25, %v1710_v23  ;;  %2396 = vmatprep.subr.bf16.mxu0 %v3769_v41  ;;  %v3778_v54 = vld [vmem:[%s4569_s19 + $0xc4] ss:$8 sps:$4 sm:$0xff]   ;;  %v3776_v55 = vld [vmem:[%s4569_s19 + $0xc0] ss:$8 sps:$4 sm:$0xff]   ;;  %v3781_v56 = vld [vmem:[%s4569_s19 + $0xd4] ss:$8 sps:$4 sm:$0xff]  }
 0x3e0   : >> { %v1678_v63 = vadd.f32 %v3077_v31, %v4753_v59  ;;  %v4761_v0 = vmul.f32 0.70710677, %v1658_v60  ;;  %v3779_v57 = vld [vmem:[%s4569_s19 + $0xd0] ss:$8 sps:$4 sm:$0xff]   ;;  %v3784_v58 = vld [vmem:[%s4569_s19 + $0xe4] ss:$8 sps:$4 sm:$0xff]  }
 0x3e1   : >> { %3196 = vmatmul.mubr.msk.bf16.vlgmr.msra.gmra.mrb[8].mxu1 %vm3194_vm11, %v3195_v62  ;;  %v3782_v60 = vld [vmem:[%s4569_s19 + $0xe0] ss:$8 sps:$4 sm:$0xff]   ;;  %v3785_v62 = vld [vmem:[%s4569_s19 + $0xf0] ss:$8 sps:$4 sm:$0xff]  }
 0x3e2   : >> { %v1679_v1 = vadd.f32 %v3077_v31, %v4761_v0  ;;  %2188 = vmatpush1.bf16.msra.mxu1 %v3740_v61  ;;  %v1686_v48 = vrot.slane %v1678_v63, 6  ;;  %v1711_v19 = vrot.slane %v1678_v63, 2  ;;  %2397 = vmatpush1.bf16.msra.mxu0 %v3767_v42  ;;  %v3787_v61 = vld [vmem:[%s4569_s19 + $0xf4] ss:$8 sps:$4 sm:$0xff]  }
 0x3e3   : >> { %2189 = vmatprep.subr.bf16.mxu1 %v3745_v43  ;;  %2398 = vmatprep.subr.bf16.mxu0 %v3772_v44  ;;  %v3086_v43 = vld [vmem:[%s4653_s18 + $0x2] sm:$0x3] }
 0x3e4   : >> { %v1734_v4 = vpack.c.bf16 %v1679_v1, %v1678_v63  ;;  %v1687_v5 = vrot.slane %v1679_v1, 6  ;;  %v1690_v11 = vsel %vm1688_vm9, %v1685_v45, %v1686_v48  ;;  %v1715_v26 = vsel %vm1713_vm12, %v1710_v23, %v1711_v19  ;;  %v3773_v45 = vld [vmem:[%s4569_s19 + $0xb0] ss:$8 sps:$4 sm:$0xff]   ;;  %v3145_v63 = vld [vmem:[%s4659_s23 + $0x2] sm:$0x3]  ;;  %s3977_s23 = scalar_lea.vmem (%p856_p1), %s4857_s29, 256 }
 0x3e5   : >> { %v1732_v28 = vpack.c.bf16 %v1715_v26, %v1716_v27  ;;  %v1712_v29 = vrot.slane %v1679_v1, 2  ;;  %v1750_v1 = vrot.slane %v3086_v43, %v4662_v37  ;;  %p3978_p5 = scmp.ne.s32.totalorder (%p856_p1), %s4857_s29, %s3977_s23  ;;  %p3985_p4 = scmp.lt.s32.totalorder (%p856_p1), %s3983_s28, %s3977_s23 }
 0x3e6   : >> { %2190 = vmatpush1.bf16.msra.mxu1 %v3743_v2  ;;  %2176 = vmatprep.mubr.bf16.mxu1 %v1734_v4  ;;  %v1689_v10 = vsel %vm1688_vm9, %v1686_v48, %v1687_v5  ;;  %v1887_v2 = vrot.slane %v3145_v63, %v4662_v37 }
 0x3e7   : >> { %2191 = vmatprep.subr.bf16.mxu1 %v3748_v3  ;;  %v1733_v12 = vpack.c.bf16 %v1689_v10, %v1690_v11  ;;  %v1714_v31 = vsel %vm1713_vm12, %v1711_v19, %v1712_v29  ;;  %2399 = vmatpush1.bf16.msra.mxu0 %v3770_v49  ;;  %p3986_p8 = por (%p856_p1), %p3985_p4, %p3984_p12 }
 0x3e8   : >> { %v3198_v34 = vpack.c.bf16 %v4139_v53, %v1714_v31  ;;  %v3775_v53 = vld [vmem:[%s4569_s19 + $0xb4] ss:$8 sps:$4 sm:$0xff]   ;;  %v3362_v48 = vadd.f32 %v1887_v2, %v1750_v1  ;;  %v3224_v2 = vld [vmem:[%s4720_s12 + $0x2] sm:$0x3]  ;;  %s4986_s19 = sld [smem:[#allocation23_spill]] (%p856_p1) }
 0x3e9   : >> { %2177 = vmatmul.mubr.bf16.gmra.mrb[12].mxu1 %v1733_v12  ;;  %2400 = vmatprep.subr.bf16.mxu0 %v3775_v53 }
 0x3ea   : >> { %2192 = vmatpush1.bf16.msra.mxu1 %v3746_v7  ;;  %2219 = vmatprep.mubr.bf16.mxu1 %v4138_v52 }
 0x3eb   : >> { %2193 = vmatprep.subr.bf16.mxu1 %v3751_v13  ;;  %2401 = vmatpush1.bf16.msra.mxu0 %v3773_v45  ;;  %v1754_v13 = vrot.slane %v3086_v43, %v4669_v47 }
 0x3ec   : >> { %2402 = vmatprep.subr.bf16.mxu0 %v3778_v54 }
 0x3ee   : >> { %2194 = vmatpush1.bf16.msra.mxu1 %v3749_v14  ;;  %v1891_v14 = vrot.slane %v3145_v63, %v4669_v47  ;;  %p4989_p6 = scmp.ne.s32.totalorder (%p856_p1), %s4986_s19, 0 }
 0x3ef   : >> { %2195 = vmatprep.subr.bf16.mxu1 %v3754_v18  ;;  %2403 = vmatpush1.bf16.msra.mxu0 %v3776_v55 }
 0x3f0   : >> { %2404 = vmatprep.subr.bf16.mxu0 %v3781_v56  ;;  %p3979_p7 = pnand (%p856_p1), %p3978_p5, %p4989_p6 }
 0x3f2   : >> { %2196 = vmatpush1.bf16.msra.mxu1 %v3752_v20  ;;  %p3980_p9 = pneg (%p856_p1), %p3979_p7 }
 0x3f3   : >> { %2197 = vmatprep.subr.bf16.mxu1 %v3757_v21  ;;  %2405 = vmatpush1.bf16.msra.mxu0 %v3779_v57  ;;  %v3364_v21 = vadd.f32 %v1891_v14, %v1754_v13 }
 0x3f4   : >> { %2406 = vmatprep.subr.bf16.mxu0 %v3784_v58  ;;  %p3987_p10 = pnand (%p856_p1), %p3986_p8, %p3980_p9 }
 0x3f6   : >> { %2198 = vmatpush1.bf16.msra.mxu1 %v3755_v16 }
 0x3f7   : >> { %2199 = vmatprep.subr.bf16.mxu1 %v3760_v17  ;;  %2407 = vmatpush1.bf16.msra.mxu0 %v3782_v60 }
 0x3f8   : >> { %2408 = vmatprep.subr.bf16.mxu0 %v3787_v61 }
 0x3fa   : >> { %2200 = vmatpush1.bf16.msra.mxu1 %v3758_v8 }
 0x3fb   : >> { %2201 = vmatprep.subr.bf16.mxu1 %v3763_v15  ;;  %2409 = vmatpush1.bf16.msra.mxu0 %v3785_v62 }
 0x3fe   : >> { %2202 = vmatpush1.bf16.msra.mxu1 %v3761_v24 }
 0x401   : >> { %2220 = vmatmul.mubr.bf16.vlgmr.msra.gmra.mrb[8].mxu1 %v1732_v28 }
 0x402   : >> { %2229 = vmatprep.mubr.bf16.mxu1 %v4138_v52 }
 0x409   : >> { %3199 = vmatmul.mubr.msk.bf16.gmra.mrb[12].mxu1 %vm3197_vm14, %v3198_v34 }
 0x4d4   : >> { %v2221_v3 = vpop.f32.mrb[8].mxu1 }
 0x4d5   : >> { %v3363_v4 = vadd.f32 %v3362_v48, %v2221_v3  ;;  %v2223_v5 = vpop.f32.mrb[9].mxu1  ;;  %v2307_v3 = vrot.slane %v3224_v2, %v4662_v37 }
 0x4d6   : >> { %v2225_v7 = vpop.f32.mrb[10].mxu1  ;;  %v3365_v24 = vadd.f32 %v3364_v21, %v2223_v5 }
 0x4d7   : >> { %v3200_v10 = vmul.f32 -1.442695, %v3363_v4  ;;  %v3367_v11 = vadd.f32 %v3362_v48, %v2225_v7  ;;  %v2227_v12 = vpop.f32.mrb[11].mxu1  ;;  %v2311_v7 = vrot.slane %v3224_v2, %v4669_v47 }
 0x4d8   : >> { %v3369_v27 = vadd.f32 %v3364_v21, %v2227_v12 }
 0x4d9   : >> { %3812 = vpow2.f32 %v3200_v10  ;;  %v3201_v18 = vmul.f32 -1.442695, %v3367_v11 }
 0x4db   : >> { %3814 = vpow2.f32 %v3201_v18 }
 0x4dc   : >> { %v2231_v20 = vpop.f32.mrb[12].mxu1 }
 0x4dd   : >> { %v3371_v16 = vadd.f32 %v3362_v48, %v2231_v20  ;;  %v2233_v17 = vpop.f32.mrb[13].mxu1 }
 0x4de   : >> { %v2235_v8 = vpop.f32.mrb[14].mxu1  ;;  %v3373_v34 = vadd.f32 %v3364_v21, %v2233_v17 }
 0x4df   : >> { %v3202_v15 = vmul.f32 -1.442695, %v3371_v16  ;;  %v3375_v19 = vadd.f32 %v3362_v48, %v2235_v8  ;;  %v2237_v23 = vpop.f32.mrb[15].mxu1  ;;  %v1519_v48 = vrot.slane %v4723_v22, %v4669_v47 }
 0x4e0   : >> { %v3377_v40 = vadd.f32 %v3364_v21, %v2237_v23 }
 0x4e1   : >> { %3816 = vpow2.f32 %v3202_v15  ;;  %v3203_v25 = vmul.f32 -1.442695, %v3375_v19  ;;  %v1643_v4 = vadd.f32 %v4728_v30, %v1519_v48  ;;  %v1649_v37 = vadd.f32 %v4742_v46, %v1519_v48 }
 0x4e3   : >> { %v3813_v26 = vpop.eup %3812  ;;  %3818 = vpow2.f32 %v3203_v25  ;;  %v1664_v18 = vadd.f32 %v4107_v51, %v1643_v4  ;;  %v1665_v8 = vadd.f32 %v4103_v50, %v1649_v37 }
 0x4e4   : >> { %v2260_v28 = vadd.f32 1.0, %v3813_v26  ;;  %3820 = vtanh.f32 %v3365_v24  ;;  %v3838_v26 = vld [vmem:[#allocation9 + $0x10] sm:$0xff] (%p856_p1)  }
 0x4e5   : >> { %v3815_v29 = vpop.eup %3814 }
 0x4e6   : >> { %3822 = vrcp.f32 %v2260_v28  ;;  %v2261_v31 = vadd.f32 1.0, %v3815_v29  ;;  %v3839_v28 = vld [vmem:[#allocation9 + $0x18] sm:$0xff] (%p856_p1)   ;;  %v3845_v29 = vld [vmem:[#allocation10 + $0x8] sm:$0xff] (%p856_p1)  }
 0x4e7   : >> { %3824 = vtanh.f32 %v3369_v27  ;;  %v3844_v27 = vld [vmem:[#allocation10] sm:$0xff] (%p856_p1)  }
 0x4e8   : >> { %3826 = vrcp.f32 %v2261_v31  ;;  %v3849_v31 = vld [vmem:[#allocation10 + $0x28] sm:$0xff] (%p856_p1)  }
 0x4e9   : >> { %3828 = vtanh.f32 %v3373_v34 }
 0x4eb   : >> { %v3817_v38 = vpop.eup %3816 }
 0x4ec   : >> { %v2262_v41 = vadd.f32 1.0, %v3817_v38  ;;  %v3850_v38 = vld [vmem:[#allocation10 + $0x30] sm:$0xff] (%p856_p1)  }
 0x4ed   : >> { %v3819_v42 = vpop.eup %3818 }
 0x4ee   : >> { %3830 = vrcp.f32 %v2262_v41  ;;  %v2263_v44 = vadd.f32 1.0, %v3819_v42  ;;  %v3821_v49 = vpop.eup %3820  ;;  %v3241_v41 = vld [vmem:[%s4984_s14] ss:$0 sm:$0xff] (%p856_p1) }
 0x4ef   : >> { %3832 = vtanh.f32 %v3377_v40  ;;  %v3851_v40 = vld [vmem:[#allocation10 + $0x38] sm:$0xff] (%p856_p1)  }
 0x4f0   : >> { %v3823_v53 = vpop.eup %3822  ;;  %3834 = vrcp.f32 %v2263_v44 }
 0x4f1   : >> { %v3825_v45 = vpop.eup %3824  ;;  %v2276_v54 = vmul.f32 %v3823_v53, %v3821_v49 }
 0x4f2   : >> { %v3827_v55 = vpop.eup %3826 }
 0x4f3   : >> { %v2277_v56 = vmul.f32 %v3827_v55, %v3825_v45  ;;  %v3829_v58 = vpop.eup %3828 }
 0x4f5   : >> { %v2280_v57 = vpack.c.bf16 %v2277_v56, %v2276_v54 }
 0x4f7   : >> { %2427 = vmatmul.mubr.bf16.vlgmr.msra.gmra.mrb[8].mxu0 %v2280_v57 }
 0x4f8   : >> { %v3831_v60 = vpop.eup %3830  ;;  %2436 = vmatprep.mubr.bf16.mxu0 %v4138_v52 }
 0x4f9   : >> { %v3833_v61 = vpop.eup %3832  ;;  %v2278_v62 = vmul.f32 %v3831_v60, %v3829_v58  ;;  %v3250_v58 = vld [vmem:[%s4985_s8] ss:$0 sm:$0xff] (%p856_p1) }
 0x4fa   : >> { %v3835_v43 = vpop.eup %3834 }
 0x4fb   : >> { %v2279_v63 = vmul.f32 %v3835_v43, %v3833_v61 }
 0x4fd   : >> { %v2281_v1 = vpack.c.bf16 %v2279_v63, %v2278_v62 }
 0x4ff   : >> { %2437 = vmatmul.mubr.bf16.gmra.mrb[12].mxu0 %v2281_v1 }
 0x5ca   : >> { %v2428_v5 = vpop.f32.mrb[8].mxu0 }
 0x5cb   : >> { %v2429_v10 = vadd.f32 %v2428_v5, %v2307_v3  ;;  %v2430_v11 = vpop.f32.mrb[9].mxu0 }
 0x5cc   : >> { %v2432_v52 = vpop.f32.mrb[10].mxu0 }
 0x5cd   : >> { %v2447_v12 = vadd.f32 %v2429_v10, %v4731_v33  ;;  %v2433_v13 = vadd.f32 %v2432_v52, %v2307_v3  ;;  %v2434_v14 = vpop.f32.mrb[11].mxu0 }
 0x5ce   : >> { %v2435_v20 = vadd.f32 %v2434_v14, %v2311_v7 }
 0x5cf   : >> { %v2451_v21 = vmul.f32 0.70710677, %v2447_v12   ;;  %v2448_v22 = vadd.f32 %v2433_v13, %v4737_v39 }
 0x5d0   : >> { %v4822_v51 = vadd.f32 %v2435_v20, %v1664_v18  }
 0x5d1   : >> { %v2452_v49 = vmul.f32 0.70710677, %v2448_v22   ;;  %v4983_v46 = vmov %v2451_v21 }
 0x5d2   : >> { %v4980_v30 = vmov %v4822_v51  ;;  %v2438_v16 = vpop.f32.mrb[12].mxu0  ;;  %v3836_v46 = vld [vmem:[#allocation9] sm:$0xff] (%p856_p1)  }
 0x5d3   : >> { %v2439_v47 = vadd.f32 %v2438_v16, %v2307_v3  ;;  %v2440_v17 = vpop.f32.mrb[13].mxu0  ;;  %v4982_v51 = vmov %v4980_v30  ;;  %858 = sbr.rel (!%p856_p1) target bundleno = 413 (0x19d), region = 175 }
 0x5d4   : >> { %v2441_v15 = vadd.f32 %v2440_v17, %v2311_v7  ;;  %v2442_v33 = vpop.f32.mrb[14].mxu0  ;;  %v3843_v51 = vld [vmem:[#allocation9 + $0x38] sm:$0xff] (%p856_p1)  }
 0x5d5   : >> { %v2449_v19 = vadd.f32 %v2439_v47, %v4753_v59  ;;  %v2443_v23 = vadd.f32 %v2442_v33, %v2307_v3  ;;  %v2444_v24 = vpop.f32.mrb[15].mxu0  ;;  %v4141_v59 = vmov (%p856_p1), 0.0  }
 0x5d6   : >> { %v2457_v25 = vadd.f32 %v2441_v15, %v1665_v8   ;;  %3306 = vmatprep.subr.bf16.mxu0 (%p856_p1), %v4141_v59  ;;  %3326 = vmatprep.subr.bf16.mxu1 (%p856_p1), %v4141_v59 }
 0x5d7   : >> { %v2453_v43 = vmul.f32 0.70710677, %v2449_v19   ;;  %v2450_v39 = vadd.f32 %v2443_v23, %v4761_v0  ;;  %3307 = vmatpush3.bf16.msra.mxu0 (%p856_p1), %v3836_v46  ;;  %v3837_v0 = vld [vmem:[#allocation9 + $0x8] sm:$0xff] (%p856_p1)   ;;  %3322 = vmatprep.mubr.msk.bf16.mxu0 (%p856_p1), %vm4142_vm15, %v4141_v59 }
 0x5d8   : >> { %v4981_v50 = vmov %v2457_v25  ;;  %3308 = vmatprep.subr.bf16.mxu0 (%p856_p1), %v4141_v59  ;;  %3342 = vmatprep.mubr.msk.bf16.mxu1 (%p856_p1), %vm4142_vm15, %v4141_v59  ;;  %v2459_v34 = vpack.c.bf16 (%p856_p1), %v2457_v25, %v4980_v30 }
 0x5d9   : >> { %v2454_v48 = vmul.f32 0.70710677, %v2450_v39   ;;  %3327 = vmatpush3.bf16.msra.mxu1 (%p856_p1), %v3844_v27  ;;  %v3848_v50 = vld [vmem:[#allocation10 + $0x20] sm:$0xff] (%p856_p1)  }
 0x5da   : > { %3328 = vmatprep.subr.bf16.mxu1 %v4141_v59 }
 0x5db   : > { %3309 = vmatpush3.bf16.msra.mxu0 %v3837_v0 }
 0x5dc   : > { %3310 = vmatprep.subr.bf16.mxu0 %v4141_v59 }
 0x5dd   : > { %3329 = vmatpush3.bf16.msra.mxu1 %v3845_v29 }
 0x5de   : > { %3330 = vmatprep.subr.bf16.mxu1 %v4141_v59 }
 0x5df   : > { %3311 = vmatpush3.bf16.msra.mxu0 %v3838_v26 }
 0x5e0   : > { %3312 = vmatprep.subr.bf16.mxu0 %v4141_v59 }
 0x5e1   : > { %3331 = vmatpush3.bf16.msra.mxu1 %v3846_v9 }
 0x5e2   : > { %3332 = vmatprep.subr.bf16.mxu1 %v4141_v59 }
 0x5e3   : > { %3313 = vmatpush3.bf16.msra.mxu0 %v3839_v28 }
 0x5e4   : > { %3314 = vmatprep.subr.bf16.mxu0 %v4141_v59 }
 0x5e5   : > { %3333 = vmatpush3.bf16.msra.mxu1 %v3847_v35 }
 0x5e6   : > { %3334 = vmatprep.subr.bf16.mxu1 %v4141_v59 }
 0x5e7   : > { %3315 = vmatpush3.bf16.msra.mxu0 %v3840_v6 }
 0x5e8   : > { %3316 = vmatprep.subr.bf16.mxu0 %v4141_v59 }
 0x5e9   : > { %3335 = vmatpush3.bf16.msra.mxu1 %v3848_v50 }
 0x5ea   : > { %3336 = vmatprep.subr.bf16.mxu1 %v4141_v59 }
 0x5eb   : > { %3317 = vmatpush3.bf16.msra.mxu0 %v3841_v32 }
 0x5ec   : > { %3318 = vmatprep.subr.bf16.mxu0 %v4141_v59 }
 0x5ed   : > { %3337 = vmatpush3.bf16.msra.mxu1 %v3849_v31 }
 0x5ee   : > { %3338 = vmatprep.subr.bf16.mxu1 %v4141_v59 }
 0x5ef   : > { %3319 = vmatpush3.bf16.msra.mxu0 %v3842_v36 }
 0x5f0   : > { %3320 = vmatprep.subr.bf16.mxu0 %v4141_v59 }
 0x5f1   : > { %3339 = vmatpush3.bf16.msra.mxu1 %v3850_v38 }
 0x5f2   : > { %3340 = vmatprep.subr.bf16.mxu1 %v4141_v59 }
 0x5f3   : > { %3321 = vmatpush3.bf16.msra.mxu0 %v3843_v51 }
 0x5f5   : > { %3341 = vmatpush3.bf16.msra.mxu1 %v3851_v40 }
 0x5f6   : > { %3323 = vmatmul.mubr.bf16.vlgmr.msra.gmra.mrb[0].mxu0 %v2459_v34 }
 0x6c9   : > { %v2565_v42 = vpop.f32.mrb[0].mxu0 }
 0x6ca   : > { %v2566_v44 = vadd.f32 %v3241_v41, %v2565_v42  ;;  %v3324_v49 = vpop.f32.mrb[1].mxu0 }
 0x6cb   : > { %v2568_v53 = vpop.f32.mrb[2].mxu0 }
 0x6cc   : > { %v2569_v45 = vadd.f32 %v3241_v41, %v2568_v53  ;;  %v3325_v54 = vpop.f32.mrb[3].mxu0  ;;  %v2572_v55 = vmax.f32 %v2566_v44, 0.0 }
 0x6ce   : > { %v2573_v56 = vmax.f32 %v2569_v45, 0.0 }
 0x6d0   : > { %v2574_v57 = vpack.c.bf16 %v2573_v56, %v2572_v55 }
 0x6d2   : > { %3343 = vmatmul.mubr.bf16.vlgmr.msra.gmra.mrb[0].mxu1 %v2574_v57 }
 0x7a5   : > { %v2680_v60 = vpop.f32.mrb[0].mxu1 }
 0x7a6   : > { %v2681_v61 = vadd.f32 %v3250_v58, %v2680_v60  ;;  %v3344_v62 = vpop.f32.mrb[1].mxu1 }
 0x7a7   : > { %v2683_v43 = vpop.f32.mrb[2].mxu1 }
 0x7a8   : > { %2687 = vst [vmem:[%s4466_s7] sm:$0xff] %v2681_v61  ;;  %v2684_v63 = vadd.f32 %v3250_v58, %v2683_v43  ;;  %v3345_v1 = vpop.f32.mrb[3].mxu1 }
 0x7aa   : > { %2688 = vst [vmem:[%s4466_s7 + $0x8] sm:$0xff] %v2684_v63 }
 0x7ab   : > { %3990 = shalt.err (!%p3987_p10)
}
 0x7ac   : > { %s3991_s7 = scalar_lea.hbm %s4855_s5, 256  ;;  %s3995_s24 = scalar_lea.hbm %s4987_s16, 512 }
 0x7ad   : > { %p3992_p11 = scmp.ne.s32.totalorder %s4855_s5, %s3991_s7  ;;  %p3996_p3 = scmp.lt.u32.totalorder %s4855_s5, %s4987_s16 }
 0x7ae   : > { %p3997_p13 = scmp.lt.u32.totalorder %s3995_s24, %s3991_s7  ;;  %p3999_p5 = scmp.lt.u32.totalorder %s3991_s7, %s4855_s5 }
 0x7af   : > { %p3993_p0 = pnand %p3992_p11, %p4989_p6 }
 0x7b0   : > { %p3998_p1 = por %p3997_p13, %p3996_p3 }
 0x7b1   : > { %p3994_p2 = pneg %p3993_p0 }
 0x7b2   : > { %p4000_p7 = por %p3999_p5, %p3998_p1 }
 0x7b4   : > { %p4001_p9 = pnand %p4000_p7, %p3994_p2 }
 0x7b6   : > { %4004 = shalt.err (!%p4001_p9)
}
 0x7b7   : > { %s4144_s20 = smov 128   ;;  %s4145_s8 = smov 8  }
 0x7b8   : > { %3430 = dma.vmem_to_hbm [thread:$0]  (%p4989_p6), %s4857_s29, 256, %s4855_s5, %s4863_s11, %s4144_s20, %s4144_s20, %s4145_s8  }
 0x7b9 PF: > { %s4990_s30 = sld [smem:[#allocation21_spill]]  ;;  %s4991_s22 = sld [smem:[#allocation18_spill]] }
 0x7ba   : > { %s4992_s18 = sld [smem:[#allocation24_spill]] }
 0x7bf   : > { %p3462_p12 = scmp.ge.s32.totalorder %s4990_s30, 2  ;;  %s2720_s27 = sand.u32 1, %s4991_s22  }
 0x7c0   : > { %p4993_p4 = scmp.ne.s32.totalorder %s4992_s18, 0  ;;  %s2721_s23 = scalar_lea.sflag [#allocation4], %s2720_s27 }
 0x7c2   : > { %p3449_p8 = pnand %p3462_p12, %p4993_p4 }
 0x7c4   : > { %4074 = dma.done.wait (!%p3449_p8), %s2721_s23, 256  }
 0x7c5   : > { %4076 = vsyncadd (!%p3449_p8), %s2721_s23, 4294967040  ;;  %s34_s29 = sadd.s32 1, %s4990_s30   ;;  %s4994_s26 = sld [smem:[#allocation19_spill]] }
 0x7c6   : > { %p31_p10 = scmp.ge.s32.totalorder %s34_s29, 4   ;;  %s4995_s0 = sld [smem:[#allocation25_spill]] }
 0x7c7   : > { %s4996_s27 = sld [smem:[#allocation20_spill]]  ;;  %s4997_s28 = sld [smem:[#allocation22_spill]] }
 0x7c8   : > { %s4998_s24 = smov %s4083_s25  ;;  %33 = sbr.rel (!%p31_p10) target bundleno = 19 (0x13), region = 186 }
 0x7cb   : > { %s4999_s25 = smov %s4994_s26 }
 0x7cc   : > { %s5000_s26 = smov %s4995_s0 }
 0x7cf   :  { %2726 = vsyncpa [#allocation3], 1 }
 0x7d0   :  { %2728 = vsyncpa [#allocation3 + $0x1], 1 }
 0x7d1   :  { %2729 = vsyncpa [#allocation8], 1 }
 0x7d2   :  { %2730 = vsyncpa [#allocation11], 1 }
 0x7d3   :  { %2731 = vsyncpa [#allocation4], 1 }
 0x7d4   :  { %2733 = vsyncpa [#allocation4 + $0x1], 1 }
 0x7d5   :  { %2734 = vsyncpa [#allocation5], 1 }
 0x7d6   :  { %2736 = vsyncpa [#allocation5 + $0x1], 1 }

// kernel: tpu_custom_call.1
= control target key start
LH: loop header
LB: loop body
LE: loop exit
PB: predicated region body
PF: predicated region fallthrough
CT: control target
= control target key end

     0   :  { %s4909_s0 = inlined_call_operand.hbm [shape: f32[2,2], index: 0, kind: input, shape index: {}]   ;;  %s4910_s1 = inlined_call_operand.vmem [shape: f32[2,1,32,16], index: 1, kind: input, shape index: {}]   ;;  %s4911_s2 = inlined_call_operand.vmem [shape: f32[2,1,32,16], index: 2, kind: input, shape index: {}]   ;;  %s4912_s3 = inlined_call_operand.vmem [shape: f32[2,1,32,32], index: 3, kind: input, shape index: {}]   ;;  %s4913_s4 = inlined_call_operand.vmem [shape: f32[2,4,1,128], index: 4, kind: input, shape index: {}]   ;;  %s4914_s5 = inlined_call_operand.vmem [shape: bf16[16,128], index: 5, kind: input, shape index: {}]   ;;  %s4915_s6 = inlined_call_operand.vmem [shape: f32[1,128], index: 6, kind: input, shape index: {}]   ;;  %s4916_s7 = inlined_call_operand.hbm [shape: bf16[4,384,256], index: 7, kind: input, shape index: {}]   ;;  %s4917_s8 = inlined_call_operand.vmem [shape: f32[4,1,256], index: 8, kind: input, shape index: {}]   ;;  %s4918_s9 = inlined_call_operand.vmem [shape: bf16[4,32,256], index: 9, kind: input, shape index: {}]   ;;  %s4919_s10 = inlined_call_operand.vmem [shape: f32[4,1,256], index: 10, kind: input, shape index: {}]   ;;  %s4920_s11 = inlined_call_operand.hbm [shape: bf16[4,128,256], index: 11, kind: input, shape index: {}]   ;;  %s4921_s12 = inlined_call_operand.vmem [shape: f32[4,1,256], index: 12, kind: input, shape index: {}]   ;;  %s4922_s13 = inlined_call_operand.hbm [shape: bf16[128,128], index: 13, kind: input, shape index: {}]   ;;  %s4923_s14 = inlined_call_operand.vmem [shape: f32[1,128], index: 14, kind: input, shape index: {}]   ;;  %s4924_s15 = inlined_call_operand.hbm [shape: bf16[128,128], index: 15, kind: input, shape index: {}]   ;;  %s4925_s16 = inlined_call_operand.vmem [shape: f32[1,128], index: 16, kind: input, shape index: {}]   ;;  %s4926_s17 = inlined_call_operand.hbm [shape: f32[2,16,128], index: 17, kind: output, shape index: {}]  }
   0x1   :  { %4945 = sst [smem:[#allocation26_spill]] %s4909_s0 }
   0x2   :  { %4946 = sst [smem:[#allocation27_spill]] %s4910_s1 }
   0x3   :  { %4947 = sst [smem:[#allocation28_spill]] %s4914_s5 }
   0x4   :  { %4948 = sst [smem:[#allocation29_spill]] %s4916_s7 }
   0x5   :  { %4949 = sst [smem:[#allocation30_spill]] %s4917_s8 }
   0x6   :  { %4950 = sst [smem:[#allocation31_spill]] %s4920_s11 }
   0x7   :  { %4951 = sst [smem:[#allocation32_spill]] %s4921_s12 }
   0x8   :  { %4952 = sst [smem:[#allocation33_spill]] %s4923_s14 }
   0x9   :  { %4953 = sst [smem:[#allocation34_spill]] %s4925_s16 }
   0xa   :  { %4954 = sst [smem:[#allocation35_spill]] %s4926_s17 }
   0xb   :  { %22 = vsyncpa [#allocation5], 0 }
   0xc   :  { %23 = vsyncpa [#allocation3], 0 }
   0xd   :  { %24 = vsyncpa [#allocation8], 0 }
   0xe   :  { %25 = vsyncpa [#allocation11], 0 }
   0xf   :  { %26 = vsyncpa [#allocation4], 0 }
  0x10   :  { %28 = vsyncpa [#allocation4 + $0x1], 0  ;;  %s4236_s24 = smov 0   ;;  %s4238_s25 = smov 0  }
  0x11   :  { %s4240_s26 = smov 0   ;;  %s4242_s27 = smov 0  }
  0x12   :  { %s4244_s28 = smov 0   ;;  %s4246_s29 = smov 0  }
  0x13 LB: > { %4955 = sst [smem:[#allocation18_spill]] %s4079_s24  ;;  %s2958_s0 = sadd.s32 4294967295, %s4099_s29   ;;  %s4099_s29 = sphi %s4246_s29, %s34_s29   ;;  %s4095_s28 = sphi %s4244_s28, %s4997_s28   ;;  %s4091_s27 = sphi %s4242_s27, %s4996_s27   ;;  %s4087_s26 = sphi %s4240_s26, %s5000_s26   ;;  %s4083_s25 = sphi %s4238_s25, %s4999_s25   ;;  %s4079_s24 = sphi %s4236_s24, %s4998_s24  }
  0x14   : > { %4956 = sst [smem:[#allocation19_spill]] %s4087_s26  ;;  %s2959_s30 = sadd.s32 4294967294, %s4099_s29  }
  0x15   : > { %4957 = sst [smem:[#allocation20_spill]] %s4095_s28  ;;  %s46_s18 = sadd.s32 1, %s4095_s28 }
  0x16   : > { %4958 = sst [smem:[#allocation21_spill]] %s4099_s29  ;;  %s438_s19 = sadd.s32 1, %s4087_s26 }
  0x17   : > { %p48_p0 = scmp.ge.s32.totalorder %s46_s18, 2  ;;  %p448_p1 = scmp.ne.s32.totalorder %s4087_s26, %s4083_s25 }
  0x18   : > { %p449_p2 = scmp.eq.s32.totalorder %s2958_s0, 1  ;;  %p454_p3 = scmp.ne.s32.totalorder %s4083_s25, %s4079_s24 }
  0x19   : > { %s5002_s18 = smov (%p48_p0, %s46_s18), 0  ;;  %p455_p5 = scmp.eq.s32.totalorder %s2959_s30, 1 }
  0x1a   : > { %4959 = sst [smem:[#allocation22_spill]] %s5002_s18  ;;  %p4276_p4 = por %p449_p2, %p448_p1 }
  0x1b   : > { %s433_s20 = ssub.s32 %s4095_s28, %s5002_s18  ;;  %p2960_p6 = scmp.ge.s32.totalorder %s4099_s29, 1 }
  0x1c   : > { %s4960_s1 = scalar_select %p4276_p4, 1, 0 }
  0x1d   : > { %p436_p7 = scmp.eq.s32.totalorder %s433_s20, 0  ;;  %p4283_p8 = por %p455_p5, %p454_p3 }
  0x1e   : > { %4961 = sst [smem:[#allocation23_spill]] %s4960_s1  ;;  %p462_p9 = scmp.lt.s32.totalorder %s4099_s29, 3 }
  0x1f   : > { %s4962_s21 = scalar_select %p4283_p8, 1, 0 }
  0x20   : > { %s4289_s22 = scalar_select %p436_p7, %s4087_s26, %s438_s19  }
  0x21   : > { %4963 = sst [smem:[#allocation24_spill]] %s4962_s21  ;;  %p4291_p10 = pnand %p2960_p6, %p462_p9 }
  0x22   : > { %4964 = sst [smem:[#allocation25_spill]] %s4289_s22  ;;  %p4295_p11 = scmp.eq.s32.totalorder %s2958_s0, 0 }
  0x23   : > { %s4965_s23 = scalar_select %p4291_p10, 1, 0 }
  0x24   : > { %s4966_s24 = scalar_select %p4295_p11, 1, 0 }
  0x25   : > { %p3432_p12 = pneg %p4291_p10  ;;  %s4129_s30 = smov [#allocation7]  }
  0x26   : > { %s511_s20 = sshll.u32 %s4129_s30, 4  ;;  %s4968_s11 = sld [smem:[#allocation31_spill]]  ;;  %s512_s20 = int_to_ptr.vmem [resolvable:$true] %s511_s20 }
  0x27   : > { %p4303_p13 = pnand %p4295_p11, %p3432_p12 }
  0x29   : > { %p4315_p1 = pneg %p4303_p13 }
  0x2c   : > { %s3852_s22 = scalar_lea.hbm %s4968_s11, 8192 }
  0x2d   : > { %p3853_p0 = scmp.ne.s32.totalorder %s4968_s11, %s3852_s22  ;;  %p3859_p5 = scmp.lt.u32.totalorder %s3852_s22, %s4968_s11 }
  0x2f   : > { %p3855_p2 = pnand %p4315_p1, %p3853_p0 }
  0x31   : > { %p3856_p3 = pneg %p3855_p2 }
  0x33   : > { %p3861_p6 = pnand %p3859_p5, %p3856_p3 }
  0x35   : > { %3864 = shalt.err (!%p3861_p6)
}
  0x36   : > { %s3865_s28 = scalar_lea.vmem %s512_s20, 8192  ;;  %p3873_p8 = scmp.lt.s32.totalorder %s512_s20, %s512_s20 }
  0x37   : > { %p3866_p7 = scmp.ne.s32.totalorder %s512_s20, %s3865_s28  ;;  %p3874_p4 = scmp.lt.s32.totalorder %s3865_s28, %s3865_s28 }
  0x39   : > { %p3868_p9 = pnand %p3866_p7, %p4315_p1  ;;  %p3875_p11 = por %p3874_p4, %p3873_p8 }
  0x3b   : > { %p3869_p12 = pneg %p3868_p9 }
  0x3d   : > { %p3876_p10 = pnand %p3875_p11, %p3869_p12 }
  0x3f   : > { %3879 = shalt.err (!%p3876_p10)
}
  0x40   : > { %s4942_s26 = smov 128   ;;  %s4943_s19 = smov 8  }
  0x41   : > { %3441 = dma.hbm_to_vmem [thread:$0]  (!%p4303_p13), %s4968_s11, 8192, %s512_s20, [#allocation8], %s4942_s26, %s4942_s26, %s4943_s19  }
  0x42   : > { %s4970_s17 = sld [smem:[#allocation26_spill]] }
  0x48   : > { %s3880_s1 = scalar_lea.hbm %s4970_s17, 32 }
  0x49   : > { %p3881_p4 = scmp.ne.s32.totalorder %s4970_s17, %s3880_s1  ;;  %p3887_p11 = scmp.lt.u32.totalorder %s3880_s1, %s4970_s17 }
  0x4b   : > { %p3883_p8 = pnand %p3881_p4, %p4315_p1 }
  0x4d   : > { %p3884_p10 = pneg %p3883_p8 }
  0x4f   : > { %p3889_p0 = pnand %p3887_p11, %p3884_p10 }
  0x51   : > { %3892 = shalt.err (!%p3889_p0)
}
  0x52   : > { %s4132_s8 = smov [#allocation2]   ;;  %s4133_s22 = smov [#allocation6]  }
  0x53   : > { %3435 = dma.hbm_to_smem (!%p4303_p13), %s4970_s17, 32, %s4132_s8, [#allocation5]  }
  0x54   : > { %s489_s16 = sshll.u32 %s4133_s22, 4  ;;  %s4134_s0 = smov [#allocation9]   ;;  %s490_s16 = int_to_ptr.vmem [resolvable:$true] %s489_s16 }
  0x55   : > { %s527_s30 = sshll.u32 %s4134_s0, 4  ;;  %s4971_s7 = sld [smem:[#allocation29_spill]]  ;;  %s528_s30 = int_to_ptr.vmem [resolvable:$true] %s527_s30 }
  0x5b   : > { %s3893_s12 = scalar_lea.hbm %s4971_s7, 24576 }
  0x5c   : > { %p3894_p2 = scmp.ne.s32.totalorder %s4971_s7, %s3893_s12  ;;  %p3900_p6 = scmp.lt.u32.totalorder %s3893_s12, %s4971_s7 }
  0x5e   : > { %p3896_p3 = pnand %p3894_p2, %p4315_p1 }
  0x60   : > { %p3897_p5 = pneg %p3896_p3 }
  0x62   : > { %p3902_p7 = pnand %p3900_p6, %p3897_p5 }
  0x64   : > { %3905 = shalt.err (!%p3902_p7)
}
  0x65   : > { %s3906_s8 = scalar_lea.vmem %s490_s16, 24576  ;;  %p3914_p8 = scmp.lt.s32.totalorder %s490_s16, %s490_s16 }
  0x66   : > { %p3907_p9 = scmp.ne.s32.totalorder %s490_s16, %s3906_s8  ;;  %p3915_p10 = scmp.lt.s32.totalorder %s3906_s8, %s3906_s8 }
  0x68   : > { %p3909_p12 = pnand %p3907_p9, %p4315_p1  ;;  %p3916_p11 = por %p3915_p10, %p3914_p8 }
  0x6a   : > { %p3910_p4 = pneg %p3909_p12 }
  0x6c   : > { %p3917_p0 = pnand %p3916_p11, %p3910_p4 }
  0x6e   : > { %3920 = shalt.err (!%p3917_p0)
}
  0x6f   : > { %s4972_s26 = smov 8   ;;  %s4973_s29 = smov 128  }
  0x70   : > { %3438 = dma.hbm_to_vmem [thread:$0]  (!%p4303_p13), %s4971_s7, 24576, %s490_s16, [#allocation3], %s4973_s29, %s4973_s29, %s4972_s26  }
  0x71   : > { %s3921_s12 = scalar_lea.hbm %s4922_s13, 1024 }
  0x72   : > { %p3922_p2 = scmp.ne.s32.totalorder %s4922_s13, %s3921_s12  ;;  %p3928_p6 = scmp.lt.u32.totalorder %s3921_s12, %s4922_s13 }
  0x74   : > { %p3924_p3 = pnand %p3922_p2, %p4315_p1 }
  0x76   : > { %p3925_p5 = pneg %p3924_p3 }
  0x78   : > { %p3930_p7 = pnand %p3928_p6, %p3925_p5 }
  0x7a   : > { %3933 = shalt.err (!%p3930_p7)
}
  0x7b   : > { %s3934_s19 = scalar_lea.vmem %s528_s30, 1024  ;;  %p3942_p8 = scmp.lt.s32.totalorder %s528_s30, %s528_s30 }
  0x7c   : > { %p3935_p9 = scmp.ne.s32.totalorder %s528_s30, %s3934_s19  ;;  %p3943_p10 = scmp.lt.s32.totalorder %s3934_s19, %s3934_s19 }
  0x7e   : > { %p3937_p12 = pnand %p3935_p9, %p4315_p1  ;;  %p3944_p11 = por %p3943_p10, %p3942_p8 }
  0x80   : > { %p3938_p4 = pneg %p3937_p12 }
  0x82   : > { %p3945_p0 = pnand %p3944_p11, %p3938_p4 }
  0x84   : > { %3948 = shalt.err (!%p3945_p0)
}
  0x85   : > { %s4135_s16 = smov 64   ;;  %s4136_s26 = smov 4  }
  0x86   : > { %3444 = dma.hbm_to_vmem [thread:$0]  (!%p4303_p13), %s4922_s13, 1024, %s528_s30, [#allocation8], %s4135_s16, %s4135_s16, %s4136_s26  }
  0x87   : > { %s4137_s0 = smov [#allocation10]   ;;  %s3949_s1 = scalar_lea.hbm %s4924_s15, 1024 }
  0x88   : > { %s543_s28 = sshll.u32 %s4137_s0, 4  ;;  %p3950_p2 = scmp.ne.s32.totalorder %s4924_s15, %s3949_s1  ;;  %s544_s28 = int_to_ptr.vmem [resolvable:$true] %s543_s28 }
  0x89   : > { %p3956_p6 = scmp.lt.u32.totalorder %s3949_s1, %s4924_s15 }
  0x8a   : > { %p3952_p3 = pnand %p3950_p2, %p4315_p1 }
  0x8c   : > { %p3953_p5 = pneg %p3952_p3 }
  0x8e   : > { %p3958_p7 = pnand %p3956_p6, %p3953_p5 }
  0x90   : > { %3961 = shalt.err (!%p3958_p7)
}
  0x91   : > { %s3962_s30 = scalar_lea.vmem %s544_s28, 1024  ;;  %p3970_p8 = scmp.lt.s32.totalorder %s544_s28, %s544_s28 }
  0x92   : > { %p3963_p9 = scmp.ne.s32.totalorder %s544_s28, %s3962_s30  ;;  %p3971_p10 = scmp.lt.s32.totalorder %s3962_s30, %s3962_s30 }
  0x94   : > { %p3965_p12 = pnand %p3963_p9, %p4315_p1  ;;  %p3972_p11 = por %p3971_p10, %p3970_p8 }
  0x96   : > { %p3966_p4 = pneg %p3965_p12 }
  0x98   : > { %p3973_p0 = pnand %p3972_p11, %p3966_p4 }
  0x9a   : > { %3976 = shalt.err (!%p3973_p0)
}
  0x9b   : > { %3447 = dma.hbm_to_vmem [thread:$0]  (!%p4303_p13), %s4924_s15, 1024, %s544_s28, [#allocation11], %s4135_s16, %s4135_s16, %s4136_s26  }
  0x9c   : > { %p4974_p2 = scmp.ne.s32.totalorder %s4965_s23, 0 }
  0x9d   : > { %p4975_p3 = scmp.ne.s32.totalorder (!%p4974_p2), %s4966_s24, 0 }
  0x9e   : > { %605 = sbr.rel (%p4974_p2) target bundleno = 1977 (0x7b9), region = 88 }
  0xa5   : > { %4058 = dma.done.wait (%p4975_p3), [#allocation5], 32  }
  0xa6   : > { %4060 = vsyncadd (%p4975_p3), [#allocation5], 4294967264 }
  0xa7   : > { %4062 = dma.done.wait (%p4975_p3), [#allocation3], 24576  }
  0xa8   : > { %4064 = vsyncadd (%p4975_p3), [#allocation3], 4294942720 }
  0xa9   : > { %4066 = dma.done.wait (%p4975_p3), [#allocation8], 9216  }
  0xaa   : > { %4068 = vsyncadd (%p4975_p3), [#allocation8], 4294958080 }
  0xab   : > { %4070 = dma.done.wait (%p4975_p3), [#allocation11], 1024  }
  0xac   : > { %4072 = vsyncadd (%p4975_p3), [#allocation11], 4294966272 }
  0xad   : > { %627 = sfence }
  0xae   : > { %s4944_s7 = sand.u32 1, %s4083_s25   ;;  %s4976_s5 = sld [smem:[#allocation28_spill]]  ;;  %vm776_vm0 = vcmask 130048   ;;  %v842_v31 = vlaneseq  ;;  %v2982_v37 = vld [vmem:[%s4915_s6] ss:$0 sm:$0xff]  ;;  %v4468_v50 = vmov 0.0  }
  0xaf   : > { %s4431_s23 = sshll.u32 %s4944_s7, 4  ;;  %p700_p13 = scmp.lt.s32.totalorder %s4091_s27, 1  ;;  %v4470_v51 = vmov 0.0  }
  0xb0   : > { %s2981_s16 = sshll.u32 %s4091_s27, 7  ;;  %s4977_s20 = sld [smem:[#allocation27_spill]]  ;;  %v4454_v32 = vshrl.u32 %v842_v31, 7 }
  0xb1   : > { %s701_s24 = scalar_select %p700_p13, %s4091_s27, 1 }
  0xb2   : > { %s734_s26 = sld [smem:[#allocation2 + %s2981_s16]]  ;;  %s735_s0 = sadd.s32 1, %s2981_s16  ;;  %v844_v33 = vadd.s32 8, %v4454_v32  ;;  %v845_v34 = vadd.s32 16, %v4454_v32 }
  0xb3   : > { %s3264_s28 = sshll.u32 %s701_s24, 5  ;;  %s2980_s12 = sshll.u32 %s701_s24, 2 }
  0xb4   : > { %v3583_v0 = vld [vmem:[%s4976_s5] sm:$0xff]   ;;  %s726_s29 = scalar_lea.vmem %s4912_s3, %s3264_s28  ;;  %s4445_s21 = scalar_lea.vmem %s4913_s4, %s2980_s12  ;;  %v4458_v35 = vadd.s32 4294967288, %v844_v33  ;;  %v4460_v36 = vadd.s32 4294967288, %v845_v34 }
  0xb5   : > { %3300 = vmatprep.subr.bf16.mxu0 %v3583_v0  ;;  %s717_s11 = scalar_lea.vmem %s4911_s2, %s3264_s28  ;;  %s736_s16 = sld [smem:[#allocation2 + %s735_s0]]  ;;  %v836_v1 = vld [vmem:[%s726_s29] sm:$0xff]  ;;  %v837_v2 = vld [vmem:[%s726_s29 + $0x8] sm:$0xff]  ;;  %v838_v4 = vld [vmem:[%s726_s29 + $0x10] sm:$0xff] }
  0xb6   : > { %3301 = vmatpush3.bf16.msra.mxu0 %v3583_v0  ;;  %s708_s8 = scalar_lea.vmem %s4977_s20, %s3264_s28  ;;  %v839_v5 = vld [vmem:[%s726_s29 + $0x18] sm:$0xff]  ;;  %v4450_v6 = vpack.c.bf16 %v837_v2, %v836_v1  ;;  %v746_v12 = vld [vmem:[%s717_s11] sm:$0xff]  ;;  %v747_v13 = vld [vmem:[%s717_s11 + $0x8] sm:$0xff]  ;;  %s4466_s7 = scalar_lea.vmem [#allocation12], %s4431_s23 }
  0xb7   : > { %v737_v3 = vld [vmem:[%s708_s8] sm:$0xff]  ;;  %v738_v7 = vld [vmem:[%s708_s8 + $0x8] sm:$0xff]  ;;  %v4452_v9 = vpack.c.bf16 %v839_v5, %v838_v4  ;;  %v739_v10 = vld [vmem:[%s708_s8 + $0x10] sm:$0xff]  ;;  %s4480_s24 = smov 0  }
  0xb8   : > { %v741_v8 = vstv %s734_s26  ;;  %v740_v11 = vld [vmem:[%s708_s8 + $0x18] sm:$0xff]  ;;  %v748_v14 = vld [vmem:[%s717_s11 + $0x10] sm:$0xff] }
  0xb9   : > { %v749_v15 = vld [vmem:[%s717_s11 + $0x18] sm:$0xff]  ;;  %v742_v16 = vmul.f32 %v741_v8, %v737_v3  ;;  %v743_v17 = vmul.f32 %v741_v8, %v738_v7  ;;  %v744_v18 = vmul.f32 %v741_v8, %v739_v10  ;;  %v745_v19 = vmul.f32 %v741_v8, %v740_v11 }
  0xbb   : > { %v750_v20 = vstv %s736_s16 }
  0xbc   : > { %v751_v21 = vmul.f32 %v750_v20, %v746_v12  ;;  %v752_v22 = vmul.f32 %v750_v20, %v747_v13  ;;  %v753_v23 = vmul.f32 %v750_v20, %v748_v14  ;;  %v754_v24 = vmul.f32 %v750_v20, %v749_v15 }
  0xbe   : > { %v755_v25 = vadd.f32 %v751_v21, %v742_v16  ;;  %v756_v26 = vadd.f32 %v752_v22, %v743_v17  ;;  %v757_v27 = vadd.f32 %v753_v23, %v744_v18  ;;  %v758_v28 = vadd.f32 %v754_v24, %v745_v19 }
  0xc0   : > { %v759_v29 = vpack.c.bf16 %v756_v26, %v755_v25  ;;  %v760_v30 = vpack.c.bf16 %v758_v28, %v757_v27 }
  0xc2   : > { %3302 = vmatprep.mubr.msk.bf16.mxu0 %vm776_vm0, %v759_v29 }
  0xc3   : > { %3303 = vmatmul.mubr.msk.bf16.vlgmr.msra.gmra.mrb[0].mxu0 %vm776_vm0, %v760_v30 }
 0x196   : > { %v3304_v38 = vpop.f32.mrb[0].mxu0 }
 0x197   : > { %v826_v39 = vadd.f32 %v3304_v38, %v2982_v37  ;;  %v817_v40 = vpop.f32.mrb[1].mxu0 }
 0x198   : > { %v818_v41 = vadd.f32 %v2982_v37, %v817_v40  ;;  %v3305_v42 = vpop.f32.mrb[2].mxu0 }
 0x199   : > { %v834_v43 = vmax.f32 %v826_v39, 0.0   ;;  %v829_v44 = vadd.f32 %v3305_v42, %v2982_v37  ;;  %v820_v45 = vpop.f32.mrb[3].mxu0 }
 0x19a   : > { %v832_v46 = vmax.f32 %v818_v41, 0.0   ;;  %v821_v47 = vadd.f32 %v2982_v37, %v820_v45 }
 0x19b   : > { %v835_v48 = vmax.f32 %v829_v44, 0.0  }
 0x19c   : > { %v833_v49 = vmax.f32 %v821_v47, 0.0  }
 0x19d LB: >> { %v4138_v52 = vmov 0   ;;  %s3268_s23 = sshll.u32 %s4127_s24, 6  ;;  %s3270_s26 = smul.u32 768, %s4127_s24  ;;  %vm978_vm1 = vcmask 261120   ;;  %vm914_vm2 = vcmp.lt.s32.totalorder %v4454_v32, 7  ;;  %vm889_vm3 = vcmp.lt.s32.totalorder %v4454_v32, 1  ;;  %s4127_s24 = sphi %s4480_s24, %s859_s24   ;;  %v4123_v46 = vphi %v832_v46, %v4983_v46   ;;  %v4119_v49 = vphi %v833_v49, %v2452_v49   ;;  %v4115_v43 = vphi %v834_v43, %v2453_v43   ;;  %v4111_v48 = vphi %v835_v48, %v2454_v48   ;;  %v4107_v51 = vphi %v4470_v51, %v4982_v51   ;;  %v4103_v50 = vphi %v4468_v50, %v4981_v50  }
 0x19e   : >> { %1017 = vmatprep.mubr.bf16.mxu0 %v4138_v52  ;;  %1634 = vmatprep.mubr.bf16.mxu1 %v4138_v52  ;;  %s4510_s12 = scalar_lea.vmem %s4918_s9, %s3268_s23  ;;  %s2986_s1 = sshll.u32 %s4127_s24, 1  ;;  %vm882_vm4 = vcmp.ge.s32.totalorder %v4458_v35, 1  ;;  %vm4140_vm5 = vmmov 1   ;;  %vm908_vm7 = vcmp.lt.s32.totalorder %v4460_v36, 15  ;;  %vm1688_vm9 = vcmp.lt.s32.totalorder %v4454_v32, 2 }
 0x19f   : >> { %v3584_v53 = vld [vmem:[%s4510_s12 + $0x4] ss:$8 sps:$4 sm:$0xff]   ;;  %v3586_v54 = vld [vmem:[%s4510_s12] ss:$8 sps:$4 sm:$0xff]   ;;  %v3587_v55 = vld [vmem:[%s4510_s12 + $0x14] ss:$8 sps:$4 sm:$0xff]   ;;  %s4534_s20 = scalar_lea.vmem %s4445_s21, %s2986_s1 }
 0x1a0   : >> { %985 = vmatprep.subr.bf16.mxu0 %v3584_v53  ;;  %s4515_s14 = scalar_lea.vmem [#allocation6], %s3270_s26  ;;  %v3589_v56 = vld [vmem:[%s4510_s12 + $0x10] ss:$8 sps:$4 sm:$0xff]   ;;  %v2987_v4 = vld [vmem:[%s4534_s20] ss:$0 sm:$0xff]  ;;  %s3272_s8 = sshll.u32 %s4127_s24, 8  ;;  %vm3047_vm6 = vmpackc.low %vm882_vm4, %vm4140_vm5 }
 0x1a1   : >> { %986 = vmatpush1.bf16.msra.mxu0 %v3586_v54  ;;  %v3592_v57 = vld [vmem:[%s4515_s14 + $0x4] ss:$8 sps:$4 sm:$0xff]   ;;  %v3590_v58 = vld [vmem:[%s4515_s14] ss:$8 sps:$4 sm:$0xff]   ;;  %v3595_v59 = vld [vmem:[%s4515_s14 + $0x14] ss:$8 sps:$4 sm:$0xff]   ;;  %v877_v5 = vadd.f32 %v4123_v46, %v2987_v4  ;;  %v4541_v7 = vadd.f32 %v4119_v49, %v2987_v4  ;;  %v4544_v8 = vadd.f32 %v4115_v43, %v2987_v4  ;;  %v880_v45 = vadd.f32 %v4111_v48, %v2987_v4 }
 0x1a2   : >> { %987 = vmatprep.subr.bf16.mxu0 %v3587_v55  ;;  %v3593_v60 = vld [vmem:[%s4515_s14 + $0x10] ss:$8 sps:$4 sm:$0xff]   ;;  %v3598_v61 = vld [vmem:[%s4515_s14 + $0x24] ss:$8 sps:$4 sm:$0xff]   ;;  %v3596_v62 = vld [vmem:[%s4515_s14 + $0x20] ss:$8 sps:$4 sm:$0xff]  }
 0x1a3   : >> { %v3601_v63 = vld [vmem:[%s4515_s14 + $0x34] ss:$8 sps:$4 sm:$0xff]   ;;  %v3599_v0 = vld [vmem:[%s4515_s14 + $0x30] ss:$8 sps:$4 sm:$0xff]   ;;  %v3604_v1 = vld [vmem:[%s4515_s14 + $0x44] ss:$8 sps:$4 sm:$0xff]   ;;  %v932_v14 = vpack.c.bf16 %v4541_v7, %v877_v5 }
 0x1a4   : >> { %v3602_v2 = vld [vmem:[%s4515_s14 + $0x40] ss:$8 sps:$4 sm:$0xff]   ;;  %v3607_v3 = vld [vmem:[%s4515_s14 + $0x54] ss:$8 sps:$4 sm:$0xff]   ;;  %v3605_v10 = vld [vmem:[%s4515_s14 + $0x50] ss:$8 sps:$4 sm:$0xff]  }
 0x1a5   : >> { %988 = vmatpush1.bf16.msra.mxu0 %v3589_v56  ;;  %v910_v11 = vrot.slane %v877_v5, 1  ;;  %v911_v12 = vrot.slane %v4541_v7, 1  ;;  %v3610_v13 = vld [vmem:[%s4515_s14 + $0x64] ss:$8 sps:$4 sm:$0xff]   ;;  %v912_v15 = vrot.slane %v4544_v8, 1  ;;  %s4569_s19 = scalar_lea.vmem [#allocation7], %s3272_s8  ;;  %v935_v56 = vpack.c.bf16 %v880_v45, %v4544_v8  ;;  %vm3050_vm8 = vmpackc.low %vm4140_vm5, %vm908_vm7 }
 0x1a6   : >> { %1342 = vmatprep.subr.bf16.mxu0 %v3592_v57  ;;  %v3608_v18 = vld [vmem:[%s4515_s14 + $0x60] ss:$8 sps:$4 sm:$0xff]   ;;  %v3613_v20 = vld [vmem:[%s4515_s14 + $0x74] ss:$8 sps:$4 sm:$0xff]   ;;  %v3611_v21 = vld [vmem:[%s4515_s14 + $0x70] ss:$8 sps:$4 sm:$0xff]  }
 0x1a7   : >> { %v4554_v16 = vsel %vm914_vm2, %v910_v11, %v911_v12  ;;  %v4560_v17 = vsel %vm914_vm2, %v911_v12, %v912_v15  ;;  %v3616_v22 = vld [vmem:[%s4515_s14 + $0x84] ss:$8 sps:$4 sm:$0xff]   ;;  %v3614_v23 = vld [vmem:[%s4515_s14 + $0x80] ss:$8 sps:$4 sm:$0xff]   ;;  %v3619_v24 = vld [vmem:[%s4515_s14 + $0x94] ss:$8 sps:$4 sm:$0xff]  }
 0x1a8   : >> { %2995 = vmatmul.mubr.msk.bf16.vlgmr.msra.gmra.mrb[0].mxu0 %vm978_vm1, %v4450_v6  ;;  %v933_v19 = vpack.c.bf16 %v4560_v17, %v4554_v16  ;;  %v3617_v25 = vld [vmem:[%s4515_s14 + $0x90] ss:$8 sps:$4 sm:$0xff]   ;;  %v3622_v26 = vld [vmem:[%s4515_s14 + $0xa4] ss:$8 sps:$4 sm:$0xff]   ;;  %v3620_v27 = vld [vmem:[%s4515_s14 + $0xa0] ss:$8 sps:$4 sm:$0xff]  }
 0x1a9   : >> { %1343 = vmatpush1.bf16.msra.mxu0 %v3590_v58  ;;  %1027 = vmatprep.mubr.bf16.mxu0 %v4138_v52  ;;  %v3625_v28 = vld [vmem:[%s4515_s14 + $0xb4] ss:$8 sps:$4 sm:$0xff]   ;;  %v3623_v29 = vld [vmem:[%s4515_s14 + $0xb0] ss:$8 sps:$4 sm:$0xff]   ;;  %v3628_v30 = vld [vmem:[%s4515_s14 + $0xc4] ss:$8 sps:$4 sm:$0xff]  }
 0x1aa   : >> { %1344 = vmatprep.subr.bf16.mxu0 %v3595_v59  ;;  %v3626_v31 = vld [vmem:[%s4515_s14 + $0xc0] ss:$8 sps:$4 sm:$0xff]   ;;  %v3631_v33 = vld [vmem:[%s4515_s14 + $0xd4] ss:$8 sps:$4 sm:$0xff]   ;;  %v3629_v34 = vld [vmem:[%s4515_s14 + $0xd0] ss:$8 sps:$4 sm:$0xff]  }
 0x1ab   : >> { %v3634_v37 = vld [vmem:[%s4515_s14 + $0xe4] ss:$8 sps:$4 sm:$0xff]   ;;  %v3632_v38 = vld [vmem:[%s4515_s14 + $0xe0] ss:$8 sps:$4 sm:$0xff]   ;;  %v885_v39 = vrot.slane %v877_v5, 7  ;;  %v886_v40 = vrot.slane %v4541_v7, 7 }
 0x1ac   : >> { %v3637_v41 = vld [vmem:[%s4515_s14 + $0xf4] ss:$8 sps:$4 sm:$0xff]   ;;  %v3635_v42 = vld [vmem:[%s4515_s14 + $0xf0] ss:$8 sps:$4 sm:$0xff]   ;;  %v3640_v47 = vld [vmem:[%s4515_s14 + $0x104] ss:$8 sps:$4 sm:$0xff]  }
 0x1ad   : >> { %1345 = vmatpush1.bf16.msra.mxu0 %v3593_v60  ;;  %v892_v44 = vsel %vm889_vm3, %v885_v39, %v886_v40  ;;  %v4139_v53 = vmov 0.0   ;;  %v3638_v55 = vld [vmem:[%s4515_s14 + $0x100] ss:$8 sps:$4 sm:$0xff]   ;;  %v887_v57 = vrot.slane %v4544_v8, 7  ;;  %v888_v58 = vrot.slane %v880_v45, 7  ;;  %s4647_s30 = sshll.u32 %s4127_s24, 2 }
 0x1ae   : >> { %1346 = vmatprep.subr.bf16.mxu0 %v3598_v61  ;;  %v3048_v54 = vpack.c.bf16 %v892_v44, %v4139_v53  ;;  %v3643_v59 = vld [vmem:[%s4515_s14 + $0x114] ss:$8 sps:$4 sm:$0xff]   ;;  %v3641_v60 = vld [vmem:[%s4515_s14 + $0x110] ss:$8 sps:$4 sm:$0xff]   ;;  %v3652_v4 = vld [vmem:[%s4515_s14 + $0x144] ss:$8 sps:$4 sm:$0xff]   ;;  %s4653_s18 = scalar_lea.vmem %s4919_s10, %s4647_s30 }
 0x1af   : >> { %v890_v61 = vsel %vm889_vm3, %v887_v57, %v888_v58  ;;  %v3650_v5 = vld [vmem:[%s4515_s14 + $0x140] ss:$8 sps:$4 sm:$0xff]   ;;  %v3655_v7 = vld [vmem:[%s4515_s14 + $0x154] ss:$8 sps:$4 sm:$0xff]   ;;  %v3658_v11 = vld [vmem:[%s4515_s14 + $0x164] ss:$8 sps:$4 sm:$0xff]  }
 0x1b0   : >> { %2996 = vmatmul.mubr.msk.bf16.gmra.mrb[4].mxu0 %vm978_vm1, %v4452_v9  ;;  %v3656_v12 = vld [vmem:[%s4515_s14 + $0x160] ss:$8 sps:$4 sm:$0xff]   ;;  %v3662_v16 = vld [vmem:[%s4569_s19 + $0x4] ss:$8 sps:$4 sm:$0xff]   ;;  %v3665_v8 = vld [vmem:[%s4569_s19 + $0x14] ss:$8 sps:$4 sm:$0xff]  }
 0x1b1   : >> { %1347 = vmatpush1.bf16.msra.mxu0 %v3596_v62  ;;  %1374 = vmatprep.mubr.bf16.mxu0 %v932_v14  ;;  %v891_v62 = vsel %vm889_vm3, %v886_v40, %v887_v57  ;;  %v3659_v14 = vld [vmem:[%s4515_s14 + $0x170] ss:$8 sps:$4 sm:$0xff]   ;;  %v3664_v17 = vld [vmem:[%s4569_s19] ss:$8 sps:$4 sm:$0xff]   ;;  %s4978_s11 = sld [smem:[#allocation30_spill]]  ;;  %s4979_s28 = sld [smem:[#allocation32_spill]] }
 0x1b2   : >> { %1348 = vmatprep.subr.bf16.mxu0 %v3601_v63  ;;  %v3646_v63 = vld [vmem:[%s4515_s14 + $0x124] ss:$8 sps:$4 sm:$0xff]   ;;  %1602 = vmatprep.subr.bf16.mxu1 %v3662_v16  ;;  %vm1681_vm10 = vcmp.ge.s32.totalorder %v4458_v35, 2  ;;  %vm1713_vm12 = vcmp.lt.s32.totalorder %v4454_v32, 6  ;;  %vm1707_vm13 = vcmp.lt.s32.totalorder %v4460_v36, 14  ;;  %s859_s24 = sadd.s32 1, %s4127_s24  }
 0x1b3   : >> { %1603 = vmatpush1.bf16.msra.mxu1 %v3664_v17  ;;  %vm3194_vm11 = vmpackc.low %vm1681_vm10, %vm4140_vm5  ;;  %p856_p1 = scmp.ge.s32.totalorder %s859_s24, 2  }
 0x1b4   : >> { %1604 = vmatprep.subr.bf16.mxu1 %v3665_v8  ;;  %vm3197_vm14 = vmpackc.low %vm4140_vm5, %vm1707_vm13  ;;  %vm4142_vm15 = vmmov (%p856_p1), 0   ;;  %v3847_v35 = vld [vmem:[#allocation10 + $0x18] sm:$0xff] (%p856_p1)   ;;  %v3842_v36 = vld [vmem:[#allocation9 + $0x30] sm:$0xff] (%p856_p1)   ;;  %s4985_s8 = sld [smem:[#allocation34_spill]] (%p856_p1)  ;;  %s2705_s29 = sshll.u32 (%p856_p1), %s4466_s7, 4  ;;  %s4857_s29 = int_to_ptr.vmem [resolvable:$true] %s2705_s29 }
 0x1b5   : >> { %1349 = vmatpush1.bf16.msra.mxu0 %v3599_v0  ;;  %v934_v0 = vpack.c.bf16 %v890_v61, %v891_v62  ;;  %s4987_s16 = sld [smem:[#allocation35_spill]] (%p856_p1)  ;;  %s4143_s26 = smov (%p856_p1), [#allocation12]  }
 0x1b6   : >> { %1350 = vmatprep.subr.bf16.mxu0 %v3604_v1  ;;  %v3644_v1 = vld [vmem:[%s4515_s14 + $0x120] ss:$8 sps:$4 sm:$0xff]   ;;  %s3981_s0 = sshll.u32 (%p856_p1), %s4143_s26, 4  ;;  %s3982_s0 = int_to_ptr.vmem [resolvable:$false] %s3981_s0 }
 0x1b7   : >> { %s4659_s23 = scalar_lea.vmem %s4978_s11, %s4647_s30  ;;  %p3984_p12 = scmp.lt.s32.totalorder (%p856_p1), %s4857_s29, %s3982_s0 }
 0x1b8   : >> { %v1090_v39 = vld [vmem:[%s4659_s23] sm:$0x3] }
 0x1b9   : >> { %1351 = vmatpush1.bf16.msra.mxu0 %v3602_v2  ;;  %v3649_v2 = vld [vmem:[%s4515_s14 + $0x134] ss:$8 sps:$4 sm:$0xff]  }
 0x1ba   : >> { %1352 = vmatprep.subr.bf16.mxu0 %v3607_v3  ;;  %v3647_v3 = vld [vmem:[%s4515_s14 + $0x130] ss:$8 sps:$4 sm:$0xff]  }
 0x1bd   : >> { %1353 = vmatpush1.bf16.msra.mxu0 %v3605_v10  ;;  %v3653_v10 = vld [vmem:[%s4515_s14 + $0x150] ss:$8 sps:$4 sm:$0xff]  }
 0x1be   : >> { %1354 = vmatprep.subr.bf16.mxu0 %v3610_v13  ;;  %v3661_v13 = vld [vmem:[%s4515_s14 + $0x174] ss:$8 sps:$4 sm:$0xff]  }
 0x1c1   : >> { %1355 = vmatpush1.bf16.msra.mxu0 %v3608_v18  ;;  %v913_v18 = vrot.slane %v880_v45, 1 }
 0x1c2   : >> { %1356 = vmatprep.subr.bf16.mxu0 %v3613_v20 }
 0x1c3   : >> { %v915_v20 = vsel %vm914_vm2, %v912_v15, %v913_v18  ;;  %v3667_v15 = vld [vmem:[%s4569_s19 + $0x10] ss:$8 sps:$4 sm:$0xff]  }
 0x1c4   : >> { %1605 = vmatpush1.bf16.msra.mxu1 %v3667_v15 }
 0x1c5   : >> { %1357 = vmatpush1.bf16.msra.mxu0 %v3611_v21  ;;  %v3051_v21 = vpack.c.bf16 %v4139_v53, %v915_v20 }
 0x1c6   : >> { %1358 = vmatprep.subr.bf16.mxu0 %v3616_v22  ;;  %v3670_v22 = vld [vmem:[%s4569_s19 + $0x20] ss:$8 sps:$4 sm:$0xff]  }
 0x1c9   : >> { %1359 = vmatpush1.bf16.msra.mxu0 %v3614_v23  ;;  %v3671_v23 = vld [vmem:[%s4569_s19 + $0x34] ss:$8 sps:$4 sm:$0xff]  }
 0x1ca   : >> { %1360 = vmatprep.subr.bf16.mxu0 %v3619_v24  ;;  %v3673_v24 = vld [vmem:[%s4569_s19 + $0x30] ss:$8 sps:$4 sm:$0xff]  }
 0x1cd   : >> { %1361 = vmatpush1.bf16.msra.mxu0 %v3617_v25  ;;  %v3674_v25 = vld [vmem:[%s4569_s19 + $0x44] ss:$8 sps:$4 sm:$0xff]  }
 0x1ce   : >> { %1362 = vmatprep.subr.bf16.mxu0 %v3622_v26  ;;  %v3676_v26 = vld [vmem:[%s4569_s19 + $0x40] ss:$8 sps:$4 sm:$0xff]  }
 0x1d1   : >> { %1363 = vmatpush1.bf16.msra.mxu0 %v3620_v27  ;;  %v3677_v27 = vld [vmem:[%s4569_s19 + $0x54] ss:$8 sps:$4 sm:$0xff]  }
 0x1d2   : >> { %1364 = vmatprep.subr.bf16.mxu0 %v3625_v28  ;;  %v3679_v28 = vld [vmem:[%s4569_s19 + $0x50] ss:$8 sps:$4 sm:$0xff]  }
 0x1d5   : >> { %1365 = vmatpush1.bf16.msra.mxu0 %v3623_v29  ;;  %v3680_v29 = vld [vmem:[%s4569_s19 + $0x64] ss:$8 sps:$4 sm:$0xff]  }
 0x1d6   : >> { %1366 = vmatprep.subr.bf16.mxu0 %v3628_v30  ;;  %v3682_v30 = vld [vmem:[%s4569_s19 + $0x60] ss:$8 sps:$4 sm:$0xff]  }
 0x1d9   : >> { %1367 = vmatpush1.bf16.msra.mxu0 %v3626_v31  ;;  %v3683_v31 = vld [vmem:[%s4569_s19 + $0x74] ss:$8 sps:$4 sm:$0xff]  }
 0x1da   : >> { %1368 = vmatprep.subr.bf16.mxu0 %v3631_v33  ;;  %v3685_v33 = vld [vmem:[%s4569_s19 + $0x70] ss:$8 sps:$4 sm:$0xff]  }
 0x1dd   : >> { %1369 = vmatpush1.bf16.msra.mxu0 %v3629_v34  ;;  %v3688_v34 = vld [vmem:[%s4510_s12 + $0x24] ss:$8 sps:$4 sm:$0xff]  }
 0x1de   : >> { %1370 = vmatprep.subr.bf16.mxu0 %v3634_v37  ;;  %v4662_v37 = vsub.s32 0, %v4454_v32 }
 0x1e1   : >> { %1371 = vmatpush1.bf16.msra.mxu0 %v3632_v38  ;;  %v946_v38 = vld [vmem:[%s4653_s18] sm:$0x3] }
 0x1e2   : >> { %1372 = vmatprep.subr.bf16.mxu0 %v3637_v41  ;;  %v951_v40 = vrot.slane %v946_v38, %v4662_v37  ;;  %v1095_v41 = vrot.slane %v1090_v39, %v4662_v37 }
 0x1e5   : >> { %1373 = vmatpush1.bf16.msra.mxu0 %v3635_v42  ;;  %v3346_v42 = vadd.f32 %v1095_v41, %v951_v40 }
 0x1e6   : >> { %1395 = vmatprep.subr.bf16.mxu0 %v3640_v47  ;;  %v4669_v47 = vsub.s32 1, %v4454_v32  ;;  %v3841_v32 = vld [vmem:[#allocation9 + $0x28] sm:$0xff] (%p856_p1)  }
 0x1e8   : >> { %3049 = vmatmul.mubr.msk.bf16.vlgmr.msra.gmra.mrb[0].mxu0 %vm3047_vm6, %v3048_v54 }
 0x1e9   : >> { %1396 = vmatpush1.bf16.msra.mxu0 %v3638_v55  ;;  %1384 = vmatprep.mubr.bf16.mxu0 %v935_v56 }
 0x1ea   : >> { %1397 = vmatprep.subr.bf16.mxu0 %v3643_v59  ;;  %v955_v59 = vrot.slane %v946_v38, %v4669_v47 }
 0x1ed   : >> { %1398 = vmatpush1.bf16.msra.mxu0 %v3641_v60  ;;  %v1099_v60 = vrot.slane %v1090_v39, %v4669_v47  ;;  %v3694_v39 = vld [vmem:[%s4515_s14 + $0x184] ss:$8 sps:$4 sm:$0xff]  }
 0x1ee   : >> { %1399 = vmatprep.subr.bf16.mxu0 %v3646_v63 }
 0x1ef   : >> { %v3348_v63 = vadd.f32 %v1099_v60, %v955_v59  ;;  %v3706_v59 = vld [vmem:[%s4515_s14 + $0x1c4] ss:$8 sps:$4 sm:$0xff]   ;;  %v3704_v60 = vld [vmem:[%s4515_s14 + $0x1c0] ss:$8 sps:$4 sm:$0xff]  }
 0x1f0   : >> { %1385 = vmatmul.mubr.bf16.gmra.mrb[4].mxu0 %v934_v0 }
 0x1f1   : >> { %1400 = vmatpush1.bf16.msra.mxu0 %v3644_v1  ;;  %1427 = vmatprep.mubr.bf16.mxu0 %v4138_v52 }
 0x1f2   : >> { %1401 = vmatprep.subr.bf16.mxu0 %v3649_v2 }
 0x1f5   : >> { %1402 = vmatpush1.bf16.msra.mxu0 %v3647_v3 }
 0x1f6   : >> { %1403 = vmatprep.subr.bf16.mxu0 %v3652_v4 }
 0x1f9   : >> { %1404 = vmatpush1.bf16.msra.mxu0 %v3650_v5 }
 0x1fa   : >> { %1405 = vmatprep.subr.bf16.mxu0 %v3655_v7 }
 0x1fd   : >> { %1406 = vmatpush1.bf16.msra.mxu0 %v3653_v10 }
 0x1fe   : >> { %1407 = vmatprep.subr.bf16.mxu0 %v3658_v11 }
 0x201   : >> { %1408 = vmatpush1.bf16.msra.mxu0 %v3656_v12 }
 0x202   : >> { %1409 = vmatprep.subr.bf16.mxu0 %v3661_v13 }
 0x205   : >> { %1410 = vmatpush1.bf16.msra.mxu0 %v3659_v14 }
 0x208   : >> { %1428 = vmatmul.mubr.bf16.vlgmr.msra.gmra.mrb[0].mxu0 %v933_v19  ;;  %v3668_v19 = vld [vmem:[%s4569_s19 + $0x24] ss:$8 sps:$4 sm:$0xff]  }
 0x209   : >> { %1437 = vmatprep.mubr.bf16.mxu0 %v4138_v52  ;;  %1606 = vmatprep.subr.bf16.mxu1 %v3668_v19 }
 0x20a   : >> { %1607 = vmatpush1.bf16.msra.mxu1 %v3670_v22 }
 0x20b   : >> { %1608 = vmatprep.subr.bf16.mxu1 %v3671_v23 }
 0x20e   : >> { %1609 = vmatpush1.bf16.msra.mxu1 %v3673_v24 }
 0x20f   : >> { %1610 = vmatprep.subr.bf16.mxu1 %v3674_v25 }
 0x210   : >> { %3052 = vmatmul.mubr.msk.bf16.gmra.mrb[4].mxu0 %vm3050_vm8, %v3051_v21 }
 0x211   : >> { %2426 = vmatprep.mubr.bf16.mxu0 %v4138_v52 }
 0x212   : >> { %1611 = vmatpush1.bf16.msra.mxu1 %v3676_v26 }
 0x213   : >> { %1612 = vmatprep.subr.bf16.mxu1 %v3677_v27  ;;  %v3686_v27 = vld [vmem:[%s4510_s12 + $0x20] ss:$8 sps:$4 sm:$0xff]  }
 0x216   : >> { %1613 = vmatpush1.bf16.msra.mxu1 %v3679_v28 }
 0x217   : >> { %1614 = vmatprep.subr.bf16.mxu1 %v3680_v29  ;;  %v3691_v29 = vld [vmem:[%s4510_s12 + $0x34] ss:$8 sps:$4 sm:$0xff]  }
 0x21a   : >> { %1615 = vmatpush1.bf16.msra.mxu1 %v3682_v30 }
 0x21b   : >> { %1616 = vmatprep.subr.bf16.mxu1 %v3683_v31 }
 0x21e   : >> { %1617 = vmatpush1.bf16.msra.mxu1 %v3685_v33  ;;  %v3689_v33 = vld [vmem:[%s4510_s12 + $0x30] ss:$8 sps:$4 sm:$0xff]   ;;  %s4720_s12 = scalar_lea.vmem %s4979_s28, %s4647_s30  ;;  %s3278_s30 = sshll.u32 (%p856_p1), %s4091_s27, 8 }
 0x21f   : >> { %1777 = vmatprep.subr.bf16.mxu1 %v3688_v34  ;;  %s4855_s5 = scalar_lea.hbm (%p856_p1), %s4987_s16, %s3278_s30  ;;  %s4988_s27 = sand.u32 (%p856_p1), 1, %s4083_s25  }
 0x220   : > { %s4863_s11 = scalar_lea.sflag (%p856_p1), [#allocation4], %s4988_s27  ;;  %s3983_s28 = scalar_lea.vmem (%p856_p1), %s3982_s0, 512 }
 0x2db   : >> { %v1429_v44 = vpop.f32.mrb[0].mxu0 }
 0x2dc   : >> { %v3347_v45 = vadd.f32 %v3346_v42, %v1429_v44  ;;  %v1431_v54 = vpop.f32.mrb[1].mxu0  ;;  %v3692_v44 = vld [vmem:[%s4515_s14 + $0x180] ss:$8 sps:$4 sm:$0xff]  }
 0x2dd   : >> { %v1433_v55 = vpop.f32.mrb[2].mxu0  ;;  %v3349_v7 = vadd.f32 %v3348_v63, %v1431_v54  ;;  %v3695_v54 = vld [vmem:[%s4515_s14 + $0x190] ss:$8 sps:$4 sm:$0xff]  }
 0x2de   : >> { %v3053_v56 = vmul.f32 -1.442695, %v3347_v45  ;;  %v3351_v57 = vadd.f32 %v3346_v42, %v1433_v55  ;;  %v1435_v58 = vpop.f32.mrb[3].mxu0  ;;  %v3697_v45 = vld [vmem:[%s4515_s14 + $0x194] ss:$8 sps:$4 sm:$0xff]  }
 0x2df   : >> { %v3353_v12 = vadd.f32 %v3348_v63, %v1435_v58  ;;  %v3700_v55 = vld [vmem:[%s4515_s14 + $0x1a4] ss:$8 sps:$4 sm:$0xff]   ;;  %v3701_v58 = vld [vmem:[%s4515_s14 + $0x1b0] ss:$8 sps:$4 sm:$0xff]  }
 0x2e0   : >> { %3788 = vpow2.f32 %v3053_v56  ;;  %v3054_v61 = vmul.f32 -1.442695, %v3351_v57  ;;  %v3698_v56 = vld [vmem:[%s4515_s14 + $0x1a0] ss:$8 sps:$4 sm:$0xff]   ;;  %v3703_v57 = vld [vmem:[%s4515_s14 + $0x1b4] ss:$8 sps:$4 sm:$0xff]  }
 0x2e2   : >> { %3790 = vpow2.f32 %v3054_v61  ;;  %v3709_v61 = vld [vmem:[%s4515_s14 + $0x1d4] ss:$8 sps:$4 sm:$0xff]  }
 0x2e3   : >> { %v1439_v62 = vpop.f32.mrb[4].mxu0 }
 0x2e4   : >> { %v3355_v0 = vadd.f32 %v3346_v42, %v1439_v62  ;;  %v1441_v1 = vpop.f32.mrb[5].mxu0  ;;  %v3707_v62 = vld [vmem:[%s4515_s14 + $0x1d0] ss:$8 sps:$4 sm:$0xff]  }
 0x2e5   : >> { %v1443_v2 = vpop.f32.mrb[6].mxu0  ;;  %v3357_v20 = vadd.f32 %v3348_v63, %v1441_v1  ;;  %v3715_v1 = vld [vmem:[%s4515_s14 + $0x1f4] ss:$8 sps:$4 sm:$0xff]  }
 0x2e6   : >> { %v3055_v3 = vmul.f32 -1.442695, %v3355_v0  ;;  %v3359_v4 = vadd.f32 %v3346_v42, %v1443_v2  ;;  %v1445_v5 = vpop.f32.mrb[7].mxu0  ;;  %v3710_v0 = vld [vmem:[%s4515_s14 + $0x1e0] ss:$8 sps:$4 sm:$0xff]  }
 0x2e7   : >> { %v3361_v16 = vadd.f32 %v3348_v63, %v1445_v5  ;;  %v3712_v63 = vld [vmem:[%s4515_s14 + $0x1e4] ss:$8 sps:$4 sm:$0xff]   ;;  %v3713_v2 = vld [vmem:[%s4515_s14 + $0x1f0] ss:$8 sps:$4 sm:$0xff]   ;;  %v3721_v5 = vld [vmem:[%s4515_s14 + $0x214] ss:$8 sps:$4 sm:$0xff]  }
 0x2e8   : >> { %3792 = vpow2.f32 %v3055_v3  ;;  %v3056_v10 = vmul.f32 -1.442695, %v3359_v4  ;;  %v3718_v3 = vld [vmem:[%s4515_s14 + $0x204] ss:$8 sps:$4 sm:$0xff]   ;;  %v3716_v4 = vld [vmem:[%s4515_s14 + $0x200] ss:$8 sps:$4 sm:$0xff]  }
 0x2ea   : >> { %v3789_v11 = vpop.eup %3788  ;;  %3794 = vpow2.f32 %v3056_v10  ;;  %v3724_v10 = vld [vmem:[%s4515_s14 + $0x224] ss:$8 sps:$4 sm:$0xff]  }
 0x2eb   : >> { %v1468_v13 = vadd.f32 1.0, %v3789_v11  ;;  %3796 = vtanh.f32 %v3349_v7  ;;  %v3719_v7 = vld [vmem:[%s4515_s14 + $0x210] ss:$8 sps:$4 sm:$0xff]   ;;  %v3722_v11 = vld [vmem:[%s4515_s14 + $0x220] ss:$8 sps:$4 sm:$0xff]  }
 0x2ec   : >> { %v3791_v14 = vpop.eup %3790 }
 0x2ed   : >> { %3798 = vrcp.f32 %v1468_v13  ;;  %v1469_v18 = vadd.f32 1.0, %v3791_v14  ;;  %v3725_v13 = vld [vmem:[%s4515_s14 + $0x230] ss:$8 sps:$4 sm:$0xff]   ;;  %v3730_v14 = vld [vmem:[%s4515_s14 + $0x244] ss:$8 sps:$4 sm:$0xff]  }
 0x2ee   : >> { %3800 = vtanh.f32 %v3353_v12  ;;  %v3727_v12 = vld [vmem:[%s4515_s14 + $0x234] ss:$8 sps:$4 sm:$0xff]  }
 0x2ef   : >> { %3802 = vrcp.f32 %v1469_v18  ;;  %v3728_v18 = vld [vmem:[%s4515_s14 + $0x240] ss:$8 sps:$4 sm:$0xff]  }
 0x2f0   : >> { %3804 = vtanh.f32 %v3357_v20  ;;  %v3733_v20 = vld [vmem:[%s4515_s14 + $0x254] ss:$8 sps:$4 sm:$0xff]  }
 0x2f2   : >> { %v3793_v21 = vpop.eup %3792 }
 0x2f3   : >> { %v1470_v17 = vadd.f32 1.0, %v3793_v21  ;;  %v3731_v21 = vld [vmem:[%s4515_s14 + $0x250] ss:$8 sps:$4 sm:$0xff]  }
 0x2f4   : >> { %v3795_v8 = vpop.eup %3794 }
 0x2f5   : >> { %3806 = vrcp.f32 %v1470_v17  ;;  %v1471_v15 = vadd.f32 1.0, %v3795_v8  ;;  %v3797_v19 = vpop.eup %3796  ;;  %v3734_v17 = vld [vmem:[%s4515_s14 + $0x260] ss:$8 sps:$4 sm:$0xff]   ;;  %v3739_v8 = vld [vmem:[%s4515_s14 + $0x274] ss:$8 sps:$4 sm:$0xff]  }
 0x2f6   : >> { %3808 = vtanh.f32 %v3361_v16  ;;  %v3736_v16 = vld [vmem:[%s4515_s14 + $0x264] ss:$8 sps:$4 sm:$0xff]  }
 0x2f7   : >> { %v3799_v22 = vpop.eup %3798  ;;  %3810 = vrcp.f32 %v1471_v15  ;;  %v3737_v15 = vld [vmem:[%s4515_s14 + $0x270] ss:$8 sps:$4 sm:$0xff]  }
 0x2f8   : >> { %v3801_v23 = vpop.eup %3800  ;;  %v1484_v24 = vmul.f32 %v3799_v22, %v3797_v19  ;;  %v3742_v19 = vld [vmem:[%s4515_s14 + $0x284] ss:$8 sps:$4 sm:$0xff]   ;;  %v4723_v22 = vld [vmem:[%s4720_s12] sm:$0x3] }
 0x2f9   : >> { %v3803_v25 = vpop.eup %3802 }
 0x2fa   : >> { %v1485_v26 = vmul.f32 %v3803_v25, %v3801_v23  ;;  %v3805_v30 = vpop.eup %3804  ;;  %v1515_v23 = vrot.slane %v4723_v22, %v4662_v37 }
 0x2fc   : >> { %v1488_v28 = vpack.c.bf16 %v1485_v26, %v1484_v24 }
 0x2fe   : >> { %1635 = vmatmul.mubr.bf16.vlgmr.msra.gmra.mrb[0].mxu1 %v1488_v28 }
 0x2ff   : >> { %v3807_v31 = vpop.eup %3806  ;;  %1644 = vmatprep.mubr.bf16.mxu1 %v4138_v52  ;;  %1778 = vmatpush1.bf16.msra.mxu1 %v3686_v27 }
 0x300   : >> { %v3809_v34 = vpop.eup %3808  ;;  %v1486_v38 = vmul.f32 %v3807_v31, %v3805_v30  ;;  %1779 = vmatprep.subr.bf16.mxu1 %v3691_v29  ;;  %v3077_v31 = vld [vmem:[%s4534_s20 + $0x1] ss:$0 sm:$0xff] }
 0x301   : >> { %v3811_v40 = vpop.eup %3810 }
 0x302   : >> { %v1487_v41 = vmul.f32 %v3811_v40, %v3809_v34 }
 0x303   : >> { %1780 = vmatpush1.bf16.msra.mxu1 %v3689_v33 }
 0x304   : >> { %v1489_v42 = vpack.c.bf16 %v1487_v41, %v1486_v38  ;;  %2134 = vmatprep.subr.bf16.mxu1 %v3694_v39 }
 0x306   : >> { %1645 = vmatmul.mubr.bf16.gmra.mrb[4].mxu1 %v1489_v42 }
 0x307   : >> { %1809 = vmatprep.mubr.bf16.mxu1 %v4138_v52 }
 0x30e   : >> { %3091 = vmatmul.mubr.msk.bf16.vlgmr.msra.gmra.mrb[8].mxu1 %vm978_vm1, %v4450_v6  ;;  %v3840_v6 = vld [vmem:[#allocation9 + $0x20] sm:$0xff] (%p856_p1)  }
 0x30f   : >> { %2135 = vmatpush1.bf16.msra.mxu1 %v3692_v44  ;;  %1819 = vmatprep.mubr.bf16.mxu1 %v4138_v52 }
 0x310   : >> { %2136 = vmatprep.subr.bf16.mxu1 %v3697_v45 }
 0x313   : >> { %2137 = vmatpush1.bf16.msra.mxu1 %v3695_v54 }
 0x314   : >> { %2138 = vmatprep.subr.bf16.mxu1 %v3700_v55 }
 0x316   : >> { %3092 = vmatmul.mubr.msk.bf16.gmra.mrb[12].mxu1 %vm978_vm1, %v4452_v9  ;;  %v3846_v9 = vld [vmem:[#allocation10 + $0x10] sm:$0xff] (%p856_p1)  }
 0x317   : >> { %2139 = vmatpush1.bf16.msra.mxu1 %v3698_v56 }
 0x318   : >> { %2140 = vmatprep.subr.bf16.mxu1 %v3703_v57 }
 0x31b   : >> { %2141 = vmatpush1.bf16.msra.mxu1 %v3701_v58 }
 0x31c   : >> { %2142 = vmatprep.subr.bf16.mxu1 %v3706_v59 }
 0x31f   : >> { %2143 = vmatpush1.bf16.msra.mxu1 %v3704_v60 }
 0x320   : >> { %2144 = vmatprep.subr.bf16.mxu1 %v3709_v61  ;;  %v3740_v61 = vld [vmem:[%s4515_s14 + $0x280] ss:$8 sps:$4 sm:$0xff]  }
 0x323   : >> { %2145 = vmatpush1.bf16.msra.mxu1 %v3707_v62 }
 0x324   : >> { %2146 = vmatprep.subr.bf16.mxu1 %v3712_v63 }
 0x327   : >> { %2147 = vmatpush1.bf16.msra.mxu1 %v3710_v0 }
 0x328   : >> { %2148 = vmatprep.subr.bf16.mxu1 %v3715_v1 }
 0x32b   : >> { %2149 = vmatpush1.bf16.msra.mxu1 %v3713_v2  ;;  %v3743_v2 = vld [vmem:[%s4515_s14 + $0x290] ss:$8 sps:$4 sm:$0xff]  }
 0x32c   : >> { %2150 = vmatprep.subr.bf16.mxu1 %v3718_v3  ;;  %v3748_v3 = vld [vmem:[%s4515_s14 + $0x2a4] ss:$8 sps:$4 sm:$0xff]  }
 0x32f   : >> { %2151 = vmatpush1.bf16.msra.mxu1 %v3716_v4 }
 0x330   : >> { %2152 = vmatprep.subr.bf16.mxu1 %v3721_v5 }
 0x333   : >> { %2153 = vmatpush1.bf16.msra.mxu1 %v3719_v7  ;;  %v3746_v7 = vld [vmem:[%s4515_s14 + $0x2a0] ss:$8 sps:$4 sm:$0xff]  }
 0x334   : >> { %2154 = vmatprep.subr.bf16.mxu1 %v3724_v10 }
 0x337   : >> { %2155 = vmatpush1.bf16.msra.mxu1 %v3722_v11 }
 0x338   : >> { %2156 = vmatprep.subr.bf16.mxu1 %v3727_v12 }
 0x33b   : >> { %2157 = vmatpush1.bf16.msra.mxu1 %v3725_v13  ;;  %v3751_v13 = vld [vmem:[%s4515_s14 + $0x2b4] ss:$8 sps:$4 sm:$0xff]  }
 0x33c   : >> { %2158 = vmatprep.subr.bf16.mxu1 %v3730_v14  ;;  %v3749_v14 = vld [vmem:[%s4515_s14 + $0x2b0] ss:$8 sps:$4 sm:$0xff]  }
 0x33f   : >> { %2159 = vmatpush1.bf16.msra.mxu1 %v3728_v18  ;;  %v3754_v18 = vld [vmem:[%s4515_s14 + $0x2c4] ss:$8 sps:$4 sm:$0xff]  }
 0x340   : >> { %2160 = vmatprep.subr.bf16.mxu1 %v3733_v20  ;;  %v3752_v20 = vld [vmem:[%s4515_s14 + $0x2c0] ss:$8 sps:$4 sm:$0xff]  }
 0x343   : >> { %2161 = vmatpush1.bf16.msra.mxu1 %v3731_v21  ;;  %v3757_v21 = vld [vmem:[%s4515_s14 + $0x2d4] ss:$8 sps:$4 sm:$0xff]  }
 0x344   : >> { %2162 = vmatprep.subr.bf16.mxu1 %v3736_v16  ;;  %v3755_v16 = vld [vmem:[%s4515_s14 + $0x2d0] ss:$8 sps:$4 sm:$0xff]  }
 0x347   : >> { %2163 = vmatpush1.bf16.msra.mxu1 %v3734_v17  ;;  %v3760_v17 = vld [vmem:[%s4515_s14 + $0x2e4] ss:$8 sps:$4 sm:$0xff]  }
 0x348   : >> { %2164 = vmatprep.subr.bf16.mxu1 %v3739_v8  ;;  %v3758_v8 = vld [vmem:[%s4515_s14 + $0x2e0] ss:$8 sps:$4 sm:$0xff]  }
 0x34b   : >> { %2165 = vmatpush1.bf16.msra.mxu1 %v3737_v15  ;;  %v3763_v15 = vld [vmem:[%s4515_s14 + $0x2f4] ss:$8 sps:$4 sm:$0xff]  }
 0x34c   : >> { %2187 = vmatprep.subr.bf16.mxu1 %v3742_v19 }
 0x3d1   : >> { %v1636_v24 = vpop.f32.mrb[0].mxu1 }
 0x3d2   : >> { %v1637_v25 = vadd.f32 %v1636_v24, %v1515_v23  ;;  %v1638_v26 = vpop.f32.mrb[1].mxu1  ;;  %v3761_v24 = vld [vmem:[%s4515_s14 + $0x2f0] ss:$8 sps:$4 sm:$0xff]  }
 0x3d3   : >> { %v1640_v27 = vpop.f32.mrb[2].mxu1 }
 0x3d4   : >> { %v1655_v28 = vadd.f32 %v4123_v46, %v1637_v25  ;;  %v1641_v29 = vadd.f32 %v1640_v27, %v1515_v23  ;;  %v4728_v30 = vpop.f32.mrb[3].mxu1 }
 0x3d6   : >> { %v4731_v33 = vmul.f32 0.70710677, %v1655_v28  ;;  %v1656_v34 = vadd.f32 %v4119_v49, %v1641_v29 }
 0x3d8   : >> { %v4735_v38 = vadd.f32 %v3077_v31, %v4731_v33  ;;  %v4737_v39 = vmul.f32 0.70710677, %v1656_v34 }
 0x3d9   : >> { %v1646_v40 = vpop.f32.mrb[4].mxu1 }
 0x3da   : >> { %v4740_v41 = vadd.f32 %v3077_v31, %v4737_v39  ;;  %v1647_v42 = vadd.f32 %v1646_v40, %v1515_v23  ;;  %v4742_v46 = vpop.f32.mrb[5].mxu1  ;;  %v1684_v49 = vrot.slane %v4735_v38, 6  ;;  %v1709_v25 = vrot.slane %v4735_v38, 2  ;;  %v3764_v40 = vld [vmem:[%s4569_s19 + $0x80] ss:$8 sps:$4 sm:$0xff]  }
 0x3db   : >> { %v1650_v44 = vpop.f32.mrb[6].mxu1 }
 0x3dc   : >> { %v1685_v45 = vrot.slane %v4740_v41, 6  ;;  %v1657_v54 = vadd.f32 %v4115_v43, %v1647_v42  ;;  %v1651_v55 = vadd.f32 %v1650_v44, %v1515_v23  ;;  %v1652_v56 = vpop.f32.mrb[7].mxu1  ;;  %v1731_v57 = vpack.c.bf16 %v4740_v41, %v4735_v38  ;;  %v3745_v43 = vld [vmem:[%s4515_s14 + $0x294] ss:$8 sps:$4 sm:$0xff]   ;;  %v3766_v38 = vld [vmem:[%s4569_s19 + $0x84] ss:$8 sps:$4 sm:$0xff]  }
 0x3dd   : >> { %v1710_v23 = vrot.slane %v4740_v41, 2  ;;  %2394 = vmatprep.subr.bf16.mxu0 %v3766_v38  ;;  %v3769_v41 = vld [vmem:[%s4569_s19 + $0x94] ss:$8 sps:$4 sm:$0xff]   ;;  %v3767_v42 = vld [vmem:[%s4569_s19 + $0x90] ss:$8 sps:$4 sm:$0xff]   ;;  %s4984_s14 = sld [smem:[#allocation33_spill]] (%p856_p1) }
 0x3de   : >> { %v1691_v58 = vsel %vm1688_vm9, %v1684_v49, %v1685_v45  ;;  %v4753_v59 = vmul.f32 0.70710677, %v1657_v54  ;;  %v1658_v60 = vadd.f32 %v4111_v48, %v1651_v55  ;;  %2166 = vmatprep.mubr.bf16.mxu1 %v1731_v57  ;;  %2395 = vmatpush1.bf16.msra.mxu0 %v3764_v40  ;;  %v3772_v44 = vld [vmem:[%s4569_s19 + $0xa4] ss:$8 sps:$4 sm:$0xff]   ;;  %v3770_v49 = vld [vmem:[%s4569_s19 + $0xa0] ss:$8 sps:$4 sm:$0xff]  }
 0x3df   : >> { %v3195_v62 = vpack.c.bf16 %v1691_v58, %v4139_v53  ;;  %v1716_v27 = vsel %vm1713_vm12, %v1709_v25, %v1710_v23  ;;  %2396 = vmatprep.subr.bf16.mxu0 %v3769_v41  ;;  %v3778_v54 = vld [vmem:[%s4569_s19 + $0xc4] ss:$8 sps:$4 sm:$0xff]   ;;  %v3776_v55 = vld [vmem:[%s4569_s19 + $0xc0] ss:$8 sps:$4 sm:$0xff]   ;;  %v3781_v56 = vld [vmem:[%s4569_s19 + $0xd4] ss:$8 sps:$4 sm:$0xff]  }
 0x3e0   : >> { %v1678_v63 = vadd.f32 %v3077_v31, %v4753_v59  ;;  %v4761_v0 = vmul.f32 0.70710677, %v1658_v60  ;;  %v3779_v57 = vld [vmem:[%s4569_s19 + $0xd0] ss:$8 sps:$4 sm:$0xff]   ;;  %v3784_v58 = vld [vmem:[%s4569_s19 + $0xe4] ss:$8 sps:$4 sm:$0xff]  }
 0x3e1   : >> { %3196 = vmatmul.mubr.msk.bf16.vlgmr.msra.gmra.mrb[8].mxu1 %vm3194_vm11, %v3195_v62  ;;  %v3782_v60 = vld [vmem:[%s4569_s19 + $0xe0] ss:$8 sps:$4 sm:$0xff]   ;;  %v3785_v62 = vld [vmem:[%s4569_s19 + $0xf0] ss:$8 sps:$4 sm:$0xff]  }
 0x3e2   : >> { %v1679_v1 = vadd.f32 %v3077_v31, %v4761_v0  ;;  %2188 = vmatpush1.bf16.msra.mxu1 %v3740_v61  ;;  %v1686_v48 = vrot.slane %v1678_v63, 6  ;;  %v1711_v19 = vrot.slane %v1678_v63, 2  ;;  %2397 = vmatpush1.bf16.msra.mxu0 %v3767_v42  ;;  %v3787_v61 = vld [vmem:[%s4569_s19 + $0xf4] ss:$8 sps:$4 sm:$0xff]  }
 0x3e3   : >> { %2189 = vmatprep.subr.bf16.mxu1 %v3745_v43  ;;  %2398 = vmatprep.subr.bf16.mxu0 %v3772_v44  ;;  %v3086_v43 = vld [vmem:[%s4653_s18 + $0x2] sm:$0x3] }
 0x3e4   : >> { %v1734_v4 = vpack.c.bf16 %v1679_v1, %v1678_v63  ;;  %v1687_v5 = vrot.slane %v1679_v1, 6  ;;  %v1690_v11 = vsel %vm1688_vm9, %v1685_v45, %v1686_v48  ;;  %v1715_v26 = vsel %vm1713_vm12, %v1710_v23, %v1711_v19  ;;  %v3773_v45 = vld [vmem:[%s4569_s19 + $0xb0] ss:$8 sps:$4 sm:$0xff]   ;;  %v3145_v63 = vld [vmem:[%s4659_s23 + $0x2] sm:$0x3]  ;;  %s3977_s23 = scalar_lea.vmem (%p856_p1), %s4857_s29, 256 }
 0x3e5   : >> { %v1732_v28 = vpack.c.bf16 %v1715_v26, %v1716_v27  ;;  %v1712_v29 = vrot.slane %v1679_v1, 2  ;;  %v1750_v1 = vrot.slane %v3086_v43, %v4662_v37  ;;  %p3978_p5 = scmp.ne.s32.totalorder (%p856_p1), %s4857_s29, %s3977_s23  ;;  %p3985_p4 = scmp.lt.s32.totalorder (%p856_p1), %s3983_s28, %s3977_s23 }
 0x3e6   : >> { %2190 = vmatpush1.bf16.msra.mxu1 %v3743_v2  ;;  %2176 = vmatprep.mubr.bf16.mxu1 %v1734_v4  ;;  %v1689_v10 = vsel %vm1688_vm9, %v1686_v48, %v1687_v5  ;;  %v1887_v2 = vrot.slane %v3145_v63, %v4662_v37 }
 0x3e7   : >> { %2191 = vmatprep.subr.bf16.mxu1 %v3748_v3  ;;  %v1733_v12 = vpack.c.bf16 %v1689_v10, %v1690_v11  ;;  %v1714_v31 = vsel %vm1713_vm12, %v1711_v19, %v1712_v29  ;;  %2399 = vmatpush1.bf16.msra.mxu0 %v3770_v49  ;;  %p3986_p8 = por (%p856_p1), %p3985_p4, %p3984_p12 }
 0x3e8   : >> { %v3198_v34 = vpack.c.bf16 %v4139_v53, %v1714_v31  ;;  %v3775_v53 = vld [vmem:[%s4569_s19 + $0xb4] ss:$8 sps:$4 sm:$0xff]   ;;  %v3362_v48 = vadd.f32 %v1887_v2, %v1750_v1  ;;  %v3224_v2 = vld [vmem:[%s4720_s12 + $0x2] sm:$0x3]  ;;  %s4986_s19 = sld [smem:[#allocation23_spill]] (%p856_p1) }
 0x3e9   : >> { %2177 = vmatmul.mubr.bf16.gmra.mrb[12].mxu1 %v1733_v12  ;;  %2400 = vmatprep.subr.bf16.mxu0 %v3775_v53 }
 0x3ea   : >> { %2192 = vmatpush1.bf16.msra.mxu1 %v3746_v7  ;;  %2219 = vmatprep.mubr.bf16.mxu1 %v4138_v52 }
 0x3eb   : >> { %2193 = vmatprep.subr.bf16.mxu1 %v3751_v13  ;;  %2401 = vmatpush1.bf16.msra.mxu0 %v3773_v45  ;;  %v1754_v13 = vrot.slane %v3086_v43, %v4669_v47 }
 0x3ec   : >> { %2402 = vmatprep.subr.bf16.mxu0 %v3778_v54 }
 0x3ee   : >> { %2194 = vmatpush1.bf16.msra.mxu1 %v3749_v14  ;;  %v1891_v14 = vrot.slane %v3145_v63, %v4669_v47  ;;  %p4989_p6 = scmp.ne.s32.totalorder (%p856_p1), %s4986_s19, 0 }
 0x3ef   : >> { %2195 = vmatprep.subr.bf16.mxu1 %v3754_v18  ;;  %2403 = vmatpush1.bf16.msra.mxu0 %v3776_v55 }
 0x3f0   : >> { %2404 = vmatprep.subr.bf16.mxu0 %v3781_v56  ;;  %p3979_p7 = pnand (%p856_p1), %p3978_p5, %p4989_p6 }
 0x3f2   : >> { %2196 = vmatpush1.bf16.msra.mxu1 %v3752_v20  ;;  %p3980_p9 = pneg (%p856_p1), %p3979_p7 }
 0x3f3   : >> { %2197 = vmatprep.subr.bf16.mxu1 %v3757_v21  ;;  %2405 = vmatpush1.bf16.msra.mxu0 %v3779_v57  ;;  %v3364_v21 = vadd.f32 %v1891_v14, %v1754_v13 }
 0x3f4   : >> { %2406 = vmatprep.subr.bf16.mxu0 %v3784_v58  ;;  %p3987_p10 = pnand (%p856_p1), %p3986_p8, %p3980_p9 }
 0x3f6   : >> { %2198 = vmatpush1.bf16.msra.mxu1 %v3755_v16 }
 0x3f7   : >> { %2199 = vmatprep.subr.bf16.mxu1 %v3760_v17  ;;  %2407 = vmatpush1.bf16.msra.mxu0 %v3782_v60 }
 0x3f8   : >> { %2408 = vmatprep.subr.bf16.mxu0 %v3787_v61 }
 0x3fa   : >> { %2200 = vmatpush1.bf16.msra.mxu1 %v3758_v8 }
 0x3fb   : >> { %2201 = vmatprep.subr.bf16.mxu1 %v3763_v15  ;;  %2409 = vmatpush1.bf16.msra.mxu0 %v3785_v62 }
 0x3fe   : >> { %2202 = vmatpush1.bf16.msra.mxu1 %v3761_v24 }
 0x401   : >> { %2220 = vmatmul.mubr.bf16.vlgmr.msra.gmra.mrb[8].mxu1 %v1732_v28 }
 0x402   : >> { %2229 = vmatprep.mubr.bf16.mxu1 %v4138_v52 }
 0x409   : >> { %3199 = vmatmul.mubr.msk.bf16.gmra.mrb[12].mxu1 %vm3197_vm14, %v3198_v34 }
 0x4d4   : >> { %v2221_v3 = vpop.f32.mrb[8].mxu1 }
 0x4d5   : >> { %v3363_v4 = vadd.f32 %v3362_v48, %v2221_v3  ;;  %v2223_v5 = vpop.f32.mrb[9].mxu1  ;;  %v2307_v3 = vrot.slane %v3224_v2, %v4662_v37 }
 0x4d6   : >> { %v2225_v7 = vpop.f32.mrb[10].mxu1  ;;  %v3365_v24 = vadd.f32 %v3364_v21, %v2223_v5 }
 0x4d7   : >> { %v3200_v10 = vmul.f32 -1.442695, %v3363_v4  ;;  %v3367_v11 = vadd.f32 %v3362_v48, %v2225_v7  ;;  %v2227_v12 = vpop.f32.mrb[11].mxu1  ;;  %v2311_v7 = vrot.slane %v3224_v2, %v4669_v47 }
 0x4d8   : >> { %v3369_v27 = vadd.f32 %v3364_v21, %v2227_v12 }
 0x4d9   : >> { %3812 = vpow2.f32 %v3200_v10  ;;  %v3201_v18 = vmul.f32 -1.442695, %v3367_v11 }
 0x4db   : >> { %3814 = vpow2.f32 %v3201_v18 }
 0x4dc   : >> { %v2231_v20 = vpop.f32.mrb[12].mxu1 }
 0x4dd   : >> { %v3371_v16 = vadd.f32 %v3362_v48, %v2231_v20  ;;  %v2233_v17 = vpop.f32.mrb[13].mxu1 }
 0x4de   : >> { %v2235_v8 = vpop.f32.mrb[14].mxu1  ;;  %v3373_v34 = vadd.f32 %v3364_v21, %v2233_v17 }
 0x4df   : >> { %v3202_v15 = vmul.f32 -1.442695, %v3371_v16  ;;  %v3375_v19 = vadd.f32 %v3362_v48, %v2235_v8  ;;  %v2237_v23 = vpop.f32.mrb[15].mxu1  ;;  %v1519_v48 = vrot.slane %v4723_v22, %v4669_v47 }
 0x4e0   : >> { %v3377_v40 = vadd.f32 %v3364_v21, %v2237_v23 }
 0x4e1   : >> { %3816 = vpow2.f32 %v3202_v15  ;;  %v3203_v25 = vmul.f32 -1.442695, %v3375_v19  ;;  %v1643_v4 = vadd.f32 %v4728_v30, %v1519_v48  ;;  %v1649_v37 = vadd.f32 %v4742_v46, %v1519_v48 }
 0x4e3   : >> { %v3813_v26 = vpop.eup %3812  ;;  %3818 = vpow2.f32 %v3203_v25  ;;  %v1664_v18 = vadd.f32 %v4107_v51, %v1643_v4  ;;  %v1665_v8 = vadd.f32 %v4103_v50, %v1649_v37 }
 0x4e4   : >> { %v2260_v28 = vadd.f32 1.0, %v3813_v26  ;;  %3820 = vtanh.f32 %v3365_v24  ;;  %v3838_v26 = vld [vmem:[#allocation9 + $0x10] sm:$0xff] (%p856_p1)  }
 0x4e5   : >> { %v3815_v29 = vpop.eup %3814 }
 0x4e6   : >> { %3822 = vrcp.f32 %v2260_v28  ;;  %v2261_v31 = vadd.f32 1.0, %v3815_v29  ;;  %v3839_v28 = vld [vmem:[#allocation9 + $0x18] sm:$0xff] (%p856_p1)   ;;  %v3845_v29 = vld [vmem:[#allocation10 + $0x8] sm:$0xff] (%p856_p1)  }
 0x4e7   : >> { %3824 = vtanh.f32 %v3369_v27  ;;  %v3844_v27 = vld [vmem:[#allocation10] sm:$0xff] (%p856_p1)  }
 0x4e8   : >> { %3826 = vrcp.f32 %v2261_v31  ;;  %v3849_v31 = vld [vmem:[#allocation10 + $0x28] sm:$0xff] (%p856_p1)  }
 0x4e9   : >> { %3828 = vtanh.f32 %v3373_v34 }
 0x4eb   : >> { %v3817_v38 = vpop.eup %3816 }
 0x4ec   : >> { %v2262_v41 = vadd.f32 1.0, %v3817_v38  ;;  %v3850_v38 = vld [vmem:[#allocation10 + $0x30] sm:$0xff] (%p856_p1)  }
 0x4ed   : >> { %v3819_v42 = vpop.eup %3818 }
 0x4ee   : >> { %3830 = vrcp.f32 %v2262_v41  ;;  %v2263_v44 = vadd.f32 1.0, %v3819_v42  ;;  %v3821_v49 = vpop.eup %3820  ;;  %v3241_v41 = vld [vmem:[%s4984_s14] ss:$0 sm:$0xff] (%p856_p1) }
 0x4ef   : >> { %3832 = vtanh.f32 %v3377_v40  ;;  %v3851_v40 = vld [vmem:[#allocation10 + $0x38] sm:$0xff] (%p856_p1)  }
 0x4f0   : >> { %v3823_v53 = vpop.eup %3822  ;;  %3834 = vrcp.f32 %v2263_v44 }
 0x4f1   : >> { %v3825_v45 = vpop.eup %3824  ;;  %v2276_v54 = vmul.f32 %v3823_v53, %v3821_v49 }
 0x4f2   : >> { %v3827_v55 = vpop.eup %3826 }
 0x4f3   : >> { %v2277_v56 = vmul.f32 %v3827_v55, %v3825_v45  ;;  %v3829_v58 = vpop.eup %3828 }
 0x4f5   : >> { %v2280_v57 = vpack.c.bf16 %v2277_v56, %v2276_v54 }
 0x4f7   : >> { %2427 = vmatmul.mubr.bf16.vlgmr.msra.gmra.mrb[8].mxu0 %v2280_v57 }
 0x4f8   : >> { %v3831_v60 = vpop.eup %3830  ;;  %2436 = vmatprep.mubr.bf16.mxu0 %v4138_v52 }
 0x4f9   : >> { %v3833_v61 = vpop.eup %3832  ;;  %v2278_v62 = vmul.f32 %v3831_v60, %v3829_v58  ;;  %v3250_v58 = vld [vmem:[%s4985_s8] ss:$0 sm:$0xff] (%p856_p1) }
 0x4fa   : >> { %v3835_v43 = vpop.eup %3834 }
 0x4fb   : >> { %v2279_v63 = vmul.f32 %v3835_v43, %v3833_v61 }
 0x4fd   : >> { %v2281_v1 = vpack.c.bf16 %v2279_v63, %v2278_v62 }
 0x4ff   : >> { %2437 = vmatmul.mubr.bf16.gmra.mrb[12].mxu0 %v2281_v1 }
 0x5ca   : >> { %v2428_v5 = vpop.f32.mrb[8].mxu0 }
 0x5cb   : >> { %v2429_v10 = vadd.f32 %v2428_v5, %v2307_v3  ;;  %v2430_v11 = vpop.f32.mrb[9].mxu0 }
 0x5cc   : >> { %v2432_v52 = vpop.f32.mrb[10].mxu0 }
 0x5cd   : >> { %v2447_v12 = vadd.f32 %v2429_v10, %v4731_v33  ;;  %v2433_v13 = vadd.f32 %v2432_v52, %v2307_v3  ;;  %v2434_v14 = vpop.f32.mrb[11].mxu0 }
 0x5ce   : >> { %v2435_v20 = vadd.f32 %v2434_v14, %v2311_v7 }
 0x5cf   : >> { %v2451_v21 = vmul.f32 0.70710677, %v2447_v12   ;;  %v2448_v22 = vadd.f32 %v2433_v13, %v4737_v39 }
 0x5d0   : >> { %v4822_v51 = vadd.f32 %v2435_v20, %v1664_v18  }
 0x5d1   : >> { %v2452_v49 = vmul.f32 0.70710677, %v2448_v22   ;;  %v4983_v46 = vmov %v2451_v21 }
 0x5d2   : >> { %v4980_v30 = vmov %v4822_v51  ;;  %v2438_v16 = vpop.f32.mrb[12].mxu0  ;;  %v3836_v46 = vld [vmem:[#allocation9] sm:$0xff] (%p856_p1)  }
 0x5d3   : >> { %v2439_v47 = vadd.f32 %v2438_v16, %v2307_v3  ;;  %v2440_v17 = vpop.f32.mrb[13].mxu0  ;;  %v4982_v51 = vmov %v4980_v30  ;;  %858 = sbr.rel (!%p856_p1) target bundleno = 413 (0x19d), region = 175 }
 0x5d4   : >> { %v2441_v15 = vadd.f32 %v2440_v17, %v2311_v7  ;;  %v2442_v33 = vpop.f32.mrb[14].mxu0  ;;  %v3843_v51 = vld [vmem:[#allocation9 + $0x38] sm:$0xff] (%p856_p1)  }
 0x5d5   : >> { %v2449_v19 = vadd.f32 %v2439_v47, %v4753_v59  ;;  %v2443_v23 = vadd.f32 %v2442_v33, %v2307_v3  ;;  %v2444_v24 = vpop.f32.mrb[15].mxu0  ;;  %v4141_v59 = vmov (%p856_p1), 0.0  }
 0x5d6   : >> { %v2457_v25 = vadd.f32 %v2441_v15, %v1665_v8   ;;  %3306 = vmatprep.subr.bf16.mxu0 (%p856_p1), %v4141_v59  ;;  %3326 = vmatprep.subr.bf16.mxu1 (%p856_p1), %v4141_v59 }
 0x5d7   : >> { %v2453_v43 = vmul.f32 0.70710677, %v2449_v19   ;;  %v2450_v39 = vadd.f32 %v2443_v23, %v4761_v0  ;;  %3307 = vmatpush3.bf16.msra.mxu0 (%p856_p1), %v3836_v46  ;;  %v3837_v0 = vld [vmem:[#allocation9 + $0x8] sm:$0xff] (%p856_p1)   ;;  %3322 = vmatprep.mubr.msk.bf16.mxu0 (%p856_p1), %vm4142_vm15, %v4141_v59 }
 0x5d8   : >> { %v4981_v50 = vmov %v2457_v25  ;;  %3308 = vmatprep.subr.bf16.mxu0 (%p856_p1), %v4141_v59  ;;  %3342 = vmatprep.mubr.msk.bf16.mxu1 (%p856_p1), %vm4142_vm15, %v4141_v59  ;;  %v2459_v34 = vpack.c.bf16 (%p856_p1), %v2457_v25, %v4980_v30 }
 0x5d9   : >> { %v2454_v48 = vmul.f32 0.70710677, %v2450_v39   ;;  %3327 = vmatpush3.bf16.msra.mxu1 (%p856_p1), %v3844_v27  ;;  %v3848_v50 = vld [vmem:[#allocation10 + $0x20] sm:$0xff] (%p856_p1)  }
 0x5da   : > { %3328 = vmatprep.subr.bf16.mxu1 %v4141_v59 }
 0x5db   : > { %3309 = vmatpush3.bf16.msra.mxu0 %v3837_v0 }
 0x5dc   : > { %3310 = vmatprep.subr.bf16.mxu0 %v4141_v59 }
 0x5dd   : > { %3329 = vmatpush3.bf16.msra.mxu1 %v3845_v29 }
 0x5de   : > { %3330 = vmatprep.subr.bf16.mxu1 %v4141_v59 }
 0x5df   : > { %3311 = vmatpush3.bf16.msra.mxu0 %v3838_v26 }
 0x5e0   : > { %3312 = vmatprep.subr.bf16.mxu0 %v4141_v59 }
 0x5e1   : > { %3331 = vmatpush3.bf16.msra.mxu1 %v3846_v9 }
 0x5e2   : > { %3332 = vmatprep.subr.bf16.mxu1 %v4141_v59 }
 0x5e3   : > { %3313 = vmatpush3.bf16.msra.mxu0 %v3839_v28 }
 0x5e4   : > { %3314 = vmatprep.subr.bf16.mxu0 %v4141_v59 }
 0x5e5   : > { %3333 = vmatpush3.bf16.msra.mxu1 %v3847_v35 }
 0x5e6   : > { %3334 = vmatprep.subr.bf16.mxu1 %v4141_v59 }
 0x5e7   : > { %3315 = vmatpush3.bf16.msra.mxu0 %v3840_v6 }
 0x5e8   : > { %3316 = vmatprep.subr.bf16.mxu0 %v4141_v59 }
 0x5e9   : > { %3335 = vmatpush3.bf16.msra.mxu1 %v3848_v50 }
 0x5ea   : > { %3336 = vmatprep.subr.bf16.mxu1 %v4141_v59 }
 0x5eb   : > { %3317 = vmatpush3.bf16.msra.mxu0 %v3841_v32 }
 0x5ec   : > { %3318 = vmatprep.subr.bf16.mxu0 %v4141_v59 }
 0x5ed   : > { %3337 = vmatpush3.bf16.msra.mxu1 %v3849_v31 }
 0x5ee   : > { %3338 = vmatprep.subr.bf16.mxu1 %v4141_v59 }
 0x5ef   : > { %3319 = vmatpush3.bf16.msra.mxu0 %v3842_v36 }
 0x5f0   : > { %3320 = vmatprep.subr.bf16.mxu0 %v4141_v59 }
 0x5f1   : > { %3339 = vmatpush3.bf16.msra.mxu1 %v3850_v38 }
 0x5f2   : > { %3340 = vmatprep.subr.bf16.mxu1 %v4141_v59 }
 0x5f3   : > { %3321 = vmatpush3.bf16.msra.mxu0 %v3843_v51 }
 0x5f5   : > { %3341 = vmatpush3.bf16.msra.mxu1 %v3851_v40 }
 0x5f6   : > { %3323 = vmatmul.mubr.bf16.vlgmr.msra.gmra.mrb[0].mxu0 %v2459_v34 }
 0x6c9   : > { %v2565_v42 = vpop.f32.mrb[0].mxu0 }
 0x6ca   : > { %v2566_v44 = vadd.f32 %v3241_v41, %v2565_v42  ;;  %v3324_v49 = vpop.f32.mrb[1].mxu0 }
 0x6cb   : > { %v2568_v53 = vpop.f32.mrb[2].mxu0 }
 0x6cc   : > { %v2569_v45 = vadd.f32 %v3241_v41, %v2568_v53  ;;  %v3325_v54 = vpop.f32.mrb[3].mxu0  ;;  %v2572_v55 = vmax.f32 %v2566_v44, 0.0 }
 0x6ce   : > { %v2573_v56 = vmax.f32 %v2569_v45, 0.0 }
 0x6d0   : > { %v2574_v57 = vpack.c.bf16 %v2573_v56, %v2572_v55 }
 0x6d2   : > { %3343 = vmatmul.mubr.bf16.vlgmr.msra.gmra.mrb[0].mxu1 %v2574_v57 }
 0x7a5   : > { %v2680_v60 = vpop.f32.mrb[0].mxu1 }
 0x7a6   : > { %v2681_v61 = vadd.f32 %v3250_v58, %v2680_v60  ;;  %v3344_v62 = vpop.f32.mrb[1].mxu1 }
 0x7a7   : > { %v2683_v43 = vpop.f32.mrb[2].mxu1 }
 0x7a8   : > { %2687 = vst [vmem:[%s4466_s7] sm:$0xff] %v2681_v61  ;;  %v2684_v63 = vadd.f32 %v3250_v58, %v2683_v43  ;;  %v3345_v1 = vpop.f32.mrb[3].mxu1 }
 0x7aa   : > { %2688 = vst [vmem:[%s4466_s7 + $0x8] sm:$0xff] %v2684_v63 }
 0x7ab   : > { %3990 = shalt.err (!%p3987_p10)
}
 0x7ac   : > { %s3991_s7 = scalar_lea.hbm %s4855_s5, 256  ;;  %s3995_s24 = scalar_lea.hbm %s4987_s16, 512 }
 0x7ad   : > { %p3992_p11 = scmp.ne.s32.totalorder %s4855_s5, %s3991_s7  ;;  %p3996_p3 = scmp.lt.u32.totalorder %s4855_s5, %s4987_s16 }
 0x7ae   : > { %p3997_p13 = scmp.lt.u32.totalorder %s3995_s24, %s3991_s7  ;;  %p3999_p5 = scmp.lt.u32.totalorder %s3991_s7, %s4855_s5 }
 0x7af   : > { %p3993_p0 = pnand %p3992_p11, %p4989_p6 }
 0x7b0   : > { %p3998_p1 = por %p3997_p13, %p3996_p3 }
 0x7b1   : > { %p3994_p2 = pneg %p3993_p0 }
 0x7b2   : > { %p4000_p7 = por %p3999_p5, %p3998_p1 }
 0x7b4   : > { %p4001_p9 = pnand %p4000_p7, %p3994_p2 }
 0x7b6   : > { %4004 = shalt.err (!%p4001_p9)
}
 0x7b7   : > { %s4144_s20 = smov 128   ;;  %s4145_s8 = smov 8  }
 0x7b8   : > { %3430 = dma.vmem_to_hbm [thread:$0]  (%p4989_p6), %s4857_s29, 256, %s4855_s5, %s4863_s11, %s4144_s20, %s4144_s20, %s4145_s8  }
 0x7b9 PF: > { %s4990_s30 = sld [smem:[#allocation21_spill]]  ;;  %s4991_s22 = sld [smem:[#allocation18_spill]] }
 0x7ba   : > { %s4992_s18 = sld [smem:[#allocation24_spill]] }
 0x7bf   : > { %p3462_p12 = scmp.ge.s32.totalorder %s4990_s30, 2  ;;  %s2720_s27 = sand.u32 1, %s4991_s22  }
 0x7c0   : > { %p4993_p4 = scmp.ne.s32.totalorder %s4992_s18, 0  ;;  %s2721_s23 = scalar_lea.sflag [#allocation4], %s2720_s27 }
 0x7c2   : > { %p3449_p8 = pnand %p3462_p12, %p4993_p4 }
 0x7c4   : > { %4074 = dma.done.wait (!%p3449_p8), %s2721_s23, 256  }
 0x7c5   : > { %4076 = vsyncadd (!%p3449_p8), %s2721_s23, 4294967040  ;;  %s34_s29 = sadd.s32 1, %s4990_s30   ;;  %s4994_s26 = sld [smem:[#allocation19_spill]] }
 0x7c6   : > { %p31_p10 = scmp.ge.s32.totalorder %s34_s29, 4   ;;  %s4995_s0 = sld [smem:[#allocation25_spill]] }
 0x7c7   : > { %s4996_s27 = sld [smem:[#allocation20_spill]]  ;;  %s4997_s28 = sld [smem:[#allocation22_spill]] }
 0x7c8   : > { %s4998_s24 = smov %s4083_s25  ;;  %33 = sbr.rel (!%p31_p10) target bundleno = 19 (0x13), region = 186 }
 0x7cb   : > { %s4999_s25 = smov %s4994_s26 }
 0x7cc   : > { %s5000_s26 = smov %s4995_s0 }
 0x7cf   :  { %2726 = vsyncpa [#allocation3], 1 }
 0x7d0   :  { %2728 = vsyncpa [#allocation3 + $0x1], 1 }
 0x7d1   :  { %2729 = vsyncpa [#allocation8], 1 }
 0x7d2   :  { %2730 = vsyncpa [#allocation11], 1 }
 0x7d3   :  { %2731 = vsyncpa [#allocation4], 1 }
 0x7d4   :  { %2733 = vsyncpa [#allocation4 + $0x1], 1 }
 0x7d5   :  { %2734 = vsyncpa [#allocation5], 1 }
 0x7d6   :  { %2736 = vsyncpa [#allocation5 + $0x1], 1 }

</bundles_post_ra>
